<compile_context>
chip_gen: v5e
topology: v5e:2x2
jax: 0.10.0
libtpu: 0.0.40
codegen_flags: <defaults>
</compile_context>

<pallas_src>
import functools
import math

import jax
import jax.numpy as jnp
from jax.experimental import pallas as pl
from jax.experimental.pallas import tpu as pltpu


# ----------------------------------------------------------------------------
# Fused BERT encoder layer:
#   head-batched attention -> Wo -> add&LN1 -> FFN(GELU) -> add&LN2
# ----------------------------------------------------------------------------
def _encoder_layer_kernel(x_ref, mbias_ref, wq_ref, wk_ref, wv_ref, bqkv_ref,
                          wo_ref, bo_ref, ln1_ref, w1_ref, b1_ref, w2_ref,
                          b2_ref, ln2_ref, o_ref):
    x = x_ref[0]                                     # (S, H) f32
    S, H = x.shape
    nH, _, Dh = wq_ref.shape
    scale = 1.0 / math.sqrt(Dh)

    xb = x.astype(jnp.bfloat16)
    xh = jnp.broadcast_to(xb[None], (nH, S, H))      # head-batched lhs

    bqkv = bqkv_ref[...]                             # (3, nH, 1, Dh) f32
    # Head-batched QKV projections (batched dot_general, natural output order).
    q = jnp.einsum('nsh,nhd->nsd', xh, wq_ref[...],
                   preferred_element_type=jnp.float32) + bqkv[0]
    k = jnp.einsum('nsh,nhd->nsd', xh, wk_ref[...],
                   preferred_element_type=jnp.float32) + bqkv[1]
    v = jnp.einsum('nsh,nhd->nsd', xh, wv_ref[...],
                   preferred_element_type=jnp.float32) + bqkv[2]

    # Scores (nH, S, S), softmax over keys — elementwise math in f32.
    s = jnp.einsum('nsd,ntd->nst', q.astype(jnp.bfloat16), k.astype(jnp.bfloat16),
                   preferred_element_type=jnp.float32) * scale
    s = s + mbias_ref[...]                           # (1,1,S) broadcast over keys
    s = s - jnp.max(s, axis=-1, keepdims=True)
    p = jnp.exp(s)
    p = p * pl.reciprocal(jnp.sum(p, axis=-1, keepdims=True), approx=True)

    ctx = jnp.einsum('nst,ntd->nsd', p.astype(jnp.bfloat16), v.astype(jnp.bfloat16),
                     preferred_element_type=jnp.float32)

    # Head re-merge folded into the output projection: per-head (S,H) partials
    # summed over the leading head axis (no lane concat / relayout).
    attn = jnp.einsum('nsd,ndh->nsh', ctx.astype(jnp.bfloat16), wo_ref[...],
                      preferred_element_type=jnp.float32)
    attn = jnp.sum(attn, axis=0) + bo_ref[...]       # (S, H)

    # Residual + LayerNorm 1 (f32).
    y = x + attn
    mu = jnp.mean(y, axis=-1, keepdims=True)
    var = jnp.mean((y - mu) ** 2, axis=-1, keepdims=True)
    y = (y - mu) * jax.lax.rsqrt(var + 1e-12)
    ln1 = ln1_ref[...]
    y = y * ln1[0:1] + ln1[1:2]

    # FFN: W1 + GELU -> W2, bf16 matmuls, f32 accumulation and elementwise.
    h = (jnp.dot(y.astype(jnp.bfloat16), w1_ref[...],
                 preferred_element_type=jnp.float32) + b1_ref[...])
    h = jax.nn.gelu(h, approximate=True)
    f = (jnp.dot(h.astype(jnp.bfloat16), w2_ref[...],
                 preferred_element_type=jnp.float32) + b2_ref[...])

    # Residual + LayerNorm 2.
    z = y + f
    mu = jnp.mean(z, axis=-1, keepdims=True)
    var = jnp.mean((z - mu) ** 2, axis=-1, keepdims=True)
    z = (z - mu) * jax.lax.rsqrt(var + 1e-12)
    ln2 = ln2_ref[...]
    o_ref[0] = (z * ln2[0:1] + ln2[1:2]).astype(o_ref.dtype)


def encoder_layer(x, mbias, lp, num_heads):
    """x:(B,S,H) f32, mbias:(B,1,S) -> (B,S,H). One fused transformer layer."""
    B, S, H = x.shape
    nH = num_heads
    Dh = H // nH
    I = lp["W1"].shape[1]
    return pl.pallas_call(
        _encoder_layer_kernel,
        grid=(B,),
        in_specs=[
            pl.BlockSpec((1, S, H), lambda b: (b, 0, 0)),
            pl.BlockSpec((1, 1, S), lambda b: (b, 0, 0)),
            pl.BlockSpec((nH, H, Dh), lambda b: (0, 0, 0)),
            pl.BlockSpec((nH, H, Dh), lambda b: (0, 0, 0)),
            pl.BlockSpec((nH, H, Dh), lambda b: (0, 0, 0)),
            pl.BlockSpec((3, nH, 1, Dh), lambda b: (0, 0, 0, 0)),
            pl.BlockSpec((nH, Dh, H), lambda b: (0, 0, 0)),
            pl.BlockSpec((1, H), lambda b: (0, 0)),
            pl.BlockSpec((2, H), lambda b: (0, 0)),
            pl.BlockSpec((H, I), lambda b: (0, 0)),
            pl.BlockSpec((1, I), lambda b: (0, 0)),
            pl.BlockSpec((I, H), lambda b: (0, 0)),
            pl.BlockSpec((1, H), lambda b: (0, 0)),
            pl.BlockSpec((2, H), lambda b: (0, 0)),
        ],
        out_specs=pl.BlockSpec((1, S, H), lambda b: (b, 0, 0)),
        out_shape=jax.ShapeDtypeStruct((B, S, H), jnp.float32),
        compiler_params=pltpu.CompilerParams(dimension_semantics=("parallel",)),
    )(x, mbias, lp["Wq"], lp["Wk"], lp["Wv"], lp["bqkv"], lp["Wo"], lp["bo"],
      lp["ln1"], lp["W1"], lp["b1"], lp["W2"], lp["b2"], lp["ln2"])


# ----------------------------------------------------------------------------
# LayerNorm (embeddings only)
# ----------------------------------------------------------------------------
def _layernorm_kernel(x_ref, g_ref, b_ref, o_ref):
    x = x_ref[...].astype(jnp.float32)
    mu = jnp.mean(x, axis=-1, keepdims=True)
    var = jnp.mean((x - mu) ** 2, axis=-1, keepdims=True)
    y = (x - mu) * jax.lax.rsqrt(var + 1e-12)
    o_ref[...] = (y * g_ref[...] + b_ref[...]).astype(o_ref.dtype)


def layernorm(x, g, b):
    M, H = x.shape
    tm = M if M <= 1024 else 1024
    assert M % tm == 0
    return pl.pallas_call(
        _layernorm_kernel,
        grid=(M // tm,),
        in_specs=[pl.BlockSpec((tm, H), lambda m: (m, 0)),
                  pl.BlockSpec((1, H), lambda m: (0, 0)),
                  pl.BlockSpec((1, H), lambda m: (0, 0))],
        out_specs=pl.BlockSpec((tm, H), lambda m: (m, 0)),
        out_shape=jax.ShapeDtypeStruct((M, H), jnp.float32),
        compiler_params=pltpu.CompilerParams(dimension_semantics=("parallel",)),
    )(x, g.reshape(1, H), b.reshape(1, H))


# ----------------------------------------------------------------------------
# LSTM layer: fused input projection + recurrence, gate-major weight layout
# ----------------------------------------------------------------------------
def _lstm_kernel(x_ref, wih_ref, whh_ref, b_ref, o_ref,
                 gxi_ref, gxf_ref, gxg_ref, gxo_ref):
    # x_ref: (S, B, In) f32; wih: (4, In, Hl) bf16; whh: (4, Hl, Hl) bf16;
    # b: (4, 1, Hl) f32 (b_ih + b_hh folded); o_ref: (S, B, Hl) f32.
    S, B, In = x_ref.shape
    Hl = whh_ref.shape[-1]

    # Time-invariant input projection hoisted out of the recurrence, done once
    # per gate (gate index = leading axis, no lane slicing), result kept in
    # VMEM scratch so the serial loop only reads (B, Hl) rows per step.
    x2d = x_ref[...].reshape(S * B, In).astype(jnp.bfloat16)
    gxi_ref[...] = jnp.dot(x2d, wih_ref[0], preferred_element_type=jnp.float32) + b_ref[0]
    gxf_ref[...] = jnp.dot(x2d, wih_ref[1], preferred_element_type=jnp.float32) + b_ref[1]
    gxg_ref[...] = jnp.dot(x2d, wih_ref[2], preferred_element_type=jnp.float32) + b_ref[2]
    gxo_ref[...] = jnp.dot(x2d, wih_ref[3], preferred_element_type=jnp.float32) + b_ref[3]

    def step(t, carry):
        h, c = carry
        hb = h.astype(jnp.bfloat16)
        rows = pl.ds(t * B, B)
        i = jax.nn.sigmoid(gxi_ref[rows] +
                           jnp.dot(hb, whh_ref[0], preferred_element_type=jnp.float32))
        f = jax.nn.sigmoid(gxf_ref[rows] +
                           jnp.dot(hb, whh_ref[1], preferred_element_type=jnp.float32))
        g = jnp.tanh(gxg_ref[rows] +
                     jnp.dot(hb, whh_ref[2], preferred_element_type=jnp.float32))
        o = jax.nn.sigmoid(gxo_ref[rows] +
                           jnp.dot(hb, whh_ref[3], preferred_element_type=jnp.float32))
        c_new = f * c + i * g
        h_new = o * jnp.tanh(c_new)
        o_ref[t] = h_new.astype(o_ref.dtype)
        return h_new, c_new

    carry0 = (jnp.zeros((B, Hl), jnp.float32), jnp.zeros((B, Hl), jnp.float32))
    # TODO(synk): switch to unroll=4..8 for realistic seq lengths (>=64).
    jax.lax.fori_loop(0, S, step, carry0, unroll=True)


def lstm_layer(x_tm, wih, whh, b):
    """x_tm:(S,B,In) time-major -> (S,B,Hl). One pallas_call per LSTM layer."""
    S, B, In = x_tm.shape
    Hl = whh.shape[-1]
    return pl.pallas_call(
        _lstm_kernel,
        out_shape=jax.ShapeDtypeStruct((S, B, Hl), jnp.float32),
        scratch_shapes=[pltpu.VMEM((S * B, Hl), jnp.float32) for _ in range(4)],
    )(x_tm, wih, whh, b)


# ----------------------------------------------------------------------------
# Parameter init (deterministic, synthetic, bf16 matmul weights)
# ----------------------------------------------------------------------------
def init_params(key, cfg):
    keys = iter(jax.random.split(key, 256))

    def w(shape, scale=0.02, dtype=jnp.bfloat16):
        return (scale * jax.random.normal(next(keys), shape)).astype(dtype)

    H, I = cfg["hidden"], cfg["intermediate"]
    nH = cfg["heads"]
    Dh = H // nH

    def ln_params():
        return jnp.stack([jnp.ones((H,), jnp.float32), jnp.zeros((H,), jnp.float32)])

    p = {
        "word_emb": w((cfg["vocab"], H), dtype=jnp.float32),
        "pos_emb": w((cfg["max_pos"], H), dtype=jnp.float32),
        "type_emb": w((2, H), dtype=jnp.float32),
        "emb_ln_g": jnp.ones((H,), jnp.float32),
        "emb_ln_b": jnp.zeros((H,), jnp.float32),
        "layers": [],
        "lstm": [],
    }
    for _ in range(cfg["bert_layers"]):
        p["layers"].append({
            # head-major layouts: no per-head lane slicing needed in the kernel
            "Wq": w((nH, H, Dh)), "Wk": w((nH, H, Dh)), "Wv": w((nH, H, Dh)),
            "bqkv": jnp.zeros((3, nH, 1, Dh), jnp.float32),
            "Wo": w((nH, Dh, H)), "bo": jnp.zeros((1, H), jnp.float32),
            "ln1": ln_params(),
            "W1": w((H, I)), "b1": jnp.zeros((1, I), jnp.float32),
            "W2": w((I, H)), "b2": jnp.zeros((1, H), jnp.float32),
            "ln2": ln_params(),
        })
    Hl = cfg["lstm_hidden"]
    in_dim = H
    for _ in range(cfg["lstm_layers"]):
        p["lstm"].append({
            # gate-major layouts (PyTorch gate order i, f, g, o on axis 0)
            "wih": w((4, in_dim, Hl), 0.1),
            "whh": w((4, Hl, Hl), 0.1),
            "b": jnp.zeros((4, 1, Hl), jnp.float32),   # b_ih + b_hh folded
        })
        in_dim = Hl
    p["Wc"] = w((Hl, cfg["num_labels"]), 0.1, jnp.float32)
    p["bc"] = jnp.zeros((cfg["num_labels"],), jnp.float32)
    return p


# ----------------------------------------------------------------------------
# Forward pass
# ----------------------------------------------------------------------------
def bert_lstm_classifier_forward(params, input_ids, attention_mask, cfg):
    B, S = input_ids.shape
    H = cfg["hidden"]
    nH = cfg["heads"]

    # --- BERT embeddings (gathers are XLA glue) ---
    x = (params["word_emb"][input_ids]
         + params["pos_emb"][:S][None, :, :]
         + params["type_emb"][0][None, None, :])              # (B, S, H)
    x = layernorm(x.reshape(B * S, H), params["emb_ln_g"], params["emb_ln_b"])
    x = x.reshape(B, S, H)

    # additive attention-mask bias over keys: (B, 1, S)
    mbias = ((1.0 - attention_mask.astype(jnp.float32)) * -1e9)[:, None, :]

    # --- BERT encoder: one fused kernel per layer ---
    for lp in params["layers"]:
        x = encoder_layer(x, mbias, lp, nH)                   # (B, S, H)

    last_hidden = x

    # --- LSTM (2 layers, unidirectional, batch_first semantics) ---
    y = jnp.transpose(last_hidden, (1, 0, 2))                 # time-major (S,B,H)
    for lp in params["lstm"]:
        y = lstm_layer(y, lp["wih"], lp["whh"], lp["b"])      # (S, B, Hl)
    lstm_out = jnp.transpose(y, (1, 0, 2))                    # (B, S, Hl)

    # Matches the PyTorch spec: lstm_output[:, 0, :]
    cls_output = lstm_out[:, 0, :]                            # (B, Hl)
    # dropout(p=0.0) is the identity.
    # Tiny classifier (Hl -> num_labels) kept in plain JAX: a Pallas launch
    # would cost more than the math at this size.
    logits = cls_output @ params["Wc"] + params["bc"]         # (B, num_labels)
    return logits


# ----------------------------------------------------------------------------
# Main
# ----------------------------------------------------------------------------
if __name__ == "__main__":
    cfg = dict(
        vocab=50, max_pos=16, hidden=32, heads=4, intermediate=64,
        bert_layers=2, lstm_hidden=16, lstm_layers=2, num_labels=3,
    )
    B, S = 2, 8

    key = jax.random.PRNGKey(0)
    k_ids, k_params = jax.random.split(key)

    input_ids = jax.random.randint(k_ids, (B, S), 0, cfg["vocab"], dtype=jnp.int32)
    attention_mask = jnp.array(
        [[1, 1, 1, 1, 1, 1, 1, 1],
         [1, 1, 1, 1, 1, 0, 0, 0]], dtype=jnp.int32)

    params = init_params(k_params, cfg)

    fwd = jax.jit(functools.partial(bert_lstm_classifier_forward, cfg=cfg))
    logits = fwd(params, input_ids, attention_mask)
    logits = jax.block_until_ready(logits)
    assert logits.shape == (B, cfg["num_labels"])
    assert bool(jnp.all(jnp.isfinite(logits)))
    print("KERNEL_OK")
</pallas_src>

<mosaic_0001>
module attributes {stable_mosaic.version = 11 : i64} {
  func.func @_layernorm_kernel(%arg0: i32, %arg1: memref<16x32xf32, #tpu.memory_space<vmem>>, %arg2: memref<1x32xf32, #tpu.memory_space<vmem>>, %arg3: memref<1x32xf32, #tpu.memory_space<vmem>>, %arg4: memref<16x32xf32, #tpu.memory_space<vmem>>) attributes {dimension_semantics = [#tpu.dimension_semantics<parallel>], iteration_bounds = array<i64: 1>, scalar_prefetch = 0 : i64, scratch_operands = 0 : i64, tpu.core_type = #tpu.core_type<tc>, window_params = [{transform_indices = @transform_0, window_bounds = array<i64: 16, 32>}, {pipeline_mode = #tpu.pipeline_mode<synchronous>, transform_indices = @transform_1, window_bounds = array<i64: 1, 32>}, {pipeline_mode = #tpu.pipeline_mode<synchronous>, transform_indices = @transform_2, window_bounds = array<i64: 1, 32>}, {transform_indices = @transform_3, window_bounds = array<i64: 16, 32>}]} {
    %c0 = arith.constant 0 : index
    %c0_0 = arith.constant 0 : index
    %0 = vector.load %arg1[%c0, %c0_0] : memref<16x32xf32, #tpu.memory_space<vmem>>, vector<16x32xf32>
    %cst = arith.constant dense<0.000000e+00> : vector<16xf32>
    %1 = vector.multi_reduction <add>, %0, %cst [1] : vector<16x32xf32> to vector<16xf32>
    %2 = vector.shape_cast %1 : vector<16xf32> to vector<16x1xf32>
    %cst_1 = arith.constant 3.200000e+01 : f32
    %3 = vector.broadcast %cst_1 : f32 to vector<16x1xf32>
    %4 = arith.divf %2, %3 : vector<16x1xf32>
    %5 = vector.broadcast %4 : vector<16x1xf32> to vector<16x32xf32>
    %6 = arith.subf %0, %5 : vector<16x32xf32>
    %7 = arith.mulf %6, %6 : vector<16x32xf32>
    %cst_2 = arith.constant dense<0.000000e+00> : vector<16xf32>
    %8 = vector.multi_reduction <add>, %7, %cst_2 [1] : vector<16x32xf32> to vector<16xf32>
    %9 = vector.shape_cast %8 : vector<16xf32> to vector<16x1xf32>
    %cst_3 = arith.constant 3.200000e+01 : f32
    %10 = vector.broadcast %cst_3 : f32 to vector<16x1xf32>
    %11 = arith.divf %9, %10 : vector<16x1xf32>
    %12 = vector.broadcast %4 : vector<16x1xf32> to vector<16x32xf32>
    %13 = arith.subf %0, %12 : vector<16x32xf32>
    %cst_4 = arith.constant 9.99999996E-13 : f32
    %14 = vector.broadcast %cst_4 : f32 to vector<16x1xf32>
    %15 = arith.addf %11, %14 : vector<16x1xf32>
    %16 = math.rsqrt %15 : vector<16x1xf32>
    %17 = vector.broadcast %16 : vector<16x1xf32> to vector<16x32xf32>
    %18 = arith.mulf %13, %17 : vector<16x32xf32>
    %c0_5 = arith.constant 0 : index
    %c0_6 = arith.constant 0 : index
    %19 = vector.load %arg2[%c0_5, %c0_6] : memref<1x32xf32, #tpu.memory_space<vmem>>, vector<1x32xf32>
    %20 = vector.broadcast %19 : vector<1x32xf32> to vector<16x32xf32>
    %21 = arith.mulf %18, %20 : vector<16x32xf32>
    %c0_7 = arith.constant 0 : index
    %c0_8 = arith.constant 0 : index
    %22 = vector.load %arg3[%c0_7, %c0_8] : memref<1x32xf32, #tpu.memory_space<vmem>>, vector<1x32xf32>
    %23 = vector.broadcast %22 : vector<1x32xf32> to vector<16x32xf32>
    %24 = arith.addf %21, %23 : vector<16x32xf32>
    %c0_9 = arith.constant 0 : index
    %c0_10 = arith.constant 0 : index
    %25 = vector.load %arg4[%c0_9, %c0_10] : memref<16x32xf32, #tpu.memory_space<vmem>>, vector<16x32xf32>
    tpu.vector_store %arg4[%c0_9, %c0_10], %24 {strides = array<i32>} : memref<16x32xf32, #tpu.memory_space<vmem>>, vector<16x32xf32>,
    return
  }
  func.func @transform_0(%arg0: i32) -> (i32, i32) {
    %c0_i32 = arith.constant 0 : i32
    %c0_i32_0 = arith.constant 0 : i32
    return %arg0, %c0_i32 : i32, i32
  }
  func.func @transform_1(%arg0: i32) -> (i32, i32) {
    %c0_i32 = arith.constant 0 : i32
    %c0_i32_0 = arith.constant 0 : i32
    %c0_i32_1 = arith.constant 0 : i32
    return %c0_i32, %c0_i32_0 : i32, i32
  }
  func.func @transform_2(%arg0: i32) -> (i32, i32) {
    %c0_i32 = arith.constant 0 : i32
    %c0_i32_0 = arith.constant 0 : i32
    %c0_i32_1 = arith.constant 0 : i32
    return %c0_i32, %c0_i32_0 : i32, i32
  }
  func.func @transform_3(%arg0: i32) -> (i32, i32) {
    %c0_i32 = arith.constant 0 : i32
    %c0_i32_0 = arith.constant 0 : i32
    return %arg0, %c0_i32 : i32, i32
  }
}

module attributes {stable_mosaic.version = 11 : i64} {
  func.func @_lstm_kernel(%arg0: memref<8x2x32xf32, #tpu.memory_space<vmem>>, %arg1: memref<4x32x16xbf16, #tpu.memory_space<vmem>>, %arg2: memref<4x16x16xbf16, #tpu.memory_space<vmem>>, %arg3: memref<4x1x16xf32, #tpu.memory_space<vmem>>, %arg4: memref<8x2x16xf32, #tpu.memory_space<vmem>>, %arg5: memref<16x16xf32, #tpu.memory_space<vmem>>, %arg6: memref<16x16xf32, #tpu.memory_space<vmem>>, %arg7: memref<16x16xf32, #tpu.memory_space<vmem>>, %arg8: memref<16x16xf32, #tpu.memory_space<vmem>>) attributes {dimension_semantics = [], scalar_prefetch = 0 : i64, scratch_operands = 4 : i64, tpu.core_type = #tpu.core_type<tc>} {
    %c0 = arith.constant 0 : index
    %c0_0 = arith.constant 0 : index
    %c0_1 = arith.constant 0 : index
    %0 = vector.load %arg0[%c0, %c0_0, %c0_1] : memref<8x2x32xf32, #tpu.memory_space<vmem>>, vector<8x2x32xf32>
    %1 = vector.shape_cast %0 : vector<8x2x32xf32> to vector<16x32xf32>
    %2 = arith.truncf %1 : vector<16x32xf32> to vector<16x32xbf16>
    %c0_2 = arith.constant 0 : index
    %c0_3 = arith.constant 0 : index
    %c0_4 = arith.constant 0 : index
    %3 = vector.load %arg1[%c0_2, %c0_3, %c0_4] : memref<4x32x16xbf16, #tpu.memory_space<vmem>>, vector<1x32x16xbf16>
    %4 = vector.shape_cast %3 : vector<1x32x16xbf16> to vector<32x16xbf16>
    %cst = arith.constant dense<0.000000e+00> : vector<16x16xf32>
    %5 = tpu.matmul %2, %4, %cst {dimension_numbers = #tpu.dot_dimension_numbers<[1], [0], [0], [1], [0, 0, 1, 1], [], []>} : vector<16x32xbf16>, vector<32x16xbf16>, vector<16x16xf32> -> vector<16x16xf32>
    %c0_5 = arith.constant 0 : index
    %c0_6 = arith.constant 0 : index
    %c0_7 = arith.constant 0 : index
    %6 = vector.load %arg3[%c0_5, %c0_6, %c0_7] : memref<4x1x16xf32, #tpu.memory_space<vmem>>, vector<1x1x16xf32>
    %7 = vector.shape_cast %6 : vector<1x1x16xf32> to vector<1x16xf32>
    %8 = vector.broadcast %7 : vector<1x16xf32> to vector<16x16xf32>
    %9 = arith.addf %5, %8 : vector<16x16xf32>
    %c0_8 = arith.constant 0 : index
    %c0_9 = arith.constant 0 : index
    %10 = vector.load %arg5[%c0_8, %c0_9] : memref<16x16xf32, #tpu.memory_space<vmem>>, vector<16x16xf32>
    tpu.vector_store %arg5[%c0_8, %c0_9], %9 {strides = array<i32>} : memref<16x16xf32, #tpu.memory_space<vmem>>, vector<16x16xf32>,
    %c1 = arith.constant 1 : index
    %c0_10 = arith.constant 0 : index
    %c0_11 = arith.constant 0 : index
    %11 = vector.load %arg1[%c1, %c0_10, %c0_11] : memref<4x32x16xbf16, #tpu.memory_space<vmem>>, vector<1x32x16xbf16>
    %12 = vector.shape_cast %11 : vector<1x32x16xbf16> to vector<32x16xbf16>
    %cst_12 = arith.constant dense<0.000000e+00> : vector<16x16xf32>
    %13 = tpu.matmul %2, %12, %cst_12 {dimension_numbers = #tpu.dot_dimension_numbers<[1], [0], [0], [1], [0, 0, 1, 1], [], []>} : vector<16x32xbf16>, vector<32x16xbf16>, vector<16x16xf32> -> vector<16x16xf32>
    %c1_13 = arith.constant 1 : index
    %c0_14 = arith.constant 0 : index
    %c0_15 = arith.constant 0 : index
    %14 = vector.load %arg3[%c1_13, %c0_14, %c0_15] : memref<4x1x16xf32, #tpu.memory_space<vmem>>, vector<1x1x16xf32>
    %15 = vector.shape_cast %14 : vector<1x1x16xf32> to vector<1x16xf32>
    %16 = vector.broadcast %15 : vector<1x16xf32> to vector<16x16xf32>
    %17 = arith.addf %13, %16 : vector<16x16xf32>
    %c0_16 = arith.constant 0 : index
    %c0_17 = arith.constant 0 : index
    %18 = vector.load %arg6[%c0_16, %c0_17] : memref<16x16xf32, #tpu.memory_space<vmem>>, vector<16x16xf32>
    tpu.vector_store %arg6[%c0_16, %c0_17], %17 {strides = array<i32>} : memref<16x16xf32, #tpu.memory_space<vmem>>, vector<16x16xf32>,
    %c2 = arith.constant 2 : index
    %c0_18 = arith.constant 0 : index
    %c0_19 = arith.constant 0 : index
    %19 = vector.load %arg1[%c2, %c0_18, %c0_19] : memref<4x32x16xbf16, #tpu.memory_space<vmem>>, vector<1x32x16xbf16>
    %20 = vector.shape_cast %19 : vector<1x32x16xbf16> to vector<32x16xbf16>
    %cst_20 = arith.constant dense<0.000000e+00> : vector<16x16xf32>
    %21 = tpu.matmul %2, %20, %cst_20 {dimension_numbers = #tpu.dot_dimension_numbers<[1], [0], [0], [1], [0, 0, 1, 1], [], []>} : vector<16x32xbf16>, vector<32x16xbf16>, vector<16x16xf32> -> vector<16x16xf32>
    %c2_21 = arith.constant 2 : index
    %c0_22 = arith.constant 0 : index
    %c0_23 = arith.constant 0 : index
    %22 = vector.load %arg3[%c2_21, %c0_22, %c0_23] : memref<4x1x16xf32, #tpu.memory_space<vmem>>, vector<1x1x16xf32>
    %23 = vector.shape_cast %22 : vector<1x1x16xf32> to vector<1x16xf32>
    %24 = vector.broadcast %23 : vector<1x16xf32> to vector<16x16xf32>
    %25 = arith.addf %21, %24 : vector<16x16xf32>
    %c0_24 = arith.constant 0 : index
    %c0_25 = arith.constant 0 : index
    %26 = vector.load %arg7[%c0_24, %c0_25] : memref<16x16xf32, #tpu.memory_space<vmem>>, vector<16x16xf32>
    tpu.vector_store %arg7[%c0_24, %c0_25], %25 {strides = array<i32>} : memref<16x16xf32, #tpu.memory_space<vmem>>, vector<16x16xf32>,
    %c3 = arith.constant 3 : index
    %c0_26 = arith.constant 0 : index
    %c0_27 = arith.constant 0 : index
    %27 = vector.load %arg1[%c3, %c0_26, %c0_27] : memref<4x32x16xbf16, #tpu.memory_space<vmem>>, vector<1x32x16xbf16>
    %28 = vector.shape_cast %27 : vector<1x32x16xbf16> to vector<32x16xbf16>
    %cst_28 = arith.constant dense<0.000000e+00> : vector<16x16xf32>
    %29 = tpu.matmul %2, %28, %cst_28 {dimension_numbers = #tpu.dot_dimension_numbers<[1], [0], [0], [1], [0, 0, 1, 1], [], []>} : vector<16x32xbf16>, vector<32x16xbf16>, vector<16x16xf32> -> vector<16x16xf32>
    %c3_29 = arith.constant 3 : index
    %c0_30 = arith.constant 0 : index
    %c0_31 = arith.constant 0 : index
    %30 = vector.load %arg3[%c3_29, %c0_30, %c0_31] : memref<4x1x16xf32, #tpu.memory_space<vmem>>, vector<1x1x16xf32>
    %31 = vector.shape_cast %30 : vector<1x1x16xf32> to vector<1x16xf32>
    %32 = vector.broadcast %31 : vector<1x16xf32> to vector<16x16xf32>
    %33 = arith.addf %29, %32 : vector<16x16xf32>
    %c0_32 = arith.constant 0 : index
    %c0_33 = arith.constant 0 : index
    %34 = vector.load %arg8[%c0_32, %c0_33] : memref<16x16xf32, #tpu.memory_space<vmem>>, vector<16x16xf32>
    tpu.vector_store %arg8[%c0_32, %c0_33], %33 {strides = array<i32>} : memref<16x16xf32, #tpu.memory_space<vmem>>, vector<16x16xf32>,
    %cst_34 = arith.constant 0.000000e+00 : f32
    %35 = vector.broadcast %cst_34 : f32 to vector<2x16xf32>
    %cst_35 = arith.constant 0.000000e+00 : f32
    %36 = vector.broadcast %cst_35 : f32 to vector<2x16xf32>
    %c0_i32 = arith.constant 0 : i32
    %37 = arith.truncf %35 : vector<2x16xf32> to vector<2x16xbf16>
    %c2_i32 = arith.constant 2 : i32
    %38 = arith.muli %c0_i32, %c2_i32 : i32
    %39 = arith.index_cast %38 : i32 to index
    %c0_36 = arith.constant 0 : index
    %40 = vector.load %arg5[%39, %c0_36] : memref<16x16xf32, #tpu.memory_space<vmem>>, vector<2x16xf32>
    %c0_37 = arith.constant 0 : index
    %c0_38 = arith.constant 0 : index
    %c0_39 = arith.constant 0 : index
    %41 = vector.load %arg2[%c0_37, %c0_38, %c0_39] : memref<4x16x16xbf16, #tpu.memory_space<vmem>>, vector<1x16x16xbf16>
    %42 = vector.shape_cast %41 : vector<1x16x16xbf16> to vector<16x16xbf16>
    %cst_40 = arith.constant dense<0.000000e+00> : vector<2x16xf32>
    %43 = tpu.matmul %37, %42, %cst_40 {dimension_numbers = #tpu.dot_dimension_numbers<[1], [0], [0], [1], [0, 0, 1, 1], [], []>} : vector<2x16xbf16>, vector<16x16xbf16>, vector<2x16xf32> -> vector<2x16xf32>
    %44 = arith.addf %40, %43 : vector<2x16xf32>
    %45 = arith.negf %44 : vector<2x16xf32>
    %46 = math.exp %45 : vector<2x16xf32>
    %cst_41 = arith.constant 1.000000e+00 : f32
    %47 = vector.broadcast %cst_41 : f32 to vector<2x16xf32>
    %48 = arith.addf %47, %46 : vector<2x16xf32>
    %49 = arith.divf %47, %48 : vector<2x16xf32>
    %50 = arith.index_cast %38 : i32 to index
    %c0_42 = arith.constant 0 : index
    %51 = vector.load %arg6[%50, %c0_42] : memref<16x16xf32, #tpu.memory_space<vmem>>, vector<2x16xf32>
    %c1_43 = arith.constant 1 : index
    %c0_44 = arith.constant 0 : index
    %c0_45 = arith.constant 0 : index
    %52 = vector.load %arg2[%c1_43, %c0_44, %c0_45] : memref<4x16x16xbf16, #tpu.memory_space<vmem>>, vector<1x16x16xbf16>
    %53 = vector.shape_cast %52 : vector<1x16x16xbf16> to vector<16x16xbf16>
    %cst_46 = arith.constant dense<0.000000e+00> : vector<2x16xf32>
    %54 = tpu.matmul %37, %53, %cst_46 {dimension_numbers = #tpu.dot_dimension_numbers<[1], [0], [0], [1], [0, 0, 1, 1], [], []>} : vector<2x16xbf16>, vector<16x16xbf16>, vector<2x16xf32> -> vector<2x16xf32>
    %55 = arith.addf %51, %54 : vector<2x16xf32>
    %56 = arith.negf %55 : vector<2x16xf32>
    %57 = math.exp %56 : vector<2x16xf32>
    %cst_47 = arith.constant 1.000000e+00 : f32
    %58 = vector.broadcast %cst_47 : f32 to vector<2x16xf32>
    %59 = arith.addf %58, %57 : vector<2x16xf32>
    %60 = arith.divf %58, %59 : vector<2x16xf32>
    %61 = arith.index_cast %38 : i32 to index
    %c0_48 = arith.constant 0 : index
    %62 = vector.load %arg7[%61, %c0_48] : memref<16x16xf32, #tpu.memory_space<vmem>>, vector<2x16xf32>
    %c2_49 = arith.constant 2 : index
    %c0_50 = arith.constant 0 : index
    %c0_51 = arith.constant 0 : index
    %63 = vector.load %arg2[%c2_49, %c0_50, %c0_51] : memref<4x16x16xbf16, #tpu.memory_space<vmem>>, vector<1x16x16xbf16>
    %64 = vector.shape_cast %63 : vector<1x16x16xbf16> to vector<16x16xbf16>
    %cst_52 = arith.constant dense<0.000000e+00> : vector<2x16xf32>
    %65 = tpu.matmul %37, %64, %cst_52 {dimension_numbers = #tpu.dot_dimension_numbers<[1], [0], [0], [1], [0, 0, 1, 1], [], []>} : vector<2x16xbf16>, vector<16x16xbf16>, vector<2x16xf32> -> vector<2x16xf32>
    %66 = arith.addf %62, %65 : vector<2x16xf32>
    %67 = math.tanh %66 : vector<2x16xf32>
    %68 = arith.index_cast %38 : i32 to index
    %c0_53 = arith.constant 0 : index
    %69 = vector.load %arg8[%68, %c0_53] : memref<16x16xf32, #tpu.memory_space<vmem>>, vector<2x16xf32>
    %c3_54 = arith.constant 3 : index
    %c0_55 = arith.constant 0 : index
    %c0_56 = arith.constant 0 : index
    %70 = vector.load %arg2[%c3_54, %c0_55, %c0_56] : memref<4x16x16xbf16, #tpu.memory_space<vmem>>, vector<1x16x16xbf16>
    %71 = vector.shape_cast %70 : vector<1x16x16xbf16> to vector<16x16xbf16>
    %cst_57 = arith.constant dense<0.000000e+00> : vector<2x16xf32>
    %72 = tpu.matmul %37, %71, %cst_57 {dimension_numbers = #tpu.dot_dimension_numbers<[1], [0], [0], [1], [0, 0, 1, 1], [], []>} : vector<2x16xbf16>, vector<16x16xbf16>, vector<2x16xf32> -> vector<2x16xf32>
    %73 = arith.addf %69, %72 : vector<2x16xf32>
    %74 = arith.negf %73 : vector<2x16xf32>
    %75 = math.exp %74 : vector<2x16xf32>
    %cst_58 = arith.constant 1.000000e+00 : f32
    %76 = vector.broadcast %cst_58 : f32 to vector<2x16xf32>
    %77 = arith.addf %76, %75 : vector<2x16xf32>
    %78 = arith.divf %76, %77 : vector<2x16xf32>
    %79 = arith.mulf %60, %36 : vector<2x16xf32>
    %80 = arith.mulf %49, %67 : vector<2x16xf32>
    %81 = arith.addf %79, %80 : vector<2x16xf32>
    %82 = math.tanh %81 : vector<2x16xf32>
    %83 = arith.mulf %78, %82 : vector<2x16xf32>
    %84 = arith.index_cast %c0_i32 : i32 to index
    %c0_59 = arith.constant 0 : index
    %c0_60 = arith.constant 0 : index
    %85 = vector.load %arg4[%84, %c0_59, %c0_60] : memref<8x2x16xf32, #tpu.memory_space<vmem>>, vector<1x2x16xf32>
    %86 = vector.shape_cast %85 : vector<1x2x16xf32> to vector<2x16xf32>
    %87 = vector.shape_cast %83 : vector<2x16xf32> to vector<1x2x16xf32>
    tpu.vector_store %arg4[%84, %c0_59, %c0_60], %87 {strides = array<i32>} : memref<8x2x16xf32, #tpu.memory_space<vmem>>, vector<1x2x16xf32>,
    %c1_i32 = arith.constant 1 : i32
    %88 = arith.truncf %83 : vector<2x16xf32> to vector<2x16xbf16>
    %c2_i32_61 = arith.constant 2 : i32
    %89 = arith.muli %c1_i32, %c2_i32_61 : i32
    %90 = arith.index_cast %89 : i32 to index
    %c0_62 = arith.constant 0 : index
    %91 = vector.load %arg5[%90, %c0_62] : memref<16x16xf32, #tpu.memory_space<vmem>>, vector<2x16xf32>
    %c0_63 = arith.constant 0 : index
    %c0_64 = arith.constant 0 : index
    %c0_65 = arith.constant 0 : index
    %92 = vector.load %arg2[%c0_63, %c0_64, %c0_65] : memref<4x16x16xbf16, #tpu.memory_space<vmem>>, vector<1x16x16xbf16>
    %93 = vector.shape_cast %92 : vector<1x16x16xbf16> to vector<16x16xbf16>
    %cst_66 = arith.constant dense<0.000000e+00> : vector<2x16xf32>
    %94 = tpu.matmul %88, %93, %cst_66 {dimension_numbers = #tpu.dot_dimension_numbers<[1], [0], [0], [1], [0, 0, 1, 1], [], []>} : vector<2x16xbf16>, vector<16x16xbf16>, vector<2x16xf32> -> vector<2x16xf32>
    %95 = arith.addf %91, %94 : vector<2x16xf32>
    %96 = arith.negf %95 : vector<2x16xf32>
    %97 = math.exp %96 : vector<2x16xf32>
    %cst_67 = arith.constant 1.000000e+00 : f32
    %98 = vector.broadcast %cst_67 : f32 to vector<2x16xf32>
    %99 = arith.addf %98, %97 : vector<2x16xf32>
    %100 = arith.divf %98, %99 : vector<2x16xf32>
    %101 = arith.index_cast %89 : i32 to index
    %c0_68 = arith.constant 0 : index
    %102 = vector.load %arg6[%101, %c0_68] : memref<16x16xf32, #tpu.memory_space<vmem>>, vector<2x16xf32>
    %c1_69 = arith.constant 1 : index
    %c0_70 = arith.constant 0 : index
    %c0_71 = arith.constant 0 : index
    %103 = vector.load %arg2[%c1_69, %c0_70, %c0_71] : memref<4x16x16xbf16, #tpu.memory_space<vmem>>, vector<1x16x16xbf16>
    %104 = vector.shape_cast %103 : vector<1x16x16xbf16> to vector<16x16xbf16>
    %cst_72 = arith.constant dense<0.000000e+00> : vector<2x16xf32>
    %105 = tpu.matmul %88, %104, %cst_72 {dimension_numbers = #tpu.dot_dimension_numbers<[1], [0], [0], [1], [0, 0, 1, 1], [], []>} : vector<2x16xbf16>, vector<16x16xbf16>, vector<2x16xf32> -> vector<2x16xf32>
    %106 = arith.addf %102, %105 : vector<2x16xf32>
    %107 = arith.negf %106 : vector<2x16xf32>
    %108 = math.exp %107 : vector<2x16xf32>
    %cst_73 = arith.constant 1.000000e+00 : f32
    %109 = vector.broadcast %cst_73 : f32 to vector<2x16xf32>
    %110 = arith.addf %109, %108 : vector<2x16xf32>
    %111 = arith.divf %109, %110 : vector<2x16xf32>
    %112 = arith.index_cast %89 : i32 to index
    %c0_74 = arith.constant 0 : index
    %113 = vector.load %arg7[%112, %c0_74] : memref<16x16xf32, #tpu.memory_space<vmem>>, vector<2x16xf32>
    %c2_75 = arith.constant 2 : index
    %c0_76 = arith.constant 0 : index
    %c0_77 = arith.constant 0 : index
    %114 = vector.load %arg2[%c2_75, %c0_76, %c0_77] : memref<4x16x16xbf16, #tpu.memory_space<vmem>>, vector<1x16x16xbf16>
    %115 = vector.shape_cast %114 : vector<1x16x16xbf16> to vector<16x16xbf16>
    %cst_78 = arith.constant dense<0.000000e+00> : vector<2x16xf32>
    %116 = tpu.matmul %88, %115, %cst_78 {dimension_numbers = #tpu.dot_dimension_numbers<[1], [0], [0], [1], [0, 0, 1, 1], [], []>} : vector<2x16xbf16>, vector<16x16xbf16>, vector<2x16xf32> -> vector<2x16xf32>
    %117 = arith.addf %113, %116 : vector<2x16xf32>
    %118 = math.tanh %117 : vector<2x16xf32>
    %119 = arith.index_cast %89 : i32 to index
    %c0_79 = arith.constant 0 : index
    %120 = vector.load %arg8[%119, %c0_79] : memref<16x16xf32, #tpu.memory_space<vmem>>, vector<2x16xf32>
    %c3_80 = arith.constant 3 : index
    %c0_81 = arith.constant 0 : index
    %c0_82 = arith.constant 0 : index
    %121 = vector.load %arg2[%c3_80, %c0_81, %c0_82] : memref<4x16x16xbf16, #tpu.memory_space<vmem>>, vector<1x16x16xbf16>
    %122 = vector.shape_cast %121 : vector<1x16x16xbf16> to vector<16x16xbf16>
    %cst_83 = arith.constant dense<0.000000e+00> : vector<2x16xf32>
    %123 = tpu.matmul %88, %122, %cst_83 {dimension_numbers = #tpu.dot_dimension_numbers<[1], [0], [0], [1], [0, 0, 1, 1], [], []>} : vector<2x16xbf16>, vector<16x16xbf16>, vector<2x16xf32> -> vector<2x16xf32>
    %124 = arith.addf %120, %123 : vector<2x16xf32>
    %125 = arith.negf %124 : vector<2x16xf32>
    %126 = math.exp %125 : vector<2x16xf32>
    %cst_84 = arith.constant 1.000000e+00 : f32
    %127 = vector.broadcast %cst_84 : f32 to vector<2x16xf32>
    %128 = arith.addf %127, %126 : vector<2x16xf32>
    %129 = arith.divf %127, %128 : vector<2x16xf32>
    %130 = arith.mulf %111, %81 : vector<2x16xf32>
    %131 = arith.mulf %100, %118 : vector<2x16xf32>
    %132 = arith.addf %130, %131 : vector<2x16xf32>
    %133 = math.tanh %132 : vector<2x16xf32>
    %134 = arith.mulf %129, %133 : vector<2x16xf32>
    %135 = arith.index_cast %c1_i32 : i32 to index
    %c0_85 = arith.constant 0 : index
    %c0_86 = arith.constant 0 : index
    %136 = vector.load %arg4[%135, %c0_85, %c0_86] : memref<8x2x16xf32, #tpu.memory_space<vmem>>, vector<1x2x16xf32>
    %137 = vector.shape_cast %136 : vector<1x2x16xf32> to vector<2x16xf32>
    %138 = vector.shape_cast %134 : vector<2x16xf32> to vector<1x2x16xf32>
    tpu.vector_store %arg4[%135, %c0_85, %c0_86], %138 {strides = array<i32>} : memref<8x2x16xf32, #tpu.memory_space<vmem>>, vector<1x2x16xf32>,
    %c2_i32_87 = arith.constant 2 : i32
    %139 = arith.truncf %134 : vector<2x16xf32> to vector<2x16xbf16>
    %c2_i32_88 = arith.constant 2 : i32
    %140 = arith.muli %c2_i32_87, %c2_i32_88 : i32
    %141 = arith.index_cast %140 : i32 to index
    %c0_89 = arith.constant 0 : index
    %142 = vector.load %arg5[%141, %c0_89] : memref<16x16xf32, #tpu.memory_space<vmem>>, vector<2x16xf32>
    %c0_90 = arith.constant 0 : index
    %c0_91 = arith.constant 0 : index
    %c0_92 = arith.constant 0 : index
    %143 = vector.load %arg2[%c0_90, %c0_91, %c0_92] : memref<4x16x16xbf16, #tpu.memory_space<vmem>>, vector<1x16x16xbf16>
    %144 = vector.shape_cast %143 : vector<1x16x16xbf16> to vector<16x16xbf16>
    %cst_93 = arith.constant dense<0.000000e+00> : vector<2x16xf32>
    %145 = tpu.matmul %139, %144, %cst_93 {dimension_numbers = #tpu.dot_dimension_numbers<[1], [0], [0], [1], [0, 0, 1, 1], [], []>} : vector<2x16xbf16>, vector<16x16xbf16>, vector<2x16xf32> -> vector<2x16xf32>
    %146 = arith.addf %142, %145 : vector<2x16xf32>
    %147 = arith.negf %146 : vector<2x16xf32>
    %148 = math.exp %147 : vector<2x16xf32>
    %cst_94 = arith.constant 1.000000e+00 : f32
    %149 = vector.broadcast %cst_94 : f32 to vector<2x16xf32>
    %150 = arith.addf %149, %148 : vector<2x16xf32>
    %151 = arith.divf %149, %150 : vector<2x16xf32>
    %152 = arith.index_cast %140 : i32 to index
    %c0_95 = arith.constant 0 : index
    %153 = vector.load %arg6[%152, %c0_95] : memref<16x16xf32, #tpu.memory_space<vmem>>, vector<2x16xf32>
    %c1_96 = arith.constant 1 : index
    %c0_97 = arith.constant 0 : index
    %c0_98 = arith.constant 0 : index
    %154 = vector.load %arg2[%c1_96, %c0_97, %c0_98] : memref<4x16x16xbf16, #tpu.memory_space<vmem>>, vector<1x16x16xbf16>
    %155 = vector.shape_cast %154 : vector<1x16x16xbf16> to vector<16x16xbf16>
    %cst_99 = arith.constant dense<0.000000e+00> : vector<2x16xf32>
    %156 = tpu.matmul %139, %155, %cst_99 {dimension_numbers = #tpu.dot_dimension_numbers<[1], [0], [0], [1], [0, 0, 1, 1], [], []>} : vector<2x16xbf16>, vector<16x16xbf16>, vector<2x16xf32> -> vector<2x16xf32>
    %157 = arith.addf %153, %156 : vector<2x16xf32>
    %158 = arith.negf %157 : vector<2x16xf32>
    %159 = math.exp %158 : vector<2x16xf32>
    %cst_100 = arith.constant 1.000000e+00 : f32
    %160 = vector.broadcast %cst_100 : f32 to vector<2x16xf32>
    %161 = arith.addf %160, %159 : vector<2x16xf32>
    %162 = arith.divf %160, %161 : vector<2x16xf32>
    %163 = arith.index_cast %140 : i32 to index
    %c0_101 = arith.constant 0 : index
    %164 = vector.load %arg7[%163, %c0_101] : memref<16x16xf32, #tpu.memory_space<vmem>>, vector<2x16xf32>
    %c2_102 = arith.constant 2 : index
    %c0_103 = arith.constant 0 : index
    %c0_104 = arith.constant 0 : index
    %165 = vector.load %arg2[%c2_102, %c0_103, %c0_104] : memref<4x16x16xbf16, #tpu.memory_space<vmem>>, vector<1x16x16xbf16>
    %166 = vector.shape_cast %165 : vector<1x16x16xbf16> to vector<16x16xbf16>
    %cst_105 = arith.constant dense<0.000000e+00> : vector<2x16xf32>
    %167 = tpu.matmul %139, %166, %cst_105 {dimension_numbers = #tpu.dot_dimension_numbers<[1], [0], [0], [1], [0, 0, 1, 1], [], []>} : vector<2x16xbf16>, vector<16x16xbf16>, vector<2x16xf32> -> vector<2x16xf32>
    %168 = arith.addf %164, %167 : vector<2x16xf32>
    %169 = math.tanh %168 : vector<2x16xf32>
    %170 = arith.index_cast %140 : i32 to index
    %c0_106 = arith.constant 0 : index
    %171 = vector.load %arg8[%170, %c0_106] : memref<16x16xf32, #tpu.memory_space<vmem>>, vector<2x16xf32>
    %c3_107 = arith.constant 3 : index
    %c0_108 = arith.constant 0 : index
    %c0_109 = arith.constant 0 : index
    %172 = vector.load %arg2[%c3_107, %c0_108, %c0_109] : memref<4x16x16xbf16, #tpu.memory_space<vmem>>, vector<1x16x16xbf16>
    %173 = vector.shape_cast %172 : vector<1x16x16xbf16> to vector<16x16xbf16>
    %cst_110 = arith.constant dense<0.000000e+00> : vector<2x16xf32>
    %174 = tpu.matmul %139, %173, %cst_110 {dimension_numbers = #tpu.dot_dimension_numbers<[1], [0], [0], [1], [0, 0, 1, 1], [], []>} : vector<2x16xbf16>, vector<16x16xbf16>, vector<2x16xf32> -> vector<2x16xf32>
    %175 = arith.addf %171, %174 : vector<2x16xf32>
    %176 = arith.negf %175 : vector<2x16xf32>
    %177 = math.exp %176 : vector<2x16xf32>
    %cst_111 = arith.constant 1.000000e+00 : f32
    %178 = vector.broadcast %cst_111 : f32 to vector<2x16xf32>
    %179 = arith.addf %178, %177 : vector<2x16xf32>
    %180 = arith.divf %178, %179 : vector<2x16xf32>
    %181 = arith.mulf %162, %132 : vector<2x16xf32>
    %182 = arith.mulf %151, %169 : vector<2x16xf32>
    %183 = arith.addf %181, %182 : vector<2x16xf32>
    %184 = math.tanh %183 : vector<2x16xf32>
    %185 = arith.mulf %180, %184 : vector<2x16xf32>
    %186 = arith.index_cast %c2_i32_87 : i32 to index
    %c0_112 = arith.constant 0 : index
    %c0_113 = arith.constant 0 : index
    %187 = vector.load %arg4[%186, %c0_112, %c0_113] : memref<8x2x16xf32, #tpu.memory_space<vmem>>, vector<1x2x16xf32>
    %188 = vector.shape_cast %187 : vector<1x2x16xf32> to vector<2x16xf32>
    %189 = vector.shape_cast %185 : vector<2x16xf32> to vector<1x2x16xf32>
    tpu.vector_store %arg4[%186, %c0_112, %c0_113], %189 {strides = array<i32>} : memref<8x2x16xf32, #tpu.memory_space<vmem>>, vector<1x2x16xf32>,
    %c3_i32 = arith.constant 3 : i32
    %190 = arith.truncf %185 : vector<2x16xf32> to vector<2x16xbf16>
    %c2_i32_114 = arith.constant 2 : i32
    %191 = arith.muli %c3_i32, %c2_i32_114 : i32
    %192 = arith.index_cast %191 : i32 to index
    %c0_115 = arith.constant 0 : index
    %193 = vector.load %arg5[%192, %c0_115] : memref<16x16xf32, #tpu.memory_space<vmem>>, vector<2x16xf32>
    %c0_116 = arith.constant 0 : index
    %c0_117 = arith.constant 0 : index
    %c0_118 = arith.constant 0 : index
    %194 = vector.load %arg2[%c0_116, %c0_117, %c0_118] : memref<4x16x16xbf16, #tpu.memory_space<vmem>>, vector<1x16x16xbf16>
    %195 = vector.shape_cast %194 : vector<1x16x16xbf16> to vector<16x16xbf16>
    %cst_119 = arith.constant dense<0.000000e+00> : vector<2x16xf32>
    %196 = tpu.matmul %190, %195, %cst_119 {dimension_numbers = #tpu.dot_dimension_numbers<[1], [0], [0], [1], [0, 0, 1, 1], [], []>} : vector<2x16xbf16>, vector<16x16xbf16>, vector<2x16xf32> -> vector<2x16xf32>
    %197 = arith.addf %193, %196 : vector<2x16xf32>
    %198 = arith.negf %197 : vector<2x16xf32>
    %199 = math.exp %198 : vector<2x16xf32>
    %cst_120 = arith.constant 1.000000e+00 : f32
    %200 = vector.broadcast %cst_120 : f32 to vector<2x16xf32>
    %201 = arith.addf %200, %199 : vector<2x16xf32>
    %202 = arith.divf %200, %201 : vector<2x16xf32>
    %203 = arith.index_cast %191 : i32 to index
    %c0_121 = arith.constant 0 : index
    %204 = vector.load %arg6[%203, %c0_121] : memref<16x16xf32, #tpu.memory_space<vmem>>, vector<2x16xf32>
    %c1_122 = arith.constant 1 : index
    %c0_123 = arith.constant 0 : index
    %c0_124 = arith.constant 0 : index
    %205 = vector.load %arg2[%c1_122, %c0_123, %c0_124] : memref<4x16x16xbf16, #tpu.memory_space<vmem>>, vector<1x16x16xbf16>
    %206 = vector.shape_cast %205 : vector<1x16x16xbf16> to vector<16x16xbf16>
    %cst_125 = arith.constant dense<0.000000e+00> : vector<2x16xf32>
    %207 = tpu.matmul %190, %206, %cst_125 {dimension_numbers = #tpu.dot_dimension_numbers<[1], [0], [0], [1], [0, 0, 1, 1], [], []>} : vector<2x16xbf16>, vector<16x16xbf16>, vector<2x16xf32> -> vector<2x16xf32>
    %208 = arith.addf %204, %207 : vector<2x16xf32>
    %209 = arith.negf %208 : vector<2x16xf32>
    %210 = math.exp %209 : vector<2x16xf32>
    %cst_126 = arith.constant 1.000000e+00 : f32
    %211 = vector.broadcast %cst_126 : f32 to vector<2x16xf32>
    %212 = arith.addf %211, %210 : vector<2x16xf32>
    %213 = arith.divf %211, %212 : vector<2x16xf32>
    %214 = arith.index_cast %191 : i32 to index
    %c0_127 = arith.constant 0 : index
    %215 = vector.load %arg7[%214, %c0_127] : memref<16x16xf32, #tpu.memory_space<vmem>>, vector<2x16xf32>
    %c2_128 = arith.constant 2 : index
    %c0_129 = arith.constant 0 : index
    %c0_130 = arith.constant 0 : index
    %216 = vector.load %arg2[%c2_128, %c0_129, %c0_130] : memref<4x16x16xbf16, #tpu.memory_space<vmem>>, vector<1x16x16xbf16>
    %217 = vector.shape_cast %216 : vector<1x16x16xbf16> to vector<16x16xbf16>
    %cst_131 = arith.constant dense<0.000000e+00> : vector<2x16xf32>
    %218 = tpu.matmul %190, %217, %cst_131 {dimension_numbers = #tpu.dot_dimension_numbers<[1], [0], [0], [1], [0, 0, 1, 1], [], []>} : vector<2x16xbf16>, vector<16x16xbf16>, vector<2x16xf32> -> vector<2x16xf32>
    %219 = arith.addf %215, %218 : vector<2x16xf32>
    %220 = math.tanh %219 : vector<2x16xf32>
    %221 = arith.index_cast %191 : i32 to index
    %c0_132 = arith.constant 0 : index
    %222 = vector.load %arg8[%221, %c0_132] : memref<16x16xf32, #tpu.memory_space<vmem>>, vector<2x16xf32>
    %c3_133 = arith.constant 3 : index
    %c0_134 = arith.constant 0 : index
    %c0_135 = arith.constant 0 : index
    %223 = vector.load %arg2[%c3_133, %c0_134, %c0_135] : memref<4x16x16xbf16, #tpu.memory_space<vmem>>, vector<1x16x16xbf16>
    %224 = vector.shape_cast %223 : vector<1x16x16xbf16> to vector<16x16xbf16>
    %cst_136 = arith.constant dense<0.000000e+00> : vector<2x16xf32>
    %225 = tpu.matmul %190, %224, %cst_136 {dimension_numbers = #tpu.dot_dimension_numbers<[1], [0], [0], [1], [0, 0, 1, 1], [], []>} : vector<2x16xbf16>, vector<16x16xbf16>, vector<2x16xf32> -> vector<2x16xf32>
    %226 = arith.addf %222, %225 : vector<2x16xf32>
    %227 = arith.negf %226 : vector<2x16xf32>
    %228 = math.exp %227 : vector<2x16xf32>
    %cst_137 = arith.constant 1.000000e+00 : f32
    %229 = vector.broadcast %cst_137 : f32 to vector<2x16xf32>
    %230 = arith.addf %229, %228 : vector<2x16xf32>
    %231 = arith.divf %229, %230 : vector<2x16xf32>
    %232 = arith.mulf %213, %183 : vector<2x16xf32>
    %233 = arith.mulf %202, %220 : vector<2x16xf32>
    %234 = arith.addf %232, %233 : vector<2x16xf32>
    %235 = math.tanh %234 : vector<2x16xf32>
    %236 = arith.mulf %231, %235 : vector<2x16xf32>
    %237 = arith.index_cast %c3_i32 : i32 to index
    %c0_138 = arith.constant 0 : index
    %c0_139 = arith.constant 0 : index
    %238 = vector.load %arg4[%237, %c0_138, %c0_139] : memref<8x2x16xf32, #tpu.memory_space<vmem>>, vector<1x2x16xf32>
    %239 = vector.shape_cast %238 : vector<1x2x16xf32> to vector<2x16xf32>
    %240 = vector.shape_cast %236 : vector<2x16xf32> to vector<1x2x16xf32>
    tpu.vector_store %arg4[%237, %c0_138, %c0_139], %240 {strides = array<i32>} : memref<8x2x16xf32, #tpu.memory_space<vmem>>, vector<1x2x16xf32>,
    %c4_i32 = arith.constant 4 : i32
    %241 = arith.truncf %236 : vector<2x16xf32> to vector<2x16xbf16>
    %c2_i32_140 = arith.constant 2 : i32
    %242 = arith.muli %c4_i32, %c2_i32_140 : i32
    %243 = arith.index_cast %242 : i32 to index
    %c0_141 = arith.constant 0 : index
    %244 = vector.load %arg5[%243, %c0_141] : memref<16x16xf32, #tpu.memory_space<vmem>>, vector<2x16xf32>
    %c0_142 = arith.constant 0 : index
    %c0_143 = arith.constant 0 : index
    %c0_144 = arith.constant 0 : index
    %245 = vector.load %arg2[%c0_142, %c0_143, %c0_144] : memref<4x16x16xbf16, #tpu.memory_space<vmem>>, vector<1x16x16xbf16>
    %246 = vector.shape_cast %245 : vector<1x16x16xbf16> to vector<16x16xbf16>
    %cst_145 = arith.constant dense<0.000000e+00> : vector<2x16xf32>
    %247 = tpu.matmul %241, %246, %cst_145 {dimension_numbers = #tpu.dot_dimension_numbers<[1], [0], [0], [1], [0, 0, 1, 1], [], []>} : vector<2x16xbf16>, vector<16x16xbf16>, vector<2x16xf32> -> vector<2x16xf32>
    %248 = arith.addf %244, %247 : vector<2x16xf32>
    %249 = arith.negf %248 : vector<2x16xf32>
    %250 = math.exp %249 : vector<2x16xf32>
    %cst_146 = arith.constant 1.000000e+00 : f32
    %251 = vector.broadcast %cst_146 : f32 to vector<2x16xf32>
    %252 = arith.addf %251, %250 : vector<2x16xf32>
    %253 = arith.divf %251, %252 : vector<2x16xf32>
    %254 = arith.index_cast %242 : i32 to index
    %c0_147 = arith.constant 0 : index
    %255 = vector.load %arg6[%254, %c0_147] : memref<16x16xf32, #tpu.memory_space<vmem>>, vector<2x16xf32>
    %c1_148 = arith.constant 1 : index
    %c0_149 = arith.constant 0 : index
    %c0_150 = arith.constant 0 : index
    %256 = vector.load %arg2[%c1_148, %c0_149, %c0_150] : memref<4x16x16xbf16, #tpu.memory_space<vmem>>, vector<1x16x16xbf16>
    %257 = vector.shape_cast %256 : vector<1x16x16xbf16> to vector<16x16xbf16>
    %cst_151 = arith.constant dense<0.000000e+00> : vector<2x16xf32>
    %258 = tpu.matmul %241, %257, %cst_151 {dimension_numbers = #tpu.dot_dimension_numbers<[1], [0], [0], [1], [0, 0, 1, 1], [], []>} : vector<2x16xbf16>, vector<16x16xbf16>, vector<2x16xf32> -> vector<2x16xf32>
    %259 = arith.addf %255, %258 : vector<2x16xf32>
    %260 = arith.negf %259 : vector<2x16xf32>
    %261 = math.exp %260 : vector<2x16xf32>
    %cst_152 = arith.constant 1.000000e+00 : f32
    %262 = vector.broadcast %cst_152 : f32 to vector<2x16xf32>
    %263 = arith.addf %262, %261 : vector<2x16xf32>
    %264 = arith.divf %262, %263 : vector<2x16xf32>
    %265 = arith.index_cast %242 : i32 to index
    %c0_153 = arith.constant 0 : index
    %266 = vector.load %arg7[%265, %c0_153] : memref<16x16xf32, #tpu.memory_space<vmem>>, vector<2x16xf32>
    %c2_154 = arith.constant 2 : index
    %c0_155 = arith.constant 0 : index
    %c0_156 = arith.constant 0 : index
    %267 = vector.load %arg2[%c2_154, %c0_155, %c0_156] : memref<4x16x16xbf16, #tpu.memory_space<vmem>>, vector<1x16x16xbf16>
    %268 = vector.shape_cast %267 : vector<1x16x16xbf16> to vector<16x16xbf16>
    %cst_157 = arith.constant dense<0.000000e+00> : vector<2x16xf32>
    %269 = tpu.matmul %241, %268, %cst_157 {dimension_numbers = #tpu.dot_dimension_numbers<[1], [0], [0], [1], [0, 0, 1, 1], [], []>} : vector<2x16xbf16>, vector<16x16xbf16>, vector<2x16xf32> -> vector<2x16xf32>
    %270 = arith.addf %266, %269 : vector<2x16xf32>
    %271 = math.tanh %270 : vector<2x16xf32>
    %272 = arith.index_cast %242 : i32 to index
    %c0_158 = arith.constant 0 : index
    %273 = vector.load %arg8[%272, %c0_158] : memref<16x16xf32, #tpu.memory_space<vmem>>, vector<2x16xf32>
    %c3_159 = arith.constant 3 : index
    %c0_160 = arith.constant 0 : index
    %c0_161 = arith.constant 0 : index
    %274 = vector.load %arg2[%c3_159, %c0_160, %c0_161] : memref<4x16x16xbf16, #tpu.memory_space<vmem>>, vector<1x16x16xbf16>
    %275 = vector.shape_cast %274 : vector<1x16x16xbf16> to vector<16x16xbf16>
    %cst_162 = arith.constant dense<0.000000e+00> : vector<2x16xf32>
    %276 = tpu.matmul %241, %275, %cst_162 {dimension_numbers = #tpu.dot_dimension_numbers<[1], [0], [0], [1], [0, 0, 1, 1], [], []>} : vector<2x16xbf16>, vector<16x16xbf16>, vector<2x16xf32> -> vector<2x16xf32>
    %277 = arith.addf %273, %276 : vector<2x16xf32>
    %278 = arith.negf %277 : vector<2x16xf32>
    %279 = math.exp %278 : vector<2x16xf32>
    %cst_163 = arith.constant 1.000000e+00 : f32
    %280 = vector.broadcast %cst_163 : f32 to vector<2x16xf32>
    %281 = arith.addf %280, %279 : vector<2x16xf32>
    %282 = arith.divf %280, %281 : vector<2x16xf32>
    %283 = arith.mulf %264, %234 : vector<2x16xf32>
    %284 = arith.mulf %253, %271 : vector<2x16xf32>
    %285 = arith.addf %283, %284 : vector<2x16xf32>
    %286 = math.tanh %285 : vector<2x16xf32>
    %287 = arith.mulf %282, %286 : vector<2x16xf32>
    %288 = arith.index_cast %c4_i32 : i32 to index
    %c0_164 = arith.constant 0 : index
    %c0_165 = arith.constant 0 : index
    %289 = vector.load %arg4[%288, %c0_164, %c0_165] : memref<8x2x16xf32, #tpu.memory_space<vmem>>, vector<1x2x16xf32>
    %290 = vector.shape_cast %289 : vector<1x2x16xf32> to vector<2x16xf32>
    %291 = vector.shape_cast %287 : vector<2x16xf32> to vector<1x2x16xf32>
    tpu.vector_store %arg4[%288, %c0_164, %c0_165], %291 {strides = array<i32>} : memref<8x2x16xf32, #tpu.memory_space<vmem>>, vector<1x2x16xf32>,
    %c5_i32 = arith.constant 5 : i32
    %292 = arith.truncf %287 : vector<2x16xf32> to vector<2x16xbf16>
    %c2_i32_166 = arith.constant 2 : i32
    %293 = arith.muli %c5_i32, %c2_i32_166 : i32
    %294 = arith.index_cast %293 : i32 to index
    %c0_167 = arith.constant 0 : index
    %295 = vector.load %arg5[%294, %c0_167] : memref<16x16xf32, #tpu.memory_space<vmem>>, vector<2x16xf32>
    %c0_168 = arith.constant 0 : index
    %c0_169 = arith.constant 0 : index
    %c0_170 = arith.constant 0 : index
    %296 = vector.load %arg2[%c0_168, %c0_169, %c0_170] : memref<4x16x16xbf16, #tpu.memory_space<vmem>>, vector<1x16x16xbf16>
    %297 = vector.shape_cast %296 : vector<1x16x16xbf16> to vector<16x16xbf16>
    %cst_171 = arith.constant dense<0.000000e+00> : vector<2x16xf32>
    %298 = tpu.matmul %292, %297, %cst_171 {dimension_numbers = #tpu.dot_dimension_numbers<[1], [0], [0], [1], [0, 0, 1, 1], [], []>} : vector<2x16xbf16>, vector<16x16xbf16>, vector<2x16xf32> -> vector<2x16xf32>
    %299 = arith.addf %295, %298 : vector<2x16xf32>
    %300 = arith.negf %299 : vector<2x16xf32>
    %301 = math.exp %300 : vector<2x16xf32>
    %cst_172 = arith.constant 1.000000e+00 : f32
    %302 = vector.broadcast %cst_172 : f32 to vector<2x16xf32>
    %303 = arith.addf %302, %301 : vector<2x16xf32>
    %304 = arith.divf %302, %303 : vector<2x16xf32>
    %305 = arith.index_cast %293 : i32 to index
    %c0_173 = arith.constant 0 : index
    %306 = vector.load %arg6[%305, %c0_173] : memref<16x16xf32, #tpu.memory_space<vmem>>, vector<2x16xf32>
    %c1_174 = arith.constant 1 : index
    %c0_175 = arith.constant 0 : index
    %c0_176 = arith.constant 0 : index
    %307 = vector.load %arg2[%c1_174, %c0_175, %c0_176] : memref<4x16x16xbf16, #tpu.memory_space<vmem>>, vector<1x16x16xbf16>
    %308 = vector.shape_cast %307 : vector<1x16x16xbf16> to vector<16x16xbf16>
    %cst_177 = arith.constant dense<0.000000e+00> : vector<2x16xf32>
    %309 = tpu.matmul %292, %308, %cst_177 {dimension_numbers = #tpu.dot_dimension_numbers<[1], [0], [0], [1], [0, 0, 1, 1], [], []>} : vector<2x16xbf16>, vector<16x16xbf16>, vector<2x16xf32> -> vector<2x16xf32>
    %310 = arith.addf %306, %309 : vector<2x16xf32>
    %311 = arith.negf %310 : vector<2x16xf32>
    %312 = math.exp %311 : vector<2x16xf32>
    %cst_178 = arith.constant 1.000000e+00 : f32
    %313 = vector.broadcast %cst_178 : f32 to vector<2x16xf32>
    %314 = arith.addf %313, %312 : vector<2x16xf32>
    %315 = arith.divf %313, %314 : vector<2x16xf32>
    %316 = arith.index_cast %293 : i32 to index
    %c0_179 = arith.constant 0 : index
    %317 = vector.load %arg7[%316, %c0_179] : memref<16x16xf32, #tpu.memory_space<vmem>>, vector<2x16xf32>
    %c2_180 = arith.constant 2 : index
    %c0_181 = arith.constant 0 : index
    %c0_182 = arith.constant 0 : index
    %318 = vector.load %arg2[%c2_180, %c0_181, %c0_182] : memref<4x16x16xbf16, #tpu.memory_space<vmem>>, vector<1x16x16xbf16>
    %319 = vector.shape_cast %318 : vector<1x16x16xbf16> to vector<16x16xbf16>
    %cst_183 = arith.constant dense<0.000000e+00> : vector<2x16xf32>
    %320 = tpu.matmul %292, %319, %cst_183 {dimension_numbers = #tpu.dot_dimension_numbers<[1], [0], [0], [1], [0, 0, 1, 1], [], []>} : vector<2x16xbf16>, vector<16x16xbf16>, vector<2x16xf32> -> vector<2x16xf32>
    %321 = arith.addf %317, %320 : vector<2x16xf32>
    %322 = math.tanh %321 : vector<2x16xf32>
    %323 = arith.index_cast %293 : i32 to index
    %c0_184 = arith.constant 0 : index
    %324 = vector.load %arg8[%323, %c0_184] : memref<16x16xf32, #tpu.memory_space<vmem>>, vector<2x16xf32>
    %c3_185 = arith.constant 3 : index
    %c0_186 = arith.constant 0 : index
    %c0_187 = arith.constant 0 : index
    %325 = vector.load %arg2[%c3_185, %c0_186, %c0_187] : memref<4x16x16xbf16, #tpu.memory_space<vmem>>, vector<1x16x16xbf16>
    %326 = vector.shape_cast %325 : vector<1x16x16xbf16> to vector<16x16xbf16>
    %cst_188 = arith.constant dense<0.000000e+00> : vector<2x16xf32>
    %327 = tpu.matmul %292, %326, %cst_188 {dimension_numbers = #tpu.dot_dimension_numbers<[1], [0], [0], [1], [0, 0, 1, 1], [], []>} : vector<2x16xbf16>, vector<16x16xbf16>, vector<2x16xf32> -> vector<2x16xf32>
    %328 = arith.addf %324, %327 : vector<2x16xf32>
    %329 = arith.negf %328 : vector<2x16xf32>
    %330 = math.exp %329 : vector<2x16xf32>
    %cst_189 = arith.constant 1.000000e+00 : f32
    %331 = vector.broadcast %cst_189 : f32 to vector<2x16xf32>
    %332 = arith.addf %331, %330 : vector<2x16xf32>
    %333 = arith.divf %331, %332 : vector<2x16xf32>
    %334 = arith.mulf %315, %285 : vector<2x16xf32>
    %335 = arith.mulf %304, %322 : vector<2x16xf32>
    %336 = arith.addf %334, %335 : vector<2x16xf32>
    %337 = math.tanh %336 : vector<2x16xf32>
    %338 = arith.mulf %333, %337 : vector<2x16xf32>
    %339 = arith.index_cast %c5_i32 : i32 to index
    %c0_190 = arith.constant 0 : index
    %c0_191 = arith.constant 0 : index
    %340 = vector.load %arg4[%339, %c0_190, %c0_191] : memref<8x2x16xf32, #tpu.memory_space<vmem>>, vector<1x2x16xf32>
    %341 = vector.shape_cast %340 : vector<1x2x16xf32> to vector<2x16xf32>
    %342 = vector.shape_cast %338 : vector<2x16xf32> to vector<1x2x16xf32>
    tpu.vector_store %arg4[%339, %c0_190, %c0_191], %342 {strides = array<i32>} : memref<8x2x16xf32, #tpu.memory_space<vmem>>, vector<1x2x16xf32>,
    %c6_i32 = arith.constant 6 : i32
    %343 = arith.truncf %338 : vector<2x16xf32> to vector<2x16xbf16>
    %c2_i32_192 = arith.constant 2 : i32
    %344 = arith.muli %c6_i32, %c2_i32_192 : i32
    %345 = arith.index_cast %344 : i32 to index
    %c0_193 = arith.constant 0 : index
    %346 = vector.load %arg5[%345, %c0_193] : memref<16x16xf32, #tpu.memory_space<vmem>>, vector<2x16xf32>
    %c0_194 = arith.constant 0 : index
    %c0_195 = arith.constant 0 : index
    %c0_196 = arith.constant 0 : index
    %347 = vector.load %arg2[%c0_194, %c0_195, %c0_196] : memref<4x16x16xbf16, #tpu.memory_space<vmem>>, vector<1x16x16xbf16>
    %348 = vector.shape_cast %347 : vector<1x16x16xbf16> to vector<16x16xbf16>
    %cst_197 = arith.constant dense<0.000000e+00> : vector<2x16xf32>
    %349 = tpu.matmul %343, %348, %cst_197 {dimension_numbers = #tpu.dot_dimension_numbers<[1], [0], [0], [1], [0, 0, 1, 1], [], []>} : vector<2x16xbf16>, vector<16x16xbf16>, vector<2x16xf32> -> vector<2x16xf32>
    %350 = arith.addf %346, %349 : vector<2x16xf32>
    %351 = arith.negf %350 : vector<2x16xf32>
    %352 = math.exp %351 : vector<2x16xf32>
    %cst_198 = arith.constant 1.000000e+00 : f32
    %353 = vector.broadcast %cst_198 : f32 to vector<2x16xf32>
    %354 = arith.addf %353, %352 : vector<2x16xf32>
    %355 = arith.divf %353, %354 : vector<2x16xf32>
    %356 = arith.index_cast %344 : i32 to index
    %c0_199 = arith.constant 0 : index
    %357 = vector.load %arg6[%356, %c0_199] : memref<16x16xf32, #tpu.memory_space<vmem>>, vector<2x16xf32>
    %c1_200 = arith.constant 1 : index
    %c0_201 = arith.constant 0 : index
    %c0_202 = arith.constant 0 : index
    %358 = vector.load %arg2[%c1_200, %c0_201, %c0_202] : memref<4x16x16xbf16, #tpu.memory_space<vmem>>, vector<1x16x16xbf16>
    %359 = vector.shape_cast %358 : vector<1x16x16xbf16> to vector<16x16xbf16>
    %cst_203 = arith.constant dense<0.000000e+00> : vector<2x16xf32>
    %360 = tpu.matmul %343, %359, %cst_203 {dimension_numbers = #tpu.dot_dimension_numbers<[1], [0], [0], [1], [0, 0, 1, 1], [], []>} : vector<2x16xbf16>, vector<16x16xbf16>, vector<2x16xf32> -> vector<2x16xf32>
    %361 = arith.addf %357, %360 : vector<2x16xf32>
    %362 = arith.negf %361 : vector<2x16xf32>
    %363 = math.exp %362 : vector<2x16xf32>
    %cst_204 = arith.constant 1.000000e+00 : f32
    %364 = vector.broadcast %cst_204 : f32 to vector<2x16xf32>
    %365 = arith.addf %364, %363 : vector<2x16xf32>
    %366 = arith.divf %364, %365 : vector<2x16xf32>
    %367 = arith.index_cast %344 : i32 to index
    %c0_205 = arith.constant 0 : index
    %368 = vector.load %arg7[%367, %c0_205] : memref<16x16xf32, #tpu.memory_space<vmem>>, vector<2x16xf32>
    %c2_206 = arith.constant 2 : index
    %c0_207 = arith.constant 0 : index
    %c0_208 = arith.constant 0 : index
    %369 = vector.load %arg2[%c2_206, %c0_207, %c0_208] : memref<4x16x16xbf16, #tpu.memory_space<vmem>>, vector<1x16x16xbf16>
    %370 = vector.shape_cast %369 : vector<1x16x16xbf16> to vector<16x16xbf16>
    %cst_209 = arith.constant dense<0.000000e+00> : vector<2x16xf32>
    %371 = tpu.matmul %343, %370, %cst_209 {dimension_numbers = #tpu.dot_dimension_numbers<[1], [0], [0], [1], [0, 0, 1, 1], [], []>} : vector<2x16xbf16>, vector<16x16xbf16>, vector<2x16xf32> -> vector<2x16xf32>
    %372 = arith.addf %368, %371 : vector<2x16xf32>
    %373 = math.tanh %372 : vector<2x16xf32>
    %374 = arith.index_cast %344 : i32 to index
    %c0_210 = arith.constant 0 : index
    %375 = vector.load %arg8[%374, %c0_210] : memref<16x16xf32, #tpu.memory_space<vmem>>, vector<2x16xf32>
    %c3_211 = arith.constant 3 : index
    %c0_212 = arith.constant 0 : index
    %c0_213 = arith.constant 0 : index
    %376 = vector.load %arg2[%c3_211, %c0_212, %c0_213] : memref<4x16x16xbf16, #tpu.memory_space<vmem>>, vector<1x16x16xbf16>
    %377 = vector.shape_cast %376 : vector<1x16x16xbf16> to vector<16x16xbf16>
    %cst_214 = arith.constant dense<0.000000e+00> : vector<2x16xf32>
    %378 = tpu.matmul %343, %377, %cst_214 {dimension_numbers = #tpu.dot_dimension_numbers<[1], [0], [0], [1], [0, 0, 1, 1], [], []>} : vector<2x16xbf16>, vector<16x16xbf16>, vector<2x16xf32> -> vector<2x16xf32>
    %379 = arith.addf %375, %378 : vector<2x16xf32>
    %380 = arith.negf %379 : vector<2x16xf32>
    %381 = math.exp %380 : vector<2x16xf32>
    %cst_215 = arith.constant 1.000000e+00 : f32
    %382 = vector.broadcast %cst_215 : f32 to vector<2x16xf32>
    %383 = arith.addf %382, %381 : vector<2x16xf32>
    %384 = arith.divf %382, %383 : vector<2x16xf32>
    %385 = arith.mulf %366, %336 : vector<2x16xf32>
    %386 = arith.mulf %355, %373 : vector<2x16xf32>
    %387 = arith.addf %385, %386 : vector<2x16xf32>
    %388 = math.tanh %387 : vector<2x16xf32>
    %389 = arith.mulf %384, %388 : vector<2x16xf32>
    %390 = arith.index_cast %c6_i32 : i32 to index
    %c0_216 = arith.constant 0 : index
    %c0_217 = arith.constant 0 : index
    %391 = vector.load %arg4[%390, %c0_216, %c0_217] : memref<8x2x16xf32, #tpu.memory_space<vmem>>, vector<1x2x16xf32>
    %392 = vector.shape_cast %391 : vector<1x2x16xf32> to vector<2x16xf32>
    %393 = vector.shape_cast %389 : vector<2x16xf32> to vector<1x2x16xf32>
    tpu.vector_store %arg4[%390, %c0_216, %c0_217], %393 {strides = array<i32>} : memref<8x2x16xf32, #tpu.memory_space<vmem>>, vector<1x2x16xf32>,
    %c7_i32 = arith.constant 7 : i32
    %394 = arith.truncf %389 : vector<2x16xf32> to vector<2x16xbf16>
    %c2_i32_218 = arith.constant 2 : i32
    %395 = arith.muli %c7_i32, %c2_i32_218 : i32
    %396 = arith.index_cast %395 : i32 to index
    %c0_219 = arith.constant 0 : index
    %397 = vector.load %arg5[%396, %c0_219] : memref<16x16xf32, #tpu.memory_space<vmem>>, vector<2x16xf32>
    %c0_220 = arith.constant 0 : index
    %c0_221 = arith.constant 0 : index
    %c0_222 = arith.constant 0 : index
    %398 = vector.load %arg2[%c0_220, %c0_221, %c0_222] : memref<4x16x16xbf16, #tpu.memory_space<vmem>>, vector<1x16x16xbf16>
    %399 = vector.shape_cast %398 : vector<1x16x16xbf16> to vector<16x16xbf16>
    %cst_223 = arith.constant dense<0.000000e+00> : vector<2x16xf32>
    %400 = tpu.matmul %394, %399, %cst_223 {dimension_numbers = #tpu.dot_dimension_numbers<[1], [0], [0], [1], [0, 0, 1, 1], [], []>} : vector<2x16xbf16>, vector<16x16xbf16>, vector<2x16xf32> -> vector<2x16xf32>
    %401 = arith.addf %397, %400 : vector<2x16xf32>
    %402 = arith.negf %401 : vector<2x16xf32>
    %403 = math.exp %402 : vector<2x16xf32>
    %cst_224 = arith.constant 1.000000e+00 : f32
    %404 = vector.broadcast %cst_224 : f32 to vector<2x16xf32>
    %405 = arith.addf %404, %403 : vector<2x16xf32>
    %406 = arith.divf %404, %405 : vector<2x16xf32>
    %407 = arith.index_cast %395 : i32 to index
    %c0_225 = arith.constant 0 : index
    %408 = vector.load %arg6[%407, %c0_225] : memref<16x16xf32, #tpu.memory_space<vmem>>, vector<2x16xf32>
    %c1_226 = arith.constant 1 : index
    %c0_227 = arith.constant 0 : index
    %c0_228 = arith.constant 0 : index
    %409 = vector.load %arg2[%c1_226, %c0_227, %c0_228] : memref<4x16x16xbf16, #tpu.memory_space<vmem>>, vector<1x16x16xbf16>
    %410 = vector.shape_cast %409 : vector<1x16x16xbf16> to vector<16x16xbf16>
    %cst_229 = arith.constant dense<0.000000e+00> : vector<2x16xf32>
    %411 = tpu.matmul %394, %410, %cst_229 {dimension_numbers = #tpu.dot_dimension_numbers<[1], [0], [0], [1], [0, 0, 1, 1], [], []>} : vector<2x16xbf16>, vector<16x16xbf16>, vector<2x16xf32> -> vector<2x16xf32>
    %412 = arith.addf %408, %411 : vector<2x16xf32>
    %413 = arith.negf %412 : vector<2x16xf32>
    %414 = math.exp %413 : vector<2x16xf32>
    %cst_230 = arith.constant 1.000000e+00 : f32
    %415 = vector.broadcast %cst_230 : f32 to vector<2x16xf32>
    %416 = arith.addf %415, %414 : vector<2x16xf32>
    %417 = arith.divf %415, %416 : vector<2x16xf32>
    %418 = arith.index_cast %395 : i32 to index
    %c0_231 = arith.constant 0 : index
    %419 = vector.load %arg7[%418, %c0_231] : memref<16x16xf32, #tpu.memory_space<vmem>>, vector<2x16xf32>
    %c2_232 = arith.constant 2 : index
    %c0_233 = arith.constant 0 : index
    %c0_234 = arith.constant 0 : index
    %420 = vector.load %arg2[%c2_232, %c0_233, %c0_234] : memref<4x16x16xbf16, #tpu.memory_space<vmem>>, vector<1x16x16xbf16>
    %421 = vector.shape_cast %420 : vector<1x16x16xbf16> to vector<16x16xbf16>
    %cst_235 = arith.constant dense<0.000000e+00> : vector<2x16xf32>
    %422 = tpu.matmul %394, %421, %cst_235 {dimension_numbers = #tpu.dot_dimension_numbers<[1], [0], [0], [1], [0, 0, 1, 1], [], []>} : vector<2x16xbf16>, vector<16x16xbf16>, vector<2x16xf32> -> vector<2x16xf32>
    %423 = arith.addf %419, %422 : vector<2x16xf32>
    %424 = math.tanh %423 : vector<2x16xf32>
    %425 = arith.index_cast %395 : i32 to index
    %c0_236 = arith.constant 0 : index
    %426 = vector.load %arg8[%425, %c0_236] : memref<16x16xf32, #tpu.memory_space<vmem>>, vector<2x16xf32>
    %c3_237 = arith.constant 3 : index
    %c0_238 = arith.constant 0 : index
    %c0_239 = arith.constant 0 : index
    %427 = vector.load %arg2[%c3_237, %c0_238, %c0_239] : memref<4x16x16xbf16, #tpu.memory_space<vmem>>, vector<1x16x16xbf16>
    %428 = vector.shape_cast %427 : vector<1x16x16xbf16> to vector<16x16xbf16>
    %cst_240 = arith.constant dense<0.000000e+00> : vector<2x16xf32>
    %429 = tpu.matmul %394, %428, %cst_240 {dimension_numbers = #tpu.dot_dimension_numbers<[1], [0], [0], [1], [0, 0, 1, 1], [], []>} : vector<2x16xbf16>, vector<16x16xbf16>, vector<2x16xf32> -> vector<2x16xf32>
    %430 = arith.addf %426, %429 : vector<2x16xf32>
    %431 = arith.negf %430 : vector<2x16xf32>
    %432 = math.exp %431 : vector<2x16xf32>
    %cst_241 = arith.constant 1.000000e+00 : f32
    %433 = vector.broadcast %cst_241 : f32 to vector<2x16xf32>
    %434 = arith.addf %433, %432 : vector<2x16xf32>
    %435 = arith.divf %433, %434 : vector<2x16xf32>
    %436 = arith.mulf %417, %387 : vector<2x16xf32>
    %437 = arith.mulf %406, %424 : vector<2x16xf32>
    %438 = arith.addf %436, %437 : vector<2x16xf32>
    %439 = math.tanh %438 : vector<2x16xf32>
    %440 = arith.mulf %435, %439 : vector<2x16xf32>
    %441 = arith.index_cast %c7_i32 : i32 to index
    %c0_242 = arith.constant 0 : index
    %c0_243 = arith.constant 0 : index
    %442 = vector.load %arg4[%441, %c0_242, %c0_243] : memref<8x2x16xf32, #tpu.memory_space<vmem>>, vector<1x2x16xf32>
    %443 = vector.shape_cast %442 : vector<1x2x16xf32> to vector<2x16xf32>
    %444 = vector.shape_cast %440 : vector<2x16xf32> to vector<1x2x16xf32>
    tpu.vector_store %arg4[%441, %c0_242, %c0_243], %444 {strides = array<i32>} : memref<8x2x16xf32, #tpu.memory_space<vmem>>, vector<1x2x16xf32>,
    %c8_i32 = arith.constant 8 : i32
    return
  }
}

module attributes {stable_mosaic.version = 11 : i64} {
  func.func @_encoder_layer_kernel(%arg0: i32, %arg1: memref<1x8x32xf32, #tpu.memory_space<vmem>>, %arg2: memref<1x1x8xf32, #tpu.memory_space<vmem>>, %arg3: memref<4x32x8xbf16, #tpu.memory_space<vmem>>, %arg4: memref<4x32x8xbf16, #tpu.memory_space<vmem>>, %arg5: memref<4x32x8xbf16, #tpu.memory_space<vmem>>, %arg6: memref<3x4x1x8xf32, #tpu.memory_space<vmem>>, %arg7: memref<4x8x32xbf16, #tpu.memory_space<vmem>>, %arg8: memref<1x32xf32, #tpu.memory_space<vmem>>, %arg9: memref<2x32xf32, #tpu.memory_space<vmem>>, %arg10: memref<32x64xbf16, #tpu.memory_space<vmem>>, %arg11: memref<1x64xf32, #tpu.memory_space<vmem>>, %arg12: memref<64x32xbf16, #tpu.memory_space<vmem>>, %arg13: memref<1x32xf32, #tpu.memory_space<vmem>>, %arg14: memref<2x32xf32, #tpu.memory_space<vmem>>, %arg15: memref<1x8x32xf32, #tpu.memory_space<vmem>>) attributes {dimension_semantics = [#tpu.dimension_semantics<parallel>], iteration_bounds = array<i64: 2>, scalar_prefetch = 0 : i64, scratch_operands = 0 : i64, tpu.core_type = #tpu.core_type<tc>, window_params = [{transform_indices = @transform_0, window_bounds = array<i64: 1, 8, 32>}, {transform_indices = @transform_1, window_bounds = array<i64: 1, 1, 8>}, {pipeline_mode = #tpu.pipeline_mode<synchronous>, transform_indices = @transform_2, window_bounds = array<i64: 4, 32, 8>}, {pipeline_mode = #tpu.pipeline_mode<synchronous>, transform_indices = @transform_3, window_bounds = array<i64: 4, 32, 8>}, {pipeline_mode = #tpu.pipeline_mode<synchronous>, transform_indices = @transform_4, window_bounds = array<i64: 4, 32, 8>}, {pipeline_mode = #tpu.pipeline_mode<synchronous>, transform_indices = @transform_5, window_bounds = array<i64: 3, 4, 1, 8>}, {pipeline_mode = #tpu.pipeline_mode<synchronous>, transform_indices = @transform_6, window_bounds = array<i64: 4, 8, 32>}, {pipeline_mode = #tpu.pipeline_mode<synchronous>, transform_indices = @transform_7, window_bounds = array<i64: 1, 32>}, {pipeline_mode = #tpu.pipeline_mode<synchronous>, transform_indices = @transform_8, window_bounds = array<i64: 2, 32>}, {pipeline_mode = #tpu.pipeline_mode<synchronous>, transform_indices = @transform_9, window_bounds = array<i64: 32, 64>}, {pipeline_mode = #tpu.pipeline_mode<synchronous>, transform_indices = @transform_10, window_bounds = array<i64: 1, 64>}, {pipeline_mode = #tpu.pipeline_mode<synchronous>, transform_indices = @transform_11, window_bounds = array<i64: 64, 32>}, {pipeline_mode = #tpu.pipeline_mode<synchronous>, transform_indices = @transform_12, window_bounds = array<i64: 1, 32>}, {pipeline_mode = #tpu.pipeline_mode<synchronous>, transform_indices = @transform_13, window_bounds = array<i64: 2, 32>}, {transform_indices = @transform_14, window_bounds = array<i64: 1, 8, 32>}]} {
    %c0 = arith.constant 0 : index
    %c0_0 = arith.constant 0 : index
    %c0_1 = arith.constant 0 : index
    %0 = vector.load %arg1[%c0, %c0_0, %c0_1] : memref<1x8x32xf32, #tpu.memory_space<vmem>>, vector<1x8x32xf32>
    %1 = vector.shape_cast %0 : vector<1x8x32xf32> to vector<8x32xf32>
    %2 = arith.truncf %1 : vector<8x32xf32> to vector<8x32xbf16>
    %3 = vector.shape_cast %2 : vector<8x32xbf16> to vector<1x8x32xbf16>
    %4 = vector.shape_cast %3 : vector<1x8x32xbf16> to vector<1x8x32xbf16>
    %5 = vector.broadcast %4 : vector<1x8x32xbf16> to vector<4x8x32xbf16>
    %c0_2 = arith.constant 0 : index
    %c0_3 = arith.constant 0 : index
    %c0_4 = arith.constant 0 : index
    %c0_5 = arith.constant 0 : index
    %6 = vector.load %arg6[%c0_2, %c0_3, %c0_4, %c0_5] : memref<3x4x1x8xf32, #tpu.memory_space<vmem>>, vector<3x4x1x8xf32>
    %c0_6 = arith.constant 0 : index
    %c0_7 = arith.constant 0 : index
    %c0_8 = arith.constant 0 : index
    %7 = vector.load %arg3[%c0_6, %c0_7, %c0_8] : memref<4x32x8xbf16, #tpu.memory_space<vmem>>, vector<4x32x8xbf16>
    "tpu.trace_start"() <{level = 10 : i32, message = "nsh,nhd->nsd"}> : () -> ()
    %cst = arith.constant dense<0.000000e+00> : vector<4x8x8xf32>
    %8 = tpu.matmul %5, %7, %cst {dimension_numbers = #tpu.dot_dimension_numbers<[2], [1], [1], [2], [0, 0, 0, 1, 1, 2], [0], [0]>} : vector<4x8x32xbf16>, vector<4x32x8xbf16>, vector<4x8x8xf32> -> vector<4x8x8xf32>
    "tpu.trace_stop"() : () -> ()
    %9 = vector.extract_strided_slice %6 {offsets = [0, 0, 0, 0], sizes = [1, 4, 1, 8], strides = [1, 1, 1, 1]} : vector<3x4x1x8xf32> to vector<1x4x1x8xf32>
    %10 = vector.shape_cast %9 : vector<1x4x1x8xf32> to vector<4x1x8xf32>
    %11 = vector.broadcast %10 : vector<4x1x8xf32> to vector<4x8x8xf32>
    %12 = arith.addf %8, %11 : vector<4x8x8xf32>
    %c0_9 = arith.constant 0 : index
    %c0_10 = arith.constant 0 : index
    %c0_11 = arith.constant 0 : index
    %13 = vector.load %arg4[%c0_9, %c0_10, %c0_11] : memref<4x32x8xbf16, #tpu.memory_space<vmem>>, vector<4x32x8xbf16>
    "tpu.trace_start"() <{level = 10 : i32, message = "nsh,nhd->nsd"}> : () -> ()
    %cst_12 = arith.constant dense<0.000000e+00> : vector<4x8x8xf32>
    %14 = tpu.matmul %5, %13, %cst_12 {dimension_numbers = #tpu.dot_dimension_numbers<[2], [1], [1], [2], [0, 0, 0, 1, 1, 2], [0], [0]>} : vector<4x8x32xbf16>, vector<4x32x8xbf16>, vector<4x8x8xf32> -> vector<4x8x8xf32>
    "tpu.trace_stop"() : () -> ()
    %15 = vector.extract_strided_slice %6 {offsets = [1, 0, 0, 0], sizes = [1, 4, 1, 8], strides = [1, 1, 1, 1]} : vector<3x4x1x8xf32> to vector<1x4x1x8xf32>
    %16 = vector.shape_cast %15 : vector<1x4x1x8xf32> to vector<4x1x8xf32>
    %17 = vector.broadcast %16 : vector<4x1x8xf32> to vector<4x8x8xf32>
    %18 = arith.addf %14, %17 : vector<4x8x8xf32>
    %c0_13 = arith.constant 0 : index
    %c0_14 = arith.constant 0 : index
    %c0_15 = arith.constant 0 : index
    %19 = vector.load %arg5[%c0_13, %c0_14, %c0_15] : memref<4x32x8xbf16, #tpu.memory_space<vmem>>, vector<4x32x8xbf16>
    "tpu.trace_start"() <{level = 10 : i32, message = "nsh,nhd->nsd"}> : () -> ()
    %cst_16 = arith.constant dense<0.000000e+00> : vector<4x8x8xf32>
    %20 = tpu.matmul %5, %19, %cst_16 {dimension_numbers = #tpu.dot_dimension_numbers<[2], [1], [1], [2], [0, 0, 0, 1, 1, 2], [0], [0]>} : vector<4x8x32xbf16>, vector<4x32x8xbf16>, vector<4x8x8xf32> -> vector<4x8x8xf32>
    "tpu.trace_stop"() : () -> ()
    %21 = vector.extract_strided_slice %6 {offsets = [2, 0, 0, 0], sizes = [1, 4, 1, 8], strides = [1, 1, 1, 1]} : vector<3x4x1x8xf32> to vector<1x4x1x8xf32>
    %22 = vector.shape_cast %21 : vector<1x4x1x8xf32> to vector<4x1x8xf32>
    %23 = vector.broadcast %22 : vector<4x1x8xf32> to vector<4x8x8xf32>
    %24 = arith.addf %20, %23 : vector<4x8x8xf32>
    %25 = arith.truncf %12 : vector<4x8x8xf32> to vector<4x8x8xbf16>
    %26 = arith.truncf %18 : vector<4x8x8xf32> to vector<4x8x8xbf16>
    "tpu.trace_start"() <{level = 10 : i32, message = "nsd,ntd->nst"}> : () -> ()
    %cst_17 = arith.constant dense<0.000000e+00> : vector<4x8x8xf32>
    %27 = tpu.matmul %25, %26, %cst_17 {dimension_numbers = #tpu.dot_dimension_numbers<[2], [2], [1], [1], [0, 0, 0, 1, 1, 1], [0], [0]>} : vector<4x8x8xbf16>, vector<4x8x8xbf16>, vector<4x8x8xf32> -> vector<4x8x8xf32>
    "tpu.trace_stop"() : () -> ()
    %cst_18 = arith.constant 0.353553385 : f32
    %28 = vector.broadcast %cst_18 : f32 to vector<4x8x8xf32>
    %29 = arith.mulf %27, %28 : vector<4x8x8xf32>
    %c0_19 = arith.constant 0 : index
    %c0_20 = arith.constant 0 : index
    %c0_21 = arith.constant 0 : index
    %30 = vector.load %arg2[%c0_19, %c0_20, %c0_21] : memref<1x1x8xf32, #tpu.memory_space<vmem>>, vector<1x1x8xf32>
    %31 = vector.broadcast %30 : vector<1x1x8xf32> to vector<4x8x8xf32>
    %32 = arith.addf %29, %31 : vector<4x8x8xf32>
    %cst_22 = arith.constant dense<0xFF800000> : vector<4x8xf32>
    %33 = vector.multi_reduction <maximumf>, %32, %cst_22 [2] : vector<4x8x8xf32> to vector<4x8xf32>
    %34 = vector.shape_cast %33 : vector<4x8xf32> to vector<4x8x1xf32>
    %35 = vector.broadcast %34 : vector<4x8x1xf32> to vector<4x8x8xf32>
    %36 = arith.subf %32, %35 : vector<4x8x8xf32>
    %37 = math.exp %36 : vector<4x8x8xf32>
    %cst_23 = arith.constant dense<0.000000e+00> : vector<4x8xf32>
    %38 = vector.multi_reduction <add>, %37, %cst_23 [2] : vector<4x8x8xf32> to vector<4x8xf32>
    %39 = vector.shape_cast %38 : vector<4x8xf32> to vector<4x8x1xf32>
    %40 = tpu.reciprocal %39 {approx = true} : vector<4x8x1xf32> -> vector<4x8x1xf32>
    %41 = vector.broadcast %40 : vector<4x8x1xf32> to vector<4x8x8xf32>
    %42 = arith.mulf %37, %41 : vector<4x8x8xf32>
    %43 = arith.truncf %42 : vector<4x8x8xf32> to vector<4x8x8xbf16>
    %44 = arith.truncf %24 : vector<4x8x8xf32> to vector<4x8x8xbf16>
    "tpu.trace_start"() <{level = 10 : i32, message = "nst,ntd->nsd"}> : () -> ()
    %cst_24 = arith.constant dense<0.000000e+00> : vector<4x8x8xf32>
    %45 = tpu.matmul %43, %44, %cst_24 {dimension_numbers = #tpu.dot_dimension_numbers<[2], [1], [1], [2], [0, 0, 0, 1, 1, 2], [0], [0]>} : vector<4x8x8xbf16>, vector<4x8x8xbf16>, vector<4x8x8xf32> -> vector<4x8x8xf32>
    "tpu.trace_stop"() : () -> ()
    %46 = arith.truncf %45 : vector<4x8x8xf32> to vector<4x8x8xbf16>
    %c0_25 = arith.constant 0 : index
    %c0_26 = arith.constant 0 : index
    %c0_27 = arith.constant 0 : index
    %47 = vector.load %arg7[%c0_25, %c0_26, %c0_27] : memref<4x8x32xbf16, #tpu.memory_space<vmem>>, vector<4x8x32xbf16>
    "tpu.trace_start"() <{level = 10 : i32, message = "nsd,ndh->nsh"}> : () -> ()
    %cst_28 = arith.constant dense<0.000000e+00> : vector<4x8x32xf32>
    %48 = tpu.matmul %46, %47, %cst_28 {dimension_numbers = #tpu.dot_dimension_numbers<[2], [1], [1], [2], [0, 0, 0, 1, 1, 2], [0], [0]>} : vector<4x8x8xbf16>, vector<4x8x32xbf16>, vector<4x8x32xf32> -> vector<4x8x32xf32>
    "tpu.trace_stop"() : () -> ()
    %cst_29 = arith.constant dense<0.000000e+00> : vector<8x32xf32>
    %49 = vector.multi_reduction <add>, %48, %cst_29 [0] : vector<4x8x32xf32> to vector<8x32xf32>
    %c0_30 = arith.constant 0 : index
    %c0_31 = arith.constant 0 : index
    %50 = vector.load %arg8[%c0_30, %c0_31] : memref<1x32xf32, #tpu.memory_space<vmem>>, vector<1x32xf32>
    %51 = vector.broadcast %50 : vector<1x32xf32> to vector<8x32xf32>
    %52 = arith.addf %49, %51 : vector<8x32xf32>
    %53 = arith.addf %1, %52 : vector<8x32xf32>
    %cst_32 = arith.constant dense<0.000000e+00> : vector<8xf32>
    %54 = vector.multi_reduction <add>, %53, %cst_32 [1] : vector<8x32xf32> to vector<8xf32>
    %55 = vector.shape_cast %54 : vector<8xf32> to vector<8x1xf32>
    %cst_33 = arith.constant 3.200000e+01 : f32
    %56 = vector.broadcast %cst_33 : f32 to vector<8x1xf32>
    %57 = arith.divf %55, %56 : vector<8x1xf32>
    %58 = vector.broadcast %57 : vector<8x1xf32> to vector<8x32xf32>
    %59 = arith.subf %53, %58 : vector<8x32xf32>
    %60 = arith.mulf %59, %59 : vector<8x32xf32>
    %cst_34 = arith.constant dense<0.000000e+00> : vector<8xf32>
    %61 = vector.multi_reduction <add>, %60, %cst_34 [1] : vector<8x32xf32> to vector<8xf32>
    %62 = vector.shape_cast %61 : vector<8xf32> to vector<8x1xf32>
    %cst_35 = arith.constant 3.200000e+01 : f32
    %63 = vector.broadcast %cst_35 : f32 to vector<8x1xf32>
    %64 = arith.divf %62, %63 : vector<8x1xf32>
    %65 = vector.broadcast %57 : vector<8x1xf32> to vector<8x32xf32>
    %66 = arith.subf %53, %65 : vector<8x32xf32>
    %cst_36 = arith.constant 9.99999996E-13 : f32
    %67 = vector.broadcast %cst_36 : f32 to vector<8x1xf32>
    %68 = arith.addf %64, %67 : vector<8x1xf32>
    %69 = math.rsqrt %68 : vector<8x1xf32>
    %70 = vector.broadcast %69 : vector<8x1xf32> to vector<8x32xf32>
    %71 = arith.mulf %66, %70 : vector<8x32xf32>
    %c0_37 = arith.constant 0 : index
    %c0_38 = arith.constant 0 : index
    %72 = vector.load %arg9[%c0_37, %c0_38] : memref<2x32xf32, #tpu.memory_space<vmem>>, vector<2x32xf32>
    %73 = vector.extract_strided_slice %72 {offsets = [0, 0], sizes = [1, 32], strides = [1, 1]} : vector<2x32xf32> to vector<1x32xf32>
    %74 = vector.broadcast %73 : vector<1x32xf32> to vector<8x32xf32>
    %75 = arith.mulf %71, %74 : vector<8x32xf32>
    %76 = vector.extract_strided_slice %72 {offsets = [1, 0], sizes = [1, 32], strides = [1, 1]} : vector<2x32xf32> to vector<1x32xf32>
    %77 = vector.broadcast %76 : vector<1x32xf32> to vector<8x32xf32>
    %78 = arith.addf %75, %77 : vector<8x32xf32>
    %79 = arith.truncf %78 : vector<8x32xf32> to vector<8x32xbf16>
    %c0_39 = arith.constant 0 : index
    %c0_40 = arith.constant 0 : index
    %80 = vector.load %arg10[%c0_39, %c0_40] : memref<32x64xbf16, #tpu.memory_space<vmem>>, vector<32x64xbf16>
    %cst_41 = arith.constant dense<0.000000e+00> : vector<8x64xf32>
    %81 = tpu.matmul %79, %80, %cst_41 {dimension_numbers = #tpu.dot_dimension_numbers<[1], [0], [0], [1], [0, 0, 1, 1], [], []>} : vector<8x32xbf16>, vector<32x64xbf16>, vector<8x64xf32> -> vector<8x64xf32>
    %c0_42 = arith.constant 0 : index
    %c0_43 = arith.constant 0 : index
    %82 = vector.load %arg11[%c0_42, %c0_43] : memref<1x64xf32, #tpu.memory_space<vmem>>, vector<1x64xf32>
    %83 = vector.broadcast %82 : vector<1x64xf32> to vector<8x64xf32>
    %84 = arith.addf %81, %83 : vector<8x64xf32>
    %85 = arith.mulf %84, %84 : vector<8x64xf32>
    %86 = arith.mulf %84, %85 : vector<8x64xf32>
    %cst_44 = arith.constant 4.471500e-02 : f32
    %87 = vector.broadcast %cst_44 : f32 to vector<8x64xf32>
    %88 = arith.mulf %87, %86 : vector<8x64xf32>
    %89 = arith.addf %84, %88 : vector<8x64xf32>
    %cst_45 = arith.constant 0.797884583 : f32
    %90 = vector.broadcast %cst_45 : f32 to vector<8x64xf32>
    %91 = arith.mulf %90, %89 : vector<8x64xf32>
    %92 = math.tanh %91 : vector<8x64xf32>
    %cst_46 = arith.constant 1.000000e+00 : f32
    %93 = vector.broadcast %cst_46 : f32 to vector<8x64xf32>
    %94 = arith.addf %93, %92 : vector<8x64xf32>
    %cst_47 = arith.constant 5.000000e-01 : f32
    %95 = vector.broadcast %cst_47 : f32 to vector<8x64xf32>
    %96 = arith.mulf %95, %94 : vector<8x64xf32>
    %97 = arith.mulf %84, %96 : vector<8x64xf32>
    %98 = arith.truncf %97 : vector<8x64xf32> to vector<8x64xbf16>
    %c0_48 = arith.constant 0 : index
    %c0_49 = arith.constant 0 : index
    %99 = vector.load %arg12[%c0_48, %c0_49] : memref<64x32xbf16, #tpu.memory_space<vmem>>, vector<64x32xbf16>
    %cst_50 = arith.constant dense<0.000000e+00> : vector<8x32xf32>
    %100 = tpu.matmul %98, %99, %cst_50 {dimension_numbers = #tpu.dot_dimension_numbers<[1], [0], [0], [1], [0, 0, 1, 1], [], []>} : vector<8x64xbf16>, vector<64x32xbf16>, vector<8x32xf32> -> vector<8x32xf32>
    %c0_51 = arith.constant 0 : index
    %c0_52 = arith.constant 0 : index
    %101 = vector.load %arg13[%c0_51, %c0_52] : memref<1x32xf32, #tpu.memory_space<vmem>>, vector<1x32xf32>
    %102 = vector.broadcast %101 : vector<1x32xf32> to vector<8x32xf32>
    %103 = arith.addf %100, %102 : vector<8x32xf32>
    %104 = arith.addf %78, %103 : vector<8x32xf32>
    %cst_53 = arith.constant dense<0.000000e+00> : vector<8xf32>
    %105 = vector.multi_reduction <add>, %104, %cst_53 [1] : vector<8x32xf32> to vector<8xf32>
    %106 = vector.shape_cast %105 : vector<8xf32> to vector<8x1xf32>
    %cst_54 = arith.constant 3.200000e+01 : f32
    %107 = vector.broadcast %cst_54 : f32 to vector<8x1xf32>
    %108 = arith.divf %106, %107 : vector<8x1xf32>
    %109 = vector.broadcast %108 : vector<8x1xf32> to vector<8x32xf32>
    %110 = arith.subf %104, %109 : vector<8x32xf32>
    %111 = arith.mulf %110, %110 : vector<8x32xf32>
    %cst_55 = arith.constant dense<0.000000e+00> : vector<8xf32>
    %112 = vector.multi_reduction <add>, %111, %cst_55 [1] : vector<8x32xf32> to vector<8xf32>
    %113 = vector.shape_cast %112 : vector<8xf32> to vector<8x1xf32>
    %cst_56 = arith.constant 3.200000e+01 : f32
    %114 = vector.broadcast %cst_56 : f32 to vector<8x1xf32>
    %115 = arith.divf %113, %114 : vector<8x1xf32>
    %116 = vector.broadcast %108 : vector<8x1xf32> to vector<8x32xf32>
    %117 = arith.subf %104, %116 : vector<8x32xf32>
    %cst_57 = arith.constant 9.99999996E-13 : f32
    %118 = vector.broadcast %cst_57 : f32 to vector<8x1xf32>
    %119 = arith.addf %115, %118 : vector<8x1xf32>
    %120 = math.rsqrt %119 : vector<8x1xf32>
    %121 = vector.broadcast %120 : vector<8x1xf32> to vector<8x32xf32>
    %122 = arith.mulf %117, %121 : vector<8x32xf32>
    %c0_58 = arith.constant 0 : index
    %c0_59 = arith.constant 0 : index
    %123 = vector.load %arg14[%c0_58, %c0_59] : memref<2x32xf32, #tpu.memory_space<vmem>>, vector<2x32xf32>
    %124 = vector.extract_strided_slice %123 {offsets = [0, 0], sizes = [1, 32], strides = [1, 1]} : vector<2x32xf32> to vector<1x32xf32>
    %125 = vector.broadcast %124 : vector<1x32xf32> to vector<8x32xf32>
    %126 = arith.mulf %122, %125 : vector<8x32xf32>
    %127 = vector.extract_strided_slice %123 {offsets = [1, 0], sizes = [1, 32], strides = [1, 1]} : vector<2x32xf32> to vector<1x32xf32>
    %128 = vector.broadcast %127 : vector<1x32xf32> to vector<8x32xf32>
    %129 = arith.addf %126, %128 : vector<8x32xf32>
    %c0_60 = arith.constant 0 : index
    %c0_61 = arith.constant 0 : index
    %c0_62 = arith.constant 0 : index
    %130 = vector.load %arg15[%c0_60, %c0_61, %c0_62] : memref<1x8x32xf32, #tpu.memory_space<vmem>>, vector<1x8x32xf32>
    %131 = vector.shape_cast %130 : vector<1x8x32xf32> to vector<8x32xf32>
    %132 = vector.shape_cast %129 : vector<8x32xf32> to vector<1x8x32xf32>
    tpu.vector_store %arg15[%c0_60, %c0_61, %c0_62], %132 {strides = array<i32>} : memref<1x8x32xf32, #tpu.memory_space<vmem>>, vector<1x8x32xf32>,
    return
  }
  func.func @transform_0(%arg0: i32) -> (i32, i32, i32) {
    %c0_i32 = arith.constant 0 : i32
    %c0_i32_0 = arith.constant 0 : i32
    %c0_i32_1 = arith.constant 0 : i32
    return %arg0, %c0_i32, %c0_i32_0 : i32, i32, i32
  }
  func.func @transform_1(%arg0: i32) -> (i32, i32, i32) {
    %c0_i32 = arith.constant 0 : i32
    %c0_i32_0 = arith.constant 0 : i32
    %c0_i32_1 = arith.constant 0 : i32
    return %arg0, %c0_i32, %c0_i32_0 : i32, i32, i32
  }
  func.func @transform_2(%arg0: i32) -> (i32, i32, i32) {
    %c0_i32 = arith.constant 0 : i32
    %c0_i32_0 = arith.constant 0 : i32
    %c0_i32_1 = arith.constant 0 : i32
    %c0_i32_2 = arith.constant 0 : i32
    return %c0_i32, %c0_i32_0, %c0_i32_1 : i32, i32, i32
  }
  func.func @transform_3(%arg0: i32) -> (i32, i32, i32) {
    %c0_i32 = arith.constant 0 : i32
    %c0_i32_0 = arith.constant 0 : i32
    %c0_i32_1 = arith.constant 0 : i32
    %c0_i32_2 = arith.constant 0 : i32
    return %c0_i32, %c0_i32_0, %c0_i32_1 : i32, i32, i32
  }
  func.func @transform_4(%arg0: i32) -> (i32, i32, i32) {
    %c0_i32 = arith.constant 0 : i32
    %c0_i32_0 = arith.constant 0 : i32
    %c0_i32_1 = arith.constant 0 : i32
    %c0_i32_2 = arith.constant 0 : i32
    return %c0_i32, %c0_i32_0, %c0_i32_1 : i32, i32, i32
  }
  func.func @transform_5(%arg0: i32) -> (i32, i32, i32, i32) {
    %c0_i32 = arith.constant 0 : i32
    %c0_i32_0 = arith.constant 0 : i32
    %c0_i32_1 = arith.constant 0 : i32
    %c0_i32_2 = arith.constant 0 : i32
    %c0_i32_3 = arith.constant 0 : i32
    return %c0_i32, %c0_i32_0, %c0_i32_1, %c0_i32_2 : i32, i32, i32, i32
  }
  func.func @transform_6(%arg0: i32) -> (i32, i32, i32) {
    %c0_i32 = arith.constant 0 : i32
    %c0_i32_0 = arith.constant 0 : i32
    %c0_i32_1 = arith.constant 0 : i32
    %c0_i32_2 = arith.constant 0 : i32
    return %c0_i32, %c0_i32_0, %c0_i32_1 : i32, i32, i32
  }
  func.func @transform_7(%arg0: i32) -> (i32, i32) {
    %c0_i32 = arith.constant 0 : i32
    %c0_i32_0 = arith.constant 0 : i32
    %c0_i32_1 = arith.constant 0 : i32
    return %c0_i32, %c0_i32_0 : i32, i32
  }
  func.func @transform_8(%arg0: i32) -> (i32, i32) {
    %c0_i32 = arith.constant 0 : i32
    %c0_i32_0 = arith.constant 0 : i32
    %c0_i32_1 = arith.constant 0 : i32
    return %c0_i32, %c0_i32_0 : i32, i32
  }
  func.func @transform_9(%arg0: i32) -> (i32, i32) {
    %c0_i32 = arith.constant 0 : i32
    %c0_i32_0 = arith.constant 0 : i32
    %c0_i32_1 = arith.constant 0 : i32
    return %c0_i32, %c0_i32_0 : i32, i32
  }
  func.func @transform_10(%arg0: i32) -> (i32, i32) {
    %c0_i32 = arith.constant 0 : i32
    %c0_i32_0 = arith.constant 0 : i32
    %c0_i32_1 = arith.constant 0 : i32
    return %c0_i32, %c0_i32_0 : i32, i32
  }
  func.func @transform_11(%arg0: i32) -> (i32, i32) {
    %c0_i32 = arith.constant 0 : i32
    %c0_i32_0 = arith.constant 0 : i32
    %c0_i32_1 = arith.constant 0 : i32
    return %c0_i32, %c0_i32_0 : i32, i32
  }
  func.func @transform_12(%arg0: i32) -> (i32, i32) {
    %c0_i32 = arith.constant 0 : i32
    %c0_i32_0 = arith.constant 0 : i32
    %c0_i32_1 = arith.constant 0 : i32
    return %c0_i32, %c0_i32_0 : i32, i32
  }
  func.func @transform_13(%arg0: i32) -> (i32, i32) {
    %c0_i32 = arith.constant 0 : i32
    %c0_i32_0 = arith.constant 0 : i32
    %c0_i32_1 = arith.constant 0 : i32
    return %c0_i32, %c0_i32_0 : i32, i32
  }
  func.func @transform_14(%arg0: i32) -> (i32, i32, i32) {
    %c0_i32 = arith.constant 0 : i32
    %c0_i32_0 = arith.constant 0 : i32
    %c0_i32_1 = arith.constant 0 : i32
    return %arg0, %c0_i32, %c0_i32_0 : i32, i32, i32
  }
}

module attributes {stable_mosaic.version = 11 : i64} {
  func.func @_lstm_kernel(%arg0: memref<8x2x16xf32, #tpu.memory_space<vmem>>, %arg1: memref<4x16x16xbf16, #tpu.memory_space<vmem>>, %arg2: memref<4x16x16xbf16, #tpu.memory_space<vmem>>, %arg3: memref<4x1x16xf32, #tpu.memory_space<vmem>>, %arg4: memref<8x2x16xf32, #tpu.memory_space<vmem>>, %arg5: memref<16x16xf32, #tpu.memory_space<vmem>>, %arg6: memref<16x16xf32, #tpu.memory_space<vmem>>, %arg7: memref<16x16xf32, #tpu.memory_space<vmem>>, %arg8: memref<16x16xf32, #tpu.memory_space<vmem>>) attributes {dimension_semantics = [], scalar_prefetch = 0 : i64, scratch_operands = 4 : i64, tpu.core_type = #tpu.core_type<tc>} {
    %c0 = arith.constant 0 : index
    %c0_0 = arith.constant 0 : index
    %c0_1 = arith.constant 0 : index
    %0 = vector.load %arg0[%c0, %c0_0, %c0_1] : memref<8x2x16xf32, #tpu.memory_space<vmem>>, vector<8x2x16xf32>
    %1 = vector.shape_cast %0 : vector<8x2x16xf32> to vector<16x16xf32>
    %2 = arith.truncf %1 : vector<16x16xf32> to vector<16x16xbf16>
    %c0_2 = arith.constant 0 : index
    %c0_3 = arith.constant 0 : index
    %c0_4 = arith.constant 0 : index
    %3 = vector.load %arg1[%c0_2, %c0_3, %c0_4] : memref<4x16x16xbf16, #tpu.memory_space<vmem>>, vector<1x16x16xbf16>
    %4 = vector.shape_cast %3 : vector<1x16x16xbf16> to vector<16x16xbf16>
    %cst = arith.constant dense<0.000000e+00> : vector<16x16xf32>
    %5 = tpu.matmul %2, %4, %cst {dimension_numbers = #tpu.dot_dimension_numbers<[1], [0], [0], [1], [0, 0, 1, 1], [], []>} : vector<16x16xbf16>, vector<16x16xbf16>, vector<16x16xf32> -> vector<16x16xf32>
    %c0_5 = arith.constant 0 : index
    %c0_6 = arith.constant 0 : index
    %c0_7 = arith.constant 0 : index
    %6 = vector.load %arg3[%c0_5, %c0_6, %c0_7] : memref<4x1x16xf32, #tpu.memory_space<vmem>>, vector<1x1x16xf32>
    %7 = vector.shape_cast %6 : vector<1x1x16xf32> to vector<1x16xf32>
    %8 = vector.broadcast %7 : vector<1x16xf32> to vector<16x16xf32>
    %9 = arith.addf %5, %8 : vector<16x16xf32>
    %c0_8 = arith.constant 0 : index
    %c0_9 = arith.constant 0 : index
    %10 = vector.load %arg5[%c0_8, %c0_9] : memref<16x16xf32, #tpu.memory_space<vmem>>, vector<16x16xf32>
    tpu.vector_store %arg5[%c0_8, %c0_9], %9 {strides = array<i32>} : memref<16x16xf32, #tpu.memory_space<vmem>>, vector<16x16xf32>,
    %c1 = arith.constant 1 : index
    %c0_10 = arith.constant 0 : index
    %c0_11 = arith.constant 0 : index
    %11 = vector.load %arg1[%c1, %c0_10, %c0_11] : memref<4x16x16xbf16, #tpu.memory_space<vmem>>, vector<1x16x16xbf16>
    %12 = vector.shape_cast %11 : vector<1x16x16xbf16> to vector<16x16xbf16>
    %cst_12 = arith.constant dense<0.000000e+00> : vector<16x16xf32>
    %13 = tpu.matmul %2, %12, %cst_12 {dimension_numbers = #tpu.dot_dimension_numbers<[1], [0], [0], [1], [0, 0, 1, 1], [], []>} : vector<16x16xbf16>, vector<16x16xbf16>, vector<16x16xf32> -> vector<16x16xf32>
    %c1_13 = arith.constant 1 : index
    %c0_14 = arith.constant 0 : index
    %c0_15 = arith.constant 0 : index
    %14 = vector.load %arg3[%c1_13, %c0_14, %c0_15] : memref<4x1x16xf32, #tpu.memory_space<vmem>>, vector<1x1x16xf32>
    %15 = vector.shape_cast %14 : vector<1x1x16xf32> to vector<1x16xf32>
    %16 = vector.broadcast %15 : vector<1x16xf32> to vector<16x16xf32>
    %17 = arith.addf %13, %16 : vector<16x16xf32>
    %c0_16 = arith.constant 0 : index
    %c0_17 = arith.constant 0 : index
    %18 = vector.load %arg6[%c0_16, %c0_17] : memref<16x16xf32, #tpu.memory_space<vmem>>, vector<16x16xf32>
    tpu.vector_store %arg6[%c0_16, %c0_17], %17 {strides = array<i32>} : memref<16x16xf32, #tpu.memory_space<vmem>>, vector<16x16xf32>,
    %c2 = arith.constant 2 : index
    %c0_18 = arith.constant 0 : index
    %c0_19 = arith.constant 0 : index
    %19 = vector.load %arg1[%c2, %c0_18, %c0_19] : memref<4x16x16xbf16, #tpu.memory_space<vmem>>, vector<1x16x16xbf16>
    %20 = vector.shape_cast %19 : vector<1x16x16xbf16> to vector<16x16xbf16>
    %cst_20 = arith.constant dense<0.000000e+00> : vector<16x16xf32>
    %21 = tpu.matmul %2, %20, %cst_20 {dimension_numbers = #tpu.dot_dimension_numbers<[1], [0], [0], [1], [0, 0, 1, 1], [], []>} : vector<16x16xbf16>, vector<16x16xbf16>, vector<16x16xf32> -> vector<16x16xf32>
    %c2_21 = arith.constant 2 : index
    %c0_22 = arith.constant 0 : index
    %c0_23 = arith.constant 0 : index
    %22 = vector.load %arg3[%c2_21, %c0_22, %c0_23] : memref<4x1x16xf32, #tpu.memory_space<vmem>>, vector<1x1x16xf32>
    %23 = vector.shape_cast %22 : vector<1x1x16xf32> to vector<1x16xf32>
    %24 = vector.broadcast %23 : vector<1x16xf32> to vector<16x16xf32>
    %25 = arith.addf %21, %24 : vector<16x16xf32>
    %c0_24 = arith.constant 0 : index
    %c0_25 = arith.constant 0 : index
    %26 = vector.load %arg7[%c0_24, %c0_25] : memref<16x16xf32, #tpu.memory_space<vmem>>, vector<16x16xf32>
    tpu.vector_store %arg7[%c0_24, %c0_25], %25 {strides = array<i32>} : memref<16x16xf32, #tpu.memory_space<vmem>>, vector<16x16xf32>,
    %c3 = arith.constant 3 : index
    %c0_26 = arith.constant 0 : index
    %c0_27 = arith.constant 0 : index
    %27 = vector.load %arg1[%c3, %c0_26, %c0_27] : memref<4x16x16xbf16, #tpu.memory_space<vmem>>, vector<1x16x16xbf16>
    %28 = vector.shape_cast %27 : vector<1x16x16xbf16> to vector<16x16xbf16>
    %cst_28 = arith.constant dense<0.000000e+00> : vector<16x16xf32>
    %29 = tpu.matmul %2, %28, %cst_28 {dimension_numbers = #tpu.dot_dimension_numbers<[1], [0], [0], [1], [0, 0, 1, 1], [], []>} : vector<16x16xbf16>, vector<16x16xbf16>, vector<16x16xf32> -> vector<16x16xf32>
    %c3_29 = arith.constant 3 : index
    %c0_30 = arith.constant 0 : index
    %c0_31 = arith.constant 0 : index
    %30 = vector.load %arg3[%c3_29, %c0_30, %c0_31] : memref<4x1x16xf32, #tpu.memory_space<vmem>>, vector<1x1x16xf32>
    %31 = vector.shape_cast %30 : vector<1x1x16xf32> to vector<1x16xf32>
    %32 = vector.broadcast %31 : vector<1x16xf32> to vector<16x16xf32>
    %33 = arith.addf %29, %32 : vector<16x16xf32>
    %c0_32 = arith.constant 0 : index
    %c0_33 = arith.constant 0 : index
    %34 = vector.load %arg8[%c0_32, %c0_33] : memref<16x16xf32, #tpu.memory_space<vmem>>, vector<16x16xf32>
    tpu.vector_store %arg8[%c0_32, %c0_33], %33 {strides = array<i32>} : memref<16x16xf32, #tpu.memory_space<vmem>>, vector<16x16xf32>,
    %cst_34 = arith.constant 0.000000e+00 : f32
    %35 = vector.broadcast %cst_34 : f32 to vector<2x16xf32>
    %cst_35 = arith.constant 0.000000e+00 : f32
    %36 = vector.broadcast %cst_35 : f32 to vector<2x16xf32>
    %c0_i32 = arith.constant 0 : i32
    %37 = arith.truncf %35 : vector<2x16xf32> to vector<2x16xbf16>
    %c2_i32 = arith.constant 2 : i32
    %38 = arith.muli %c0_i32, %c2_i32 : i32
    %39 = arith.index_cast %38 : i32 to index
    %c0_36 = arith.constant 0 : index
    %40 = vector.load %arg5[%39, %c0_36] : memref<16x16xf32, #tpu.memory_space<vmem>>, vector<2x16xf32>
    %c0_37 = arith.constant 0 : index
    %c0_38 = arith.constant 0 : index
    %c0_39 = arith.constant 0 : index
    %41 = vector.load %arg2[%c0_37, %c0_38, %c0_39] : memref<4x16x16xbf16, #tpu.memory_space<vmem>>, vector<1x16x16xbf16>
    %42 = vector.shape_cast %41 : vector<1x16x16xbf16> to vector<16x16xbf16>
    %cst_40 = arith.constant dense<0.000000e+00> : vector<2x16xf32>
    %43 = tpu.matmul %37, %42, %cst_40 {dimension_numbers = #tpu.dot_dimension_numbers<[1], [0], [0], [1], [0, 0, 1, 1], [], []>} : vector<2x16xbf16>, vector<16x16xbf16>, vector<2x16xf32> -> vector<2x16xf32>
    %44 = arith.addf %40, %43 : vector<2x16xf32>
    %45 = arith.negf %44 : vector<2x16xf32>
    %46 = math.exp %45 : vector<2x16xf32>
    %cst_41 = arith.constant 1.000000e+00 : f32
    %47 = vector.broadcast %cst_41 : f32 to vector<2x16xf32>
    %48 = arith.addf %47, %46 : vector<2x16xf32>
    %49 = arith.divf %47, %48 : vector<2x16xf32>
    %50 = arith.index_cast %38 : i32 to index
    %c0_42 = arith.constant 0 : index
    %51 = vector.load %arg6[%50, %c0_42] : memref<16x16xf32, #tpu.memory_space<vmem>>, vector<2x16xf32>
    %c1_43 = arith.constant 1 : index
    %c0_44 = arith.constant 0 : index
    %c0_45 = arith.constant 0 : index
    %52 = vector.load %arg2[%c1_43, %c0_44, %c0_45] : memref<4x16x16xbf16, #tpu.memory_space<vmem>>, vector<1x16x16xbf16>
    %53 = vector.shape_cast %52 : vector<1x16x16xbf16> to vector<16x16xbf16>
    %cst_46 = arith.constant dense<0.000000e+00> : vector<2x16xf32>
    %54 = tpu.matmul %37, %53, %cst_46 {dimension_numbers = #tpu.dot_dimension_numbers<[1], [0], [0], [1], [0, 0, 1, 1], [], []>} : vector<2x16xbf16>, vector<16x16xbf16>, vector<2x16xf32> -> vector<2x16xf32>
    %55 = arith.addf %51, %54 : vector<2x16xf32>
    %56 = arith.negf %55 : vector<2x16xf32>
    %57 = math.exp %56 : vector<2x16xf32>
    %cst_47 = arith.constant 1.000000e+00 : f32
    %58 = vector.broadcast %cst_47 : f32 to vector<2x16xf32>
    %59 = arith.addf %58, %57 : vector<2x16xf32>
    %60 = arith.divf %58, %59 : vector<2x16xf32>
    %61 = arith.index_cast %38 : i32 to index
    %c0_48 = arith.constant 0 : index
    %62 = vector.load %arg7[%61, %c0_48] : memref<16x16xf32, #tpu.memory_space<vmem>>, vector<2x16xf32>
    %c2_49 = arith.constant 2 : index
    %c0_50 = arith.constant 0 : index
    %c0_51 = arith.constant 0 : index
    %63 = vector.load %arg2[%c2_49, %c0_50, %c0_51] : memref<4x16x16xbf16, #tpu.memory_space<vmem>>, vector<1x16x16xbf16>
    %64 = vector.shape_cast %63 : vector<1x16x16xbf16> to vector<16x16xbf16>
    %cst_52 = arith.constant dense<0.000000e+00> : vector<2x16xf32>
    %65 = tpu.matmul %37, %64, %cst_52 {dimension_numbers = #tpu.dot_dimension_numbers<[1], [0], [0], [1], [0, 0, 1, 1], [], []>} : vector<2x16xbf16>, vector<16x16xbf16>, vector<2x16xf32> -> vector<2x16xf32>
    %66 = arith.addf %62, %65 : vector<2x16xf32>
    %67 = math.tanh %66 : vector<2x16xf32>
    %68 = arith.index_cast %38 : i32 to index
    %c0_53 = arith.constant 0 : index
    %69 = vector.load %arg8[%68, %c0_53] : memref<16x16xf32, #tpu.memory_space<vmem>>, vector<2x16xf32>
    %c3_54 = arith.constant 3 : index
    %c0_55 = arith.constant 0 : index
    %c0_56 = arith.constant 0 : index
    %70 = vector.load %arg2[%c3_54, %c0_55, %c0_56] : memref<4x16x16xbf16, #tpu.memory_space<vmem>>, vector<1x16x16xbf16>
    %71 = vector.shape_cast %70 : vector<1x16x16xbf16> to vector<16x16xbf16>
    %cst_57 = arith.constant dense<0.000000e+00> : vector<2x16xf32>
    %72 = tpu.matmul %37, %71, %cst_57 {dimension_numbers = #tpu.dot_dimension_numbers<[1], [0], [0], [1], [0, 0, 1, 1], [], []>} : vector<2x16xbf16>, vector<16x16xbf16>, vector<2x16xf32> -> vector<2x16xf32>
    %73 = arith.addf %69, %72 : vector<2x16xf32>
    %74 = arith.negf %73 : vector<2x16xf32>
    %75 = math.exp %74 : vector<2x16xf32>
    %cst_58 = arith.constant 1.000000e+00 : f32
    %76 = vector.broadcast %cst_58 : f32 to vector<2x16xf32>
    %77 = arith.addf %76, %75 : vector<2x16xf32>
    %78 = arith.divf %76, %77 : vector<2x16xf32>
    %79 = arith.mulf %60, %36 : vector<2x16xf32>
    %80 = arith.mulf %49, %67 : vector<2x16xf32>
    %81 = arith.addf %79, %80 : vector<2x16xf32>
    %82 = math.tanh %81 : vector<2x16xf32>
    %83 = arith.mulf %78, %82 : vector<2x16xf32>
    %84 = arith.index_cast %c0_i32 : i32 to index
    %c0_59 = arith.constant 0 : index
    %c0_60 = arith.constant 0 : index
    %85 = vector.load %arg4[%84, %c0_59, %c0_60] : memref<8x2x16xf32, #tpu.memory_space<vmem>>, vector<1x2x16xf32>
    %86 = vector.shape_cast %85 : vector<1x2x16xf32> to vector<2x16xf32>
    %87 = vector.shape_cast %83 : vector<2x16xf32> to vector<1x2x16xf32>
    tpu.vector_store %arg4[%84, %c0_59, %c0_60], %87 {strides = array<i32>} : memref<8x2x16xf32, #tpu.memory_space<vmem>>, vector<1x2x16xf32>,
    %c1_i32 = arith.constant 1 : i32
    %88 = arith.truncf %83 : vector<2x16xf32> to vector<2x16xbf16>
    %c2_i32_61 = arith.constant 2 : i32
    %89 = arith.muli %c1_i32, %c2_i32_61 : i32
    %90 = arith.index_cast %89 : i32 to index
    %c0_62 = arith.constant 0 : index
    %91 = vector.load %arg5[%90, %c0_62] : memref<16x16xf32, #tpu.memory_space<vmem>>, vector<2x16xf32>
    %c0_63 = arith.constant 0 : index
    %c0_64 = arith.constant 0 : index
    %c0_65 = arith.constant 0 : index
    %92 = vector.load %arg2[%c0_63, %c0_64, %c0_65] : memref<4x16x16xbf16, #tpu.memory_space<vmem>>, vector<1x16x16xbf16>
    %93 = vector.shape_cast %92 : vector<1x16x16xbf16> to vector<16x16xbf16>
    %cst_66 = arith.constant dense<0.000000e+00> : vector<2x16xf32>
    %94 = tpu.matmul %88, %93, %cst_66 {dimension_numbers = #tpu.dot_dimension_numbers<[1], [0], [0], [1], [0, 0, 1, 1], [], []>} : vector<2x16xbf16>, vector<16x16xbf16>, vector<2x16xf32> -> vector<2x16xf32>
    %95 = arith.addf %91, %94 : vector<2x16xf32>
    %96 = arith.negf %95 : vector<2x16xf32>
    %97 = math.exp %96 : vector<2x16xf32>
    %cst_67 = arith.constant 1.000000e+00 : f32
    %98 = vector.broadcast %cst_67 : f32 to vector<2x16xf32>
    %99 = arith.addf %98, %97 : vector<2x16xf32>
    %100 = arith.divf %98, %99 : vector<2x16xf32>
    %101 = arith.index_cast %89 : i32 to index
    %c0_68 = arith.constant 0 : index
    %102 = vector.load %arg6[%101, %c0_68] : memref<16x16xf32, #tpu.memory_space<vmem>>, vector<2x16xf32>
    %c1_69 = arith.constant 1 : index
    %c0_70 = arith.constant 0 : index
    %c0_71 = arith.constant 0 : index
    %103 = vector.load %arg2[%c1_69, %c0_70, %c0_71] : memref<4x16x16xbf16, #tpu.memory_space<vmem>>, vector<1x16x16xbf16>
    %104 = vector.shape_cast %103 : vector<1x16x16xbf16> to vector<16x16xbf16>
    %cst_72 = arith.constant dense<0.000000e+00> : vector<2x16xf32>
    %105 = tpu.matmul %88, %104, %cst_72 {dimension_numbers = #tpu.dot_dimension_numbers<[1], [0], [0], [1], [0, 0, 1, 1], [], []>} : vector<2x16xbf16>, vector<16x16xbf16>, vector<2x16xf32> -> vector<2x16xf32>
    %106 = arith.addf %102, %105 : vector<2x16xf32>
    %107 = arith.negf %106 : vector<2x16xf32>
    %108 = math.exp %107 : vector<2x16xf32>
    %cst_73 = arith.constant 1.000000e+00 : f32
    %109 = vector.broadcast %cst_73 : f32 to vector<2x16xf32>
    %110 = arith.addf %109, %108 : vector<2x16xf32>
    %111 = arith.divf %109, %110 : vector<2x16xf32>
    %112 = arith.index_cast %89 : i32 to index
    %c0_74 = arith.constant 0 : index
    %113 = vector.load %arg7[%112, %c0_74] : memref<16x16xf32, #tpu.memory_space<vmem>>, vector<2x16xf32>
    %c2_75 = arith.constant 2 : index
    %c0_76 = arith.constant 0 : index
    %c0_77 = arith.constant 0 : index
    %114 = vector.load %arg2[%c2_75, %c0_76, %c0_77] : memref<4x16x16xbf16, #tpu.memory_space<vmem>>, vector<1x16x16xbf16>
    %115 = vector.shape_cast %114 : vector<1x16x16xbf16> to vector<16x16xbf16>
    %cst_78 = arith.constant dense<0.000000e+00> : vector<2x16xf32>
    %116 = tpu.matmul %88, %115, %cst_78 {dimension_numbers = #tpu.dot_dimension_numbers<[1], [0], [0], [1], [0, 0, 1, 1], [], []>} : vector<2x16xbf16>, vector<16x16xbf16>, vector<2x16xf32> -> vector<2x16xf32>
    %117 = arith.addf %113, %116 : vector<2x16xf32>
    %118 = math.tanh %117 : vector<2x16xf32>
    %119 = arith.index_cast %89 : i32 to index
    %c0_79 = arith.constant 0 : index
    %120 = vector.load %arg8[%119, %c0_79] : memref<16x16xf32, #tpu.memory_space<vmem>>, vector<2x16xf32>
    %c3_80 = arith.constant 3 : index
    %c0_81 = arith.constant 0 : index
    %c0_82 = arith.constant 0 : index
    %121 = vector.load %arg2[%c3_80, %c0_81, %c0_82] : memref<4x16x16xbf16, #tpu.memory_space<vmem>>, vector<1x16x16xbf16>
    %122 = vector.shape_cast %121 : vector<1x16x16xbf16> to vector<16x16xbf16>
    %cst_83 = arith.constant dense<0.000000e+00> : vector<2x16xf32>
    %123 = tpu.matmul %88, %122, %cst_83 {dimension_numbers = #tpu.dot_dimension_numbers<[1], [0], [0], [1], [0, 0, 1, 1], [], []>} : vector<2x16xbf16>, vector<16x16xbf16>, vector<2x16xf32> -> vector<2x16xf32>
    %124 = arith.addf %120, %123 : vector<2x16xf32>
    %125 = arith.negf %124 : vector<2x16xf32>
    %126 = math.exp %125 : vector<2x16xf32>
    %cst_84 = arith.constant 1.000000e+00 : f32
    %127 = vector.broadcast %cst_84 : f32 to vector<2x16xf32>
    %128 = arith.addf %127, %126 : vector<2x16xf32>
    %129 = arith.divf %127, %128 : vector<2x16xf32>
    %130 = arith.mulf %111, %81 : vector<2x16xf32>
    %131 = arith.mulf %100, %118 : vector<2x16xf32>
    %132 = arith.addf %130, %131 : vector<2x16xf32>
    %133 = math.tanh %132 : vector<2x16xf32>
    %134 = arith.mulf %129, %133 : vector<2x16xf32>
    %135 = arith.index_cast %c1_i32 : i32 to index
    %c0_85 = arith.constant 0 : index
    %c0_86 = arith.constant 0 : index
    %136 = vector.load %arg4[%135, %c0_85, %c0_86] : memref<8x2x16xf32, #tpu.memory_space<vmem>>, vector<1x2x16xf32>
    %137 = vector.shape_cast %136 : vector<1x2x16xf32> to vector<2x16xf32>
    %138 = vector.shape_cast %134 : vector<2x16xf32> to vector<1x2x16xf32>
    tpu.vector_store %arg4[%135, %c0_85, %c0_86], %138 {strides = array<i32>} : memref<8x2x16xf32, #tpu.memory_space<vmem>>, vector<1x2x16xf32>,
    %c2_i32_87 = arith.constant 2 : i32
    %139 = arith.truncf %134 : vector<2x16xf32> to vector<2x16xbf16>
    %c2_i32_88 = arith.constant 2 : i32
    %140 = arith.muli %c2_i32_87, %c2_i32_88 : i32
    %141 = arith.index_cast %140 : i32 to index
    %c0_89 = arith.constant 0 : index
    %142 = vector.load %arg5[%141, %c0_89] : memref<16x16xf32, #tpu.memory_space<vmem>>, vector<2x16xf32>
    %c0_90 = arith.constant 0 : index
    %c0_91 = arith.constant 0 : index
    %c0_92 = arith.constant 0 : index
    %143 = vector.load %arg2[%c0_90, %c0_91, %c0_92] : memref<4x16x16xbf16, #tpu.memory_space<vmem>>, vector<1x16x16xbf16>
    %144 = vector.shape_cast %143 : vector<1x16x16xbf16> to vector<16x16xbf16>
    %cst_93 = arith.constant dense<0.000000e+00> : vector<2x16xf32>
    %145 = tpu.matmul %139, %144, %cst_93 {dimension_numbers = #tpu.dot_dimension_numbers<[1], [0], [0], [1], [0, 0, 1, 1], [], []>} : vector<2x16xbf16>, vector<16x16xbf16>, vector<2x16xf32> -> vector<2x16xf32>
    %146 = arith.addf %142, %145 : vector<2x16xf32>
    %147 = arith.negf %146 : vector<2x16xf32>
    %148 = math.exp %147 : vector<2x16xf32>
    %cst_94 = arith.constant 1.000000e+00 : f32
    %149 = vector.broadcast %cst_94 : f32 to vector<2x16xf32>
    %150 = arith.addf %149, %148 : vector<2x16xf32>
    %151 = arith.divf %149, %150 : vector<2x16xf32>
    %152 = arith.index_cast %140 : i32 to index
    %c0_95 = arith.constant 0 : index
    %153 = vector.load %arg6[%152, %c0_95] : memref<16x16xf32, #tpu.memory_space<vmem>>, vector<2x16xf32>
    %c1_96 = arith.constant 1 : index
    %c0_97 = arith.constant 0 : index
    %c0_98 = arith.constant 0 : index
    %154 = vector.load %arg2[%c1_96, %c0_97, %c0_98] : memref<4x16x16xbf16, #tpu.memory_space<vmem>>, vector<1x16x16xbf16>
    %155 = vector.shape_cast %154 : vector<1x16x16xbf16> to vector<16x16xbf16>
    %cst_99 = arith.constant dense<0.000000e+00> : vector<2x16xf32>
    %156 = tpu.matmul %139, %155, %cst_99 {dimension_numbers = #tpu.dot_dimension_numbers<[1], [0], [0], [1], [0, 0, 1, 1], [], []>} : vector<2x16xbf16>, vector<16x16xbf16>, vector<2x16xf32> -> vector<2x16xf32>
    %157 = arith.addf %153, %156 : vector<2x16xf32>
    %158 = arith.negf %157 : vector<2x16xf32>
    %159 = math.exp %158 : vector<2x16xf32>
    %cst_100 = arith.constant 1.000000e+00 : f32
    %160 = vector.broadcast %cst_100 : f32 to vector<2x16xf32>
    %161 = arith.addf %160, %159 : vector<2x16xf32>
    %162 = arith.divf %160, %161 : vector<2x16xf32>
    %163 = arith.index_cast %140 : i32 to index
    %c0_101 = arith.constant 0 : index
    %164 = vector.load %arg7[%163, %c0_101] : memref<16x16xf32, #tpu.memory_space<vmem>>, vector<2x16xf32>
    %c2_102 = arith.constant 2 : index
    %c0_103 = arith.constant 0 : index
    %c0_104 = arith.constant 0 : index
    %165 = vector.load %arg2[%c2_102, %c0_103, %c0_104] : memref<4x16x16xbf16, #tpu.memory_space<vmem>>, vector<1x16x16xbf16>
    %166 = vector.shape_cast %165 : vector<1x16x16xbf16> to vector<16x16xbf16>
    %cst_105 = arith.constant dense<0.000000e+00> : vector<2x16xf32>
    %167 = tpu.matmul %139, %166, %cst_105 {dimension_numbers = #tpu.dot_dimension_numbers<[1], [0], [0], [1], [0, 0, 1, 1], [], []>} : vector<2x16xbf16>, vector<16x16xbf16>, vector<2x16xf32> -> vector<2x16xf32>
    %168 = arith.addf %164, %167 : vector<2x16xf32>
    %169 = math.tanh %168 : vector<2x16xf32>
    %170 = arith.index_cast %140 : i32 to index
    %c0_106 = arith.constant 0 : index
    %171 = vector.load %arg8[%170, %c0_106] : memref<16x16xf32, #tpu.memory_space<vmem>>, vector<2x16xf32>
    %c3_107 = arith.constant 3 : index
    %c0_108 = arith.constant 0 : index
    %c0_109 = arith.constant 0 : index
    %172 = vector.load %arg2[%c3_107, %c0_108, %c0_109] : memref<4x16x16xbf16, #tpu.memory_space<vmem>>, vector<1x16x16xbf16>
    %173 = vector.shape_cast %172 : vector<1x16x16xbf16> to vector<16x16xbf16>
    %cst_110 = arith.constant dense<0.000000e+00> : vector<2x16xf32>
    %174 = tpu.matmul %139, %173, %cst_110 {dimension_numbers = #tpu.dot_dimension_numbers<[1], [0], [0], [1], [0, 0, 1, 1], [], []>} : vector<2x16xbf16>, vector<16x16xbf16>, vector<2x16xf32> -> vector<2x16xf32>
    %175 = arith.addf %171, %174 : vector<2x16xf32>
    %176 = arith.negf %175 : vector<2x16xf32>
    %177 = math.exp %176 : vector<2x16xf32>
    %cst_111 = arith.constant 1.000000e+00 : f32
    %178 = vector.broadcast %cst_111 : f32 to vector<2x16xf32>
    %179 = arith.addf %178, %177 : vector<2x16xf32>
    %180 = arith.divf %178, %179 : vector<2x16xf32>
    %181 = arith.mulf %162, %132 : vector<2x16xf32>
    %182 = arith.mulf %151, %169 : vector<2x16xf32>
    %183 = arith.addf %181, %182 : vector<2x16xf32>
    %184 = math.tanh %183 : vector<2x16xf32>
    %185 = arith.mulf %180, %184 : vector<2x16xf32>
    %186 = arith.index_cast %c2_i32_87 : i32 to index
    %c0_112 = arith.constant 0 : index
    %c0_113 = arith.constant 0 : index
    %187 = vector.load %arg4[%186, %c0_112, %c0_113] : memref<8x2x16xf32, #tpu.memory_space<vmem>>, vector<1x2x16xf32>
    %188 = vector.shape_cast %187 : vector<1x2x16xf32> to vector<2x16xf32>
    %189 = vector.shape_cast %185 : vector<2x16xf32> to vector<1x2x16xf32>
    tpu.vector_store %arg4[%186, %c0_112, %c0_113], %189 {strides = array<i32>} : memref<8x2x16xf32, #tpu.memory_space<vmem>>, vector<1x2x16xf32>,
    %c3_i32 = arith.constant 3 : i32
    %190 = arith.truncf %185 : vector<2x16xf32> to vector<2x16xbf16>
    %c2_i32_114 = arith.constant 2 : i32
    %191 = arith.muli %c3_i32, %c2_i32_114 : i32
    %192 = arith.index_cast %191 : i32 to index
    %c0_115 = arith.constant 0 : index
    %193 = vector.load %arg5[%192, %c0_115] : memref<16x16xf32, #tpu.memory_space<vmem>>, vector<2x16xf32>
    %c0_116 = arith.constant 0 : index
    %c0_117 = arith.constant 0 : index
    %c0_118 = arith.constant 0 : index
    %194 = vector.load %arg2[%c0_116, %c0_117, %c0_118] : memref<4x16x16xbf16, #tpu.memory_space<vmem>>, vector<1x16x16xbf16>
    %195 = vector.shape_cast %194 : vector<1x16x16xbf16> to vector<16x16xbf16>
    %cst_119 = arith.constant dense<0.000000e+00> : vector<2x16xf32>
    %196 = tpu.matmul %190, %195, %cst_119 {dimension_numbers = #tpu.dot_dimension_numbers<[1], [0], [0], [1], [0, 0, 1, 1], [], []>} : vector<2x16xbf16>, vector<16x16xbf16>, vector<2x16xf32> -> vector<2x16xf32>
    %197 = arith.addf %193, %196 : vector<2x16xf32>
    %198 = arith.negf %197 : vector<2x16xf32>
    %199 = math.exp %198 : vector<2x16xf32>
    %cst_120 = arith.constant 1.000000e+00 : f32
    %200 = vector.broadcast %cst_120 : f32 to vector<2x16xf32>
    %201 = arith.addf %200, %199 : vector<2x16xf32>
    %202 = arith.divf %200, %201 : vector<2x16xf32>
    %203 = arith.index_cast %191 : i32 to index
    %c0_121 = arith.constant 0 : index
    %204 = vector.load %arg6[%203, %c0_121] : memref<16x16xf32, #tpu.memory_space<vmem>>, vector<2x16xf32>
    %c1_122 = arith.constant 1 : index
    %c0_123 = arith.constant 0 : index
    %c0_124 = arith.constant 0 : index
    %205 = vector.load %arg2[%c1_122, %c0_123, %c0_124] : memref<4x16x16xbf16, #tpu.memory_space<vmem>>, vector<1x16x16xbf16>
    %206 = vector.shape_cast %205 : vector<1x16x16xbf16> to vector<16x16xbf16>
    %cst_125 = arith.constant dense<0.000000e+00> : vector<2x16xf32>
    %207 = tpu.matmul %190, %206, %cst_125 {dimension_numbers = #tpu.dot_dimension_numbers<[1], [0], [0], [1], [0, 0, 1, 1], [], []>} : vector<2x16xbf16>, vector<16x16xbf16>, vector<2x16xf32> -> vector<2x16xf32>
    %208 = arith.addf %204, %207 : vector<2x16xf32>
    %209 = arith.negf %208 : vector<2x16xf32>
    %210 = math.exp %209 : vector<2x16xf32>
    %cst_126 = arith.constant 1.000000e+00 : f32
    %211 = vector.broadcast %cst_126 : f32 to vector<2x16xf32>
    %212 = arith.addf %211, %210 : vector<2x16xf32>
    %213 = arith.divf %211, %212 : vector<2x16xf32>
    %214 = arith.index_cast %191 : i32 to index
    %c0_127 = arith.constant 0 : index
    %215 = vector.load %arg7[%214, %c0_127] : memref<16x16xf32, #tpu.memory_space<vmem>>, vector<2x16xf32>
    %c2_128 = arith.constant 2 : index
    %c0_129 = arith.constant 0 : index
    %c0_130 = arith.constant 0 : index
    %216 = vector.load %arg2[%c2_128, %c0_129, %c0_130] : memref<4x16x16xbf16, #tpu.memory_space<vmem>>, vector<1x16x16xbf16>
    %217 = vector.shape_cast %216 : vector<1x16x16xbf16> to vector<16x16xbf16>
    %cst_131 = arith.constant dense<0.000000e+00> : vector<2x16xf32>
    %218 = tpu.matmul %190, %217, %cst_131 {dimension_numbers = #tpu.dot_dimension_numbers<[1], [0], [0], [1], [0, 0, 1, 1], [], []>} : vector<2x16xbf16>, vector<16x16xbf16>, vector<2x16xf32> -> vector<2x16xf32>
    %219 = arith.addf %215, %218 : vector<2x16xf32>
    %220 = math.tanh %219 : vector<2x16xf32>
    %221 = arith.index_cast %191 : i32 to index
    %c0_132 = arith.constant 0 : index
    %222 = vector.load %arg8[%221, %c0_132] : memref<16x16xf32, #tpu.memory_space<vmem>>, vector<2x16xf32>
    %c3_133 = arith.constant 3 : index
    %c0_134 = arith.constant 0 : index
    %c0_135 = arith.constant 0 : index
    %223 = vector.load %arg2[%c3_133, %c0_134, %c0_135] : memref<4x16x16xbf16, #tpu.memory_space<vmem>>, vector<1x16x16xbf16>
    %224 = vector.shape_cast %223 : vector<1x16x16xbf16> to vector<16x16xbf16>
    %cst_136 = arith.constant dense<0.000000e+00> : vector<2x16xf32>
    %225 = tpu.matmul %190, %224, %cst_136 {dimension_numbers = #tpu.dot_dimension_numbers<[1], [0], [0], [1], [0, 0, 1, 1], [], []>} : vector<2x16xbf16>, vector<16x16xbf16>, vector<2x16xf32> -> vector<2x16xf32>
    %226 = arith.addf %222, %225 : vector<2x16xf32>
    %227 = arith.negf %226 : vector<2x16xf32>
    %228 = math.exp %227 : vector<2x16xf32>
    %cst_137 = arith.constant 1.000000e+00 : f32
    %229 = vector.broadcast %cst_137 : f32 to vector<2x16xf32>
    %230 = arith.addf %229, %228 : vector<2x16xf32>
    %231 = arith.divf %229, %230 : vector<2x16xf32>
    %232 = arith.mulf %213, %183 : vector<2x16xf32>
    %233 = arith.mulf %202, %220 : vector<2x16xf32>
    %234 = arith.addf %232, %233 : vector<2x16xf32>
    %235 = math.tanh %234 : vector<2x16xf32>
    %236 = arith.mulf %231, %235 : vector<2x16xf32>
    %237 = arith.index_cast %c3_i32 : i32 to index
    %c0_138 = arith.constant 0 : index
    %c0_139 = arith.constant 0 : index
    %238 = vector.load %arg4[%237, %c0_138, %c0_139] : memref<8x2x16xf32, #tpu.memory_space<vmem>>, vector<1x2x16xf32>
    %239 = vector.shape_cast %238 : vector<1x2x16xf32> to vector<2x16xf32>
    %240 = vector.shape_cast %236 : vector<2x16xf32> to vector<1x2x16xf32>
    tpu.vector_store %arg4[%237, %c0_138, %c0_139], %240 {strides = array<i32>} : memref<8x2x16xf32, #tpu.memory_space<vmem>>, vector<1x2x16xf32>,
    %c4_i32 = arith.constant 4 : i32
    %241 = arith.truncf %236 : vector<2x16xf32> to vector<2x16xbf16>
    %c2_i32_140 = arith.constant 2 : i32
    %242 = arith.muli %c4_i32, %c2_i32_140 : i32
    %243 = arith.index_cast %242 : i32 to index
    %c0_141 = arith.constant 0 : index
    %244 = vector.load %arg5[%243, %c0_141] : memref<16x16xf32, #tpu.memory_space<vmem>>, vector<2x16xf32>
    %c0_142 = arith.constant 0 : index
    %c0_143 = arith.constant 0 : index
    %c0_144 = arith.constant 0 : index
    %245 = vector.load %arg2[%c0_142, %c0_143, %c0_144] : memref<4x16x16xbf16, #tpu.memory_space<vmem>>, vector<1x16x16xbf16>
    %246 = vector.shape_cast %245 : vector<1x16x16xbf16> to vector<16x16xbf16>
    %cst_145 = arith.constant dense<0.000000e+00> : vector<2x16xf32>
    %247 = tpu.matmul %241, %246, %cst_145 {dimension_numbers = #tpu.dot_dimension_numbers<[1], [0], [0], [1], [0, 0, 1, 1], [], []>} : vector<2x16xbf16>, vector<16x16xbf16>, vector<2x16xf32> -> vector<2x16xf32>
    %248 = arith.addf %244, %247 : vector<2x16xf32>
    %249 = arith.negf %248 : vector<2x16xf32>
    %250 = math.exp %249 : vector<2x16xf32>
    %cst_146 = arith.constant 1.000000e+00 : f32
    %251 = vector.broadcast %cst_146 : f32 to vector<2x16xf32>
    %252 = arith.addf %251, %250 : vector<2x16xf32>
    %253 = arith.divf %251, %252 : vector<2x16xf32>
    %254 = arith.index_cast %242 : i32 to index
    %c0_147 = arith.constant 0 : index
    %255 = vector.load %arg6[%254, %c0_147] : memref<16x16xf32, #tpu.memory_space<vmem>>, vector<2x16xf32>
    %c1_148 = arith.constant 1 : index
    %c0_149 = arith.constant 0 : index
    %c0_150 = arith.constant 0 : index
    %256 = vector.load %arg2[%c1_148, %c0_149, %c0_150] : memref<4x16x16xbf16, #tpu.memory_space<vmem>>, vector<1x16x16xbf16>
    %257 = vector.shape_cast %256 : vector<1x16x16xbf16> to vector<16x16xbf16>
    %cst_151 = arith.constant dense<0.000000e+00> : vector<2x16xf32>
    %258 = tpu.matmul %241, %257, %cst_151 {dimension_numbers = #tpu.dot_dimension_numbers<[1], [0], [0], [1], [0, 0, 1, 1], [], []>} : vector<2x16xbf16>, vector<16x16xbf16>, vector<2x16xf32> -> vector<2x16xf32>
    %259 = arith.addf %255, %258 : vector<2x16xf32>
    %260 = arith.negf %259 : vector<2x16xf32>
    %261 = math.exp %260 : vector<2x16xf32>
    %cst_152 = arith.constant 1.000000e+00 : f32
    %262 = vector.broadcast %cst_152 : f32 to vector<2x16xf32>
    %263 = arith.addf %262, %261 : vector<2x16xf32>
    %264 = arith.divf %262, %263 : vector<2x16xf32>
    %265 = arith.index_cast %242 : i32 to index
    %c0_153 = arith.constant 0 : index
    %266 = vector.load %arg7[%265, %c0_153] : memref<16x16xf32, #tpu.memory_space<vmem>>, vector<2x16xf32>
    %c2_154 = arith.constant 2 : index
    %c0_155 = arith.constant 0 : index
    %c0_156 = arith.constant 0 : index
    %267 = vector.load %arg2[%c2_154, %c0_155, %c0_156] : memref<4x16x16xbf16, #tpu.memory_space<vmem>>, vector<1x16x16xbf16>
    %268 = vector.shape_cast %267 : vector<1x16x16xbf16> to vector<16x16xbf16>
    %cst_157 = arith.constant dense<0.000000e+00> : vector<2x16xf32>
    %269 = tpu.matmul %241, %268, %cst_157 {dimension_numbers = #tpu.dot_dimension_numbers<[1], [0], [0], [1], [0, 0, 1, 1], [], []>} : vector<2x16xbf16>, vector<16x16xbf16>, vector<2x16xf32> -> vector<2x16xf32>
    %270 = arith.addf %266, %269 : vector<2x16xf32>
    %271 = math.tanh %270 : vector<2x16xf32>
    %272 = arith.index_cast %242 : i32 to index
    %c0_158 = arith.constant 0 : index
    %273 = vector.load %arg8[%272, %c0_158] : memref<16x16xf32, #tpu.memory_space<vmem>>, vector<2x16xf32>
    %c3_159 = arith.constant 3 : index
    %c0_160 = arith.constant 0 : index
    %c0_161 = arith.constant 0 : index
    %274 = vector.load %arg2[%c3_159, %c0_160, %c0_161] : memref<4x16x16xbf16, #tpu.memory_space<vmem>>, vector<1x16x16xbf16>
    %275 = vector.shape_cast %274 : vector<1x16x16xbf16> to vector<16x16xbf16>
    %cst_162 = arith.constant dense<0.000000e+00> : vector<2x16xf32>
    %276 = tpu.matmul %241, %275, %cst_162 {dimension_numbers = #tpu.dot_dimension_numbers<[1], [0], [0], [1], [0, 0, 1, 1], [], []>} : vector<2x16xbf16>, vector<16x16xbf16>, vector<2x16xf32> -> vector<2x16xf32>
    %277 = arith.addf %273, %276 : vector<2x16xf32>
    %278 = arith.negf %277 : vector<2x16xf32>
    %279 = math.exp %278 : vector<2x16xf32>
    %cst_163 = arith.constant 1.000000e+00 : f32
    %280 = vector.broadcast %cst_163 : f32 to vector<2x16xf32>
    %281 = arith.addf %280, %279 : vector<2x16xf32>
    %282 = arith.divf %280, %281 : vector<2x16xf32>
    %283 = arith.mulf %264, %234 : vector<2x16xf32>
    %284 = arith.mulf %253, %271 : vector<2x16xf32>
    %285 = arith.addf %283, %284 : vector<2x16xf32>
    %286 = math.tanh %285 : vector<2x16xf32>
    %287 = arith.mulf %282, %286 : vector<2x16xf32>
    %288 = arith.index_cast %c4_i32 : i32 to index
    %c0_164 = arith.constant 0 : index
    %c0_165 = arith.constant 0 : index
    %289 = vector.load %arg4[%288, %c0_164, %c0_165] : memref<8x2x16xf32, #tpu.memory_space<vmem>>, vector<1x2x16xf32>
    %290 = vector.shape_cast %289 : vector<1x2x16xf32> to vector<2x16xf32>
    %291 = vector.shape_cast %287 : vector<2x16xf32> to vector<1x2x16xf32>
    tpu.vector_store %arg4[%288, %c0_164, %c0_165], %291 {strides = array<i32>} : memref<8x2x16xf32, #tpu.memory_space<vmem>>, vector<1x2x16xf32>,
    %c5_i32 = arith.constant 5 : i32
    %292 = arith.truncf %287 : vector<2x16xf32> to vector<2x16xbf16>
    %c2_i32_166 = arith.constant 2 : i32
    %293 = arith.muli %c5_i32, %c2_i32_166 : i32
    %294 = arith.index_cast %293 : i32 to index
    %c0_167 = arith.constant 0 : index
    %295 = vector.load %arg5[%294, %c0_167] : memref<16x16xf32, #tpu.memory_space<vmem>>, vector<2x16xf32>
    %c0_168 = arith.constant 0 : index
    %c0_169 = arith.constant 0 : index
    %c0_170 = arith.constant 0 : index
    %296 = vector.load %arg2[%c0_168, %c0_169, %c0_170] : memref<4x16x16xbf16, #tpu.memory_space<vmem>>, vector<1x16x16xbf16>
    %297 = vector.shape_cast %296 : vector<1x16x16xbf16> to vector<16x16xbf16>
    %cst_171 = arith.constant dense<0.000000e+00> : vector<2x16xf32>
    %298 = tpu.matmul %292, %297, %cst_171 {dimension_numbers = #tpu.dot_dimension_numbers<[1], [0], [0], [1], [0, 0, 1, 1], [], []>} : vector<2x16xbf16>, vector<16x16xbf16>, vector<2x16xf32> -> vector<2x16xf32>
    %299 = arith.addf %295, %298 : vector<2x16xf32>
    %300 = arith.negf %299 : vector<2x16xf32>
    %301 = math.exp %300 : vector<2x16xf32>
    %cst_172 = arith.constant 1.000000e+00 : f32
    %302 = vector.broadcast %cst_172 : f32 to vector<2x16xf32>
    %303 = arith.addf %302, %301 : vector<2x16xf32>
    %304 = arith.divf %302, %303 : vector<2x16xf32>
    %305 = arith.index_cast %293 : i32 to index
    %c0_173 = arith.constant 0 : index
    %306 = vector.load %arg6[%305, %c0_173] : memref<16x16xf32, #tpu.memory_space<vmem>>, vector<2x16xf32>
    %c1_174 = arith.constant 1 : index
    %c0_175 = arith.constant 0 : index
    %c0_176 = arith.constant 0 : index
    %307 = vector.load %arg2[%c1_174, %c0_175, %c0_176] : memref<4x16x16xbf16, #tpu.memory_space<vmem>>, vector<1x16x16xbf16>
    %308 = vector.shape_cast %307 : vector<1x16x16xbf16> to vector<16x16xbf16>
    %cst_177 = arith.constant dense<0.000000e+00> : vector<2x16xf32>
    %309 = tpu.matmul %292, %308, %cst_177 {dimension_numbers = #tpu.dot_dimension_numbers<[1], [0], [0], [1], [0, 0, 1, 1], [], []>} : vector<2x16xbf16>, vector<16x16xbf16>, vector<2x16xf32> -> vector<2x16xf32>
    %310 = arith.addf %306, %309 : vector<2x16xf32>
    %311 = arith.negf %310 : vector<2x16xf32>
    %312 = math.exp %311 : vector<2x16xf32>
    %cst_178 = arith.constant 1.000000e+00 : f32
    %313 = vector.broadcast %cst_178 : f32 to vector<2x16xf32>
    %314 = arith.addf %313, %312 : vector<2x16xf32>
    %315 = arith.divf %313, %314 : vector<2x16xf32>
    %316 = arith.index_cast %293 : i32 to index
    %c0_179 = arith.constant 0 : index
    %317 = vector.load %arg7[%316, %c0_179] : memref<16x16xf32, #tpu.memory_space<vmem>>, vector<2x16xf32>
    %c2_180 = arith.constant 2 : index
    %c0_181 = arith.constant 0 : index
    %c0_182 = arith.constant 0 : index
    %318 = vector.load %arg2[%c2_180, %c0_181, %c0_182] : memref<4x16x16xbf16, #tpu.memory_space<vmem>>, vector<1x16x16xbf16>
    %319 = vector.shape_cast %318 : vector<1x16x16xbf16> to vector<16x16xbf16>
    %cst_183 = arith.constant dense<0.000000e+00> : vector<2x16xf32>
    %320 = tpu.matmul %292, %319, %cst_183 {dimension_numbers = #tpu.dot_dimension_numbers<[1], [0], [0], [1], [0, 0, 1, 1], [], []>} : vector<2x16xbf16>, vector<16x16xbf16>, vector<2x16xf32> -> vector<2x16xf32>
    %321 = arith.addf %317, %320 : vector<2x16xf32>
    %322 = math.tanh %321 : vector<2x16xf32>
    %323 = arith.index_cast %293 : i32 to index
    %c0_184 = arith.constant 0 : index
    %324 = vector.load %arg8[%323, %c0_184] : memref<16x16xf32, #tpu.memory_space<vmem>>, vector<2x16xf32>
    %c3_185 = arith.constant 3 : index
    %c0_186 = arith.constant 0 : index
    %c0_187 = arith.constant 0 : index
    %325 = vector.load %arg2[%c3_185, %c0_186, %c0_187] : memref<4x16x16xbf16, #tpu.memory_space<vmem>>, vector<1x16x16xbf16>
    %326 = vector.shape_cast %325 : vector<1x16x16xbf16> to vector<16x16xbf16>
    %cst_188 = arith.constant dense<0.000000e+00> : vector<2x16xf32>
    %327 = tpu.matmul %292, %326, %cst_188 {dimension_numbers = #tpu.dot_dimension_numbers<[1], [0], [0], [1], [0, 0, 1, 1], [], []>} : vector<2x16xbf16>, vector<16x16xbf16>, vector<2x16xf32> -> vector<2x16xf32>
    %328 = arith.addf %324, %327 : vector<2x16xf32>
    %329 = arith.negf %328 : vector<2x16xf32>
    %330 = math.exp %329 : vector<2x16xf32>
    %cst_189 = arith.constant 1.000000e+00 : f32
    %331 = vector.broadcast %cst_189 : f32 to vector<2x16xf32>
    %332 = arith.addf %331, %330 : vector<2x16xf32>
    %333 = arith.divf %331, %332 : vector<2x16xf32>
    %334 = arith.mulf %315, %285 : vector<2x16xf32>
    %335 = arith.mulf %304, %322 : vector<2x16xf32>
    %336 = arith.addf %334, %335 : vector<2x16xf32>
    %337 = math.tanh %336 : vector<2x16xf32>
    %338 = arith.mulf %333, %337 : vector<2x16xf32>
    %339 = arith.index_cast %c5_i32 : i32 to index
    %c0_190 = arith.constant 0 : index
    %c0_191 = arith.constant 0 : index
    %340 = vector.load %arg4[%339, %c0_190, %c0_191] : memref<8x2x16xf32, #tpu.memory_space<vmem>>, vector<1x2x16xf32>
    %341 = vector.shape_cast %340 : vector<1x2x16xf32> to vector<2x16xf32>
    %342 = vector.shape_cast %338 : vector<2x16xf32> to vector<1x2x16xf32>
    tpu.vector_store %arg4[%339, %c0_190, %c0_191], %342 {strides = array<i32>} : memref<8x2x16xf32, #tpu.memory_space<vmem>>, vector<1x2x16xf32>,
    %c6_i32 = arith.constant 6 : i32
    %343 = arith.truncf %338 : vector<2x16xf32> to vector<2x16xbf16>
    %c2_i32_192 = arith.constant 2 : i32
    %344 = arith.muli %c6_i32, %c2_i32_192 : i32
    %345 = arith.index_cast %344 : i32 to index
    %c0_193 = arith.constant 0 : index
    %346 = vector.load %arg5[%345, %c0_193] : memref<16x16xf32, #tpu.memory_space<vmem>>, vector<2x16xf32>
    %c0_194 = arith.constant 0 : index
    %c0_195 = arith.constant 0 : index
    %c0_196 = arith.constant 0 : index
    %347 = vector.load %arg2[%c0_194, %c0_195, %c0_196] : memref<4x16x16xbf16, #tpu.memory_space<vmem>>, vector<1x16x16xbf16>
    %348 = vector.shape_cast %347 : vector<1x16x16xbf16> to vector<16x16xbf16>
    %cst_197 = arith.constant dense<0.000000e+00> : vector<2x16xf32>
    %349 = tpu.matmul %343, %348, %cst_197 {dimension_numbers = #tpu.dot_dimension_numbers<[1], [0], [0], [1], [0, 0, 1, 1], [], []>} : vector<2x16xbf16>, vector<16x16xbf16>, vector<2x16xf32> -> vector<2x16xf32>
    %350 = arith.addf %346, %349 : vector<2x16xf32>
    %351 = arith.negf %350 : vector<2x16xf32>
    %352 = math.exp %351 : vector<2x16xf32>
    %cst_198 = arith.constant 1.000000e+00 : f32
    %353 = vector.broadcast %cst_198 : f32 to vector<2x16xf32>
    %354 = arith.addf %353, %352 : vector<2x16xf32>
    %355 = arith.divf %353, %354 : vector<2x16xf32>
    %356 = arith.index_cast %344 : i32 to index
    %c0_199 = arith.constant 0 : index
    %357 = vector.load %arg6[%356, %c0_199] : memref<16x16xf32, #tpu.memory_space<vmem>>, vector<2x16xf32>
    %c1_200 = arith.constant 1 : index
    %c0_201 = arith.constant 0 : index
    %c0_202 = arith.constant 0 : index
    %358 = vector.load %arg2[%c1_200, %c0_201, %c0_202] : memref<4x16x16xbf16, #tpu.memory_space<vmem>>, vector<1x16x16xbf16>
    %359 = vector.shape_cast %358 : vector<1x16x16xbf16> to vector<16x16xbf16>
    %cst_203 = arith.constant dense<0.000000e+00> : vector<2x16xf32>
    %360 = tpu.matmul %343, %359, %cst_203 {dimension_numbers = #tpu.dot_dimension_numbers<[1], [0], [0], [1], [0, 0, 1, 1], [], []>} : vector<2x16xbf16>, vector<16x16xbf16>, vector<2x16xf32> -> vector<2x16xf32>
    %361 = arith.addf %357, %360 : vector<2x16xf32>
    %362 = arith.negf %361 : vector<2x16xf32>
    %363 = math.exp %362 : vector<2x16xf32>
    %cst_204 = arith.constant 1.000000e+00 : f32
    %364 = vector.broadcast %cst_204 : f32 to vector<2x16xf32>
    %365 = arith.addf %364, %363 : vector<2x16xf32>
    %366 = arith.divf %364, %365 : vector<2x16xf32>
    %367 = arith.index_cast %344 : i32 to index
    %c0_205 = arith.constant 0 : index
    %368 = vector.load %arg7[%367, %c0_205] : memref<16x16xf32, #tpu.memory_space<vmem>>, vector<2x16xf32>
    %c2_206 = arith.constant 2 : index
    %c0_207 = arith.constant 0 : index
    %c0_208 = arith.constant 0 : index
    %369 = vector.load %arg2[%c2_206, %c0_207, %c0_208] : memref<4x16x16xbf16, #tpu.memory_space<vmem>>, vector<1x16x16xbf16>
    %370 = vector.shape_cast %369 : vector<1x16x16xbf16> to vector<16x16xbf16>
    %cst_209 = arith.constant dense<0.000000e+00> : vector<2x16xf32>
    %371 = tpu.matmul %343, %370, %cst_209 {dimension_numbers = #tpu.dot_dimension_numbers<[1], [0], [0], [1], [0, 0, 1, 1], [], []>} : vector<2x16xbf16>, vector<16x16xbf16>, vector<2x16xf32> -> vector<2x16xf32>
    %372 = arith.addf %368, %371 : vector<2x16xf32>
    %373 = math.tanh %372 : vector<2x16xf32>
    %374 = arith.index_cast %344 : i32 to index
    %c0_210 = arith.constant 0 : index
    %375 = vector.load %arg8[%374, %c0_210] : memref<16x16xf32, #tpu.memory_space<vmem>>, vector<2x16xf32>
    %c3_211 = arith.constant 3 : index
    %c0_212 = arith.constant 0 : index
    %c0_213 = arith.constant 0 : index
    %376 = vector.load %arg2[%c3_211, %c0_212, %c0_213] : memref<4x16x16xbf16, #tpu.memory_space<vmem>>, vector<1x16x16xbf16>
    %377 = vector.shape_cast %376 : vector<1x16x16xbf16> to vector<16x16xbf16>
    %cst_214 = arith.constant dense<0.000000e+00> : vector<2x16xf32>
    %378 = tpu.matmul %343, %377, %cst_214 {dimension_numbers = #tpu.dot_dimension_numbers<[1], [0], [0], [1], [0, 0, 1, 1], [], []>} : vector<2x16xbf16>, vector<16x16xbf16>, vector<2x16xf32> -> vector<2x16xf32>
    %379 = arith.addf %375, %378 : vector<2x16xf32>
    %380 = arith.negf %379 : vector<2x16xf32>
    %381 = math.exp %380 : vector<2x16xf32>
    %cst_215 = arith.constant 1.000000e+00 : f32
    %382 = vector.broadcast %cst_215 : f32 to vector<2x16xf32>
    %383 = arith.addf %382, %381 : vector<2x16xf32>
    %384 = arith.divf %382, %383 : vector<2x16xf32>
    %385 = arith.mulf %366, %336 : vector<2x16xf32>
    %386 = arith.mulf %355, %373 : vector<2x16xf32>
    %387 = arith.addf %385, %386 : vector<2x16xf32>
    %388 = math.tanh %387 : vector<2x16xf32>
    %389 = arith.mulf %384, %388 : vector<2x16xf32>
    %390 = arith.index_cast %c6_i32 : i32 to index
    %c0_216 = arith.constant 0 : index
    %c0_217 = arith.constant 0 : index
    %391 = vector.load %arg4[%390, %c0_216, %c0_217] : memref<8x2x16xf32, #tpu.memory_space<vmem>>, vector<1x2x16xf32>
    %392 = vector.shape_cast %391 : vector<1x2x16xf32> to vector<2x16xf32>
    %393 = vector.shape_cast %389 : vector<2x16xf32> to vector<1x2x16xf32>
    tpu.vector_store %arg4[%390, %c0_216, %c0_217], %393 {strides = array<i32>} : memref<8x2x16xf32, #tpu.memory_space<vmem>>, vector<1x2x16xf32>,
    %c7_i32 = arith.constant 7 : i32
    %394 = arith.truncf %389 : vector<2x16xf32> to vector<2x16xbf16>
    %c2_i32_218 = arith.constant 2 : i32
    %395 = arith.muli %c7_i32, %c2_i32_218 : i32
    %396 = arith.index_cast %395 : i32 to index
    %c0_219 = arith.constant 0 : index
    %397 = vector.load %arg5[%396, %c0_219] : memref<16x16xf32, #tpu.memory_space<vmem>>, vector<2x16xf32>
    %c0_220 = arith.constant 0 : index
    %c0_221 = arith.constant 0 : index
    %c0_222 = arith.constant 0 : index
    %398 = vector.load %arg2[%c0_220, %c0_221, %c0_222] : memref<4x16x16xbf16, #tpu.memory_space<vmem>>, vector<1x16x16xbf16>
    %399 = vector.shape_cast %398 : vector<1x16x16xbf16> to vector<16x16xbf16>
    %cst_223 = arith.constant dense<0.000000e+00> : vector<2x16xf32>
    %400 = tpu.matmul %394, %399, %cst_223 {dimension_numbers = #tpu.dot_dimension_numbers<[1], [0], [0], [1], [0, 0, 1, 1], [], []>} : vector<2x16xbf16>, vector<16x16xbf16>, vector<2x16xf32> -> vector<2x16xf32>
    %401 = arith.addf %397, %400 : vector<2x16xf32>
    %402 = arith.negf %401 : vector<2x16xf32>
    %403 = math.exp %402 : vector<2x16xf32>
    %cst_224 = arith.constant 1.000000e+00 : f32
    %404 = vector.broadcast %cst_224 : f32 to vector<2x16xf32>
    %405 = arith.addf %404, %403 : vector<2x16xf32>
    %406 = arith.divf %404, %405 : vector<2x16xf32>
    %407 = arith.index_cast %395 : i32 to index
    %c0_225 = arith.constant 0 : index
    %408 = vector.load %arg6[%407, %c0_225] : memref<16x16xf32, #tpu.memory_space<vmem>>, vector<2x16xf32>
    %c1_226 = arith.constant 1 : index
    %c0_227 = arith.constant 0 : index
    %c0_228 = arith.constant 0 : index
    %409 = vector.load %arg2[%c1_226, %c0_227, %c0_228] : memref<4x16x16xbf16, #tpu.memory_space<vmem>>, vector<1x16x16xbf16>
    %410 = vector.shape_cast %409 : vector<1x16x16xbf16> to vector<16x16xbf16>
    %cst_229 = arith.constant dense<0.000000e+00> : vector<2x16xf32>
    %411 = tpu.matmul %394, %410, %cst_229 {dimension_numbers = #tpu.dot_dimension_numbers<[1], [0], [0], [1], [0, 0, 1, 1], [], []>} : vector<2x16xbf16>, vector<16x16xbf16>, vector<2x16xf32> -> vector<2x16xf32>
    %412 = arith.addf %408, %411 : vector<2x16xf32>
    %413 = arith.negf %412 : vector<2x16xf32>
    %414 = math.exp %413 : vector<2x16xf32>
    %cst_230 = arith.constant 1.000000e+00 : f32
    %415 = vector.broadcast %cst_230 : f32 to vector<2x16xf32>
    %416 = arith.addf %415, %414 : vector<2x16xf32>
    %417 = arith.divf %415, %416 : vector<2x16xf32>
    %418 = arith.index_cast %395 : i32 to index
    %c0_231 = arith.constant 0 : index
    %419 = vector.load %arg7[%418, %c0_231] : memref<16x16xf32, #tpu.memory_space<vmem>>, vector<2x16xf32>
    %c2_232 = arith.constant 2 : index
    %c0_233 = arith.constant 0 : index
    %c0_234 = arith.constant 0 : index
    %420 = vector.load %arg2[%c2_232, %c0_233, %c0_234] : memref<4x16x16xbf16, #tpu.memory_space<vmem>>, vector<1x16x16xbf16>
    %421 = vector.shape_cast %420 : vector<1x16x16xbf16> to vector<16x16xbf16>
    %cst_235 = arith.constant dense<0.000000e+00> : vector<2x16xf32>
    %422 = tpu.matmul %394, %421, %cst_235 {dimension_numbers = #tpu.dot_dimension_numbers<[1], [0], [0], [1], [0, 0, 1, 1], [], []>} : vector<2x16xbf16>, vector<16x16xbf16>, vector<2x16xf32> -> vector<2x16xf32>
    %423 = arith.addf %419, %422 : vector<2x16xf32>
    %424 = math.tanh %423 : vector<2x16xf32>
    %425 = arith.index_cast %395 : i32 to index
    %c0_236 = arith.constant 0 : index
    %426 = vector.load %arg8[%425, %c0_236] : memref<16x16xf32, #tpu.memory_space<vmem>>, vector<2x16xf32>
    %c3_237 = arith.constant 3 : index
    %c0_238 = arith.constant 0 : index
    %c0_239 = arith.constant 0 : index
    %427 = vector.load %arg2[%c3_237, %c0_238, %c0_239] : memref<4x16x16xbf16, #tpu.memory_space<vmem>>, vector<1x16x16xbf16>
    %428 = vector.shape_cast %427 : vector<1x16x16xbf16> to vector<16x16xbf16>
    %cst_240 = arith.constant dense<0.000000e+00> : vector<2x16xf32>
    %429 = tpu.matmul %394, %428, %cst_240 {dimension_numbers = #tpu.dot_dimension_numbers<[1], [0], [0], [1], [0, 0, 1, 1], [], []>} : vector<2x16xbf16>, vector<16x16xbf16>, vector<2x16xf32> -> vector<2x16xf32>
    %430 = arith.addf %426, %429 : vector<2x16xf32>
    %431 = arith.negf %430 : vector<2x16xf32>
    %432 = math.exp %431 : vector<2x16xf32>
    %cst_241 = arith.constant 1.000000e+00 : f32
    %433 = vector.broadcast %cst_241 : f32 to vector<2x16xf32>
    %434 = arith.addf %433, %432 : vector<2x16xf32>
    %435 = arith.divf %433, %434 : vector<2x16xf32>
    %436 = arith.mulf %417, %387 : vector<2x16xf32>
    %437 = arith.mulf %406, %424 : vector<2x16xf32>
    %438 = arith.addf %436, %437 : vector<2x16xf32>
    %439 = math.tanh %438 : vector<2x16xf32>
    %440 = arith.mulf %435, %439 : vector<2x16xf32>
    %441 = arith.index_cast %c7_i32 : i32 to index
    %c0_242 = arith.constant 0 : index
    %c0_243 = arith.constant 0 : index
    %442 = vector.load %arg4[%441, %c0_242, %c0_243] : memref<8x2x16xf32, #tpu.memory_space<vmem>>, vector<1x2x16xf32>
    %443 = vector.shape_cast %442 : vector<1x2x16xf32> to vector<2x16xf32>
    %444 = vector.shape_cast %440 : vector<2x16xf32> to vector<1x2x16xf32>
    tpu.vector_store %arg4[%441, %c0_242, %c0_243], %444 {strides = array<i32>} : memref<8x2x16xf32, #tpu.memory_space<vmem>>, vector<1x2x16xf32>,
    %c8_i32 = arith.constant 8 : i32
    return
  }
}

</mosaic_0001>

<bundles_post_ra>
// kernel: bert_lstm_classifier_forward.5
= control target key start
LH: loop header
LB: loop body
LE: loop exit
PB: predicated region body
PF: predicated region fallthrough
CT: control target
= control target key end

     0   :  { %vm16_vm0 = vcmask 261120   ;;  %v95_v4 = vmov 32.0   ;;  %s140_s0 = inlined_call_operand.vmem [shape: f32[16,32], index: 0, kind: input, shape index: {}]   ;;  %s141_s1 = inlined_call_operand.vmem [shape: f32[1,32], index: 1, kind: input, shape index: {}]   ;;  %s142_s2 = inlined_call_operand.vmem [shape: f32[1,32], index: 2, kind: input, shape index: {}]   ;;  %s143_s3 = inlined_call_operand.vmem [shape: f32[16,32], index: 3, kind: output, shape index: {}]  }
   0x1   :  { %v14_v0 = vld [vmem:[%s140_s0] sm:$0xff]  ;;  %v15_v2 = vld [vmem:[%s140_s0 + $0x8] sm:$0xff]  ;;  %89 = vrcp.f32 %v95_v4 }
   0x2   :  { %v17_v1 = vsel %vm16_vm0, %v14_v0, 0.0  ;;  %v20_v3 = vsel %vm16_vm0, %v15_v2, 0.0  ;;  %v87_v35 = vld [vmem:[%s141_s1] ss:$0 sm:$0xff] }
   0x3   :  { %18 = vadd.xlane.f32.xlu0 %v17_v1  ;;  %v88_v38 = vld [vmem:[%s142_s2] ss:$0 sm:$0xff] }
   0x7   :  { %v90_v5 = vpop.eup %89 }
   0x8   :  { %v24_v6 = vmul.f32 32.0, %v90_v5  ;;  %vm28_vm1 = vweird.f32 %v90_v5 }
   0xa   :  { %v25_v7 = vsub.f32 1.0, %v24_v6 }
   0xb   :  { %21 = vadd.xlane.f32.xlu0 %v20_v3 }
   0xc   :  { %v26_v8 = vmul.f32 %v90_v5, %v25_v7 }
   0xe   :  { %v27_v9 = vadd.f32 %v90_v5, %v26_v8 }
  0x10   :  { %v29_v10 = vsel %vm28_vm1, %v90_v5, %v27_v9 }
  0x76   :  { %v19_v11 = vpop.xlane.xlu0 %18 }
  0x77   :  { %v30_v12 = vmul.f32 %v29_v10, %v19_v11 }
  0x79   :  { %v32_v13 = vsub.f32 %v14_v0, %v30_v12 }
  0x7b   :  { %v34_v14 = vmul.f32 %v32_v13, %v32_v13 }
  0x7d   :  { %v36_v15 = vsel %vm16_vm0, %v34_v14, 0.0 }
  0x7e   :  { %37 = vadd.xlane.f32.xlu1 %v36_v15  ;;  %v22_v16 = vpop.xlane.xlu0 %21 }
  0x7f   :  { %v31_v17 = vmul.f32 %v29_v10, %v22_v16 }
  0x81   :  { %v33_v18 = vsub.f32 %v15_v2, %v31_v17 }
  0x83   :  { %v35_v19 = vmul.f32 %v33_v18, %v33_v18 }
  0x85   :  { %v39_v20 = vsel %vm16_vm0, %v35_v19, 0.0 }
  0x86   :  { %40 = vadd.xlane.f32.xlu1 %v39_v20 }
  0xf1   :  { %v38_v21 = vpop.xlane.xlu1 %37 }
  0xf2   :  { %v42_v22 = vmul.f32 %v38_v21, %v29_v10 }
  0xf4   :  { %v44_v23 = vadd.f32 1e-12, %v42_v22 }
  0xf6   :  { %91 = vrsqrt.f32 %v44_v23  ;;  %vm52_vm3 = vweird.f32 %v44_v23 }
  0xf9   :  { %v41_v24 = vpop.xlane.xlu1 %40 }
  0xfa   :  { %v43_v25 = vmul.f32 %v41_v24, %v29_v10 }
  0xfc   :  { %v92_v26 = vpop.eup %91  ;;  %v45_v27 = vadd.f32 1e-12, %v43_v25 }
  0xfd   :  { %v47_v28 = vmul.f32 %v92_v26, %v44_v23  ;;  %vm53_vm2 = vweird.f32 %v92_v26 }
  0xfe   :  { %93 = vrsqrt.f32 %v45_v27  ;;  %vm54_vm4 = vmor %vm52_vm3, %vm53_vm2  ;;  %vm62_vm6 = vweird.f32 %v45_v27 }
  0xff   :  { %v48_v29 = vmul.f32 %v92_v26, %v47_v28 }
 0x101   :  { %v49_v30 = vmul.f32 0.5, %v48_v29 }
 0x103   :  { %v50_v31 = vsub.f32 1.5, %v49_v30 }
 0x104   :  { %v94_v32 = vpop.eup %93 }
 0x105   :  { %v51_v33 = vmul.f32 %v92_v26, %v50_v31  ;;  %v57_v34 = vmul.f32 %v94_v32, %v45_v27  ;;  %vm63_vm5 = vweird.f32 %v94_v32 }
 0x106   :  { %vm64_vm7 = vmor %vm62_vm6, %vm63_vm5 }
 0x107   :  { %v55_v36 = vsel %vm54_vm4, %v92_v26, %v51_v33  ;;  %v58_v37 = vmul.f32 %v94_v32, %v57_v34 }
 0x108   :  { %v66_v39 = vmul.f32 %v55_v36, %v32_v13 }
 0x109   :  { %v59_v40 = vmul.f32 0.5, %v58_v37 }
 0x10a   :  { %v72_v41 = vmul.f32 %v87_v35, %v66_v39 }
 0x10b   :  { %v60_v42 = vsub.f32 1.5, %v59_v40 }
 0x10c   :  { %v78_v43 = vadd.f32 %v88_v38, %v72_v41 }
 0x10d   :  { %v61_v44 = vmul.f32 %v94_v32, %v60_v42 }
 0x10e   :  { %80 = vst.msk [vmem:[%s143_s3] sm:$0xff] %vm16_vm0, %v78_v43 }
 0x10f   :  { %v65_v45 = vsel %vm64_vm7, %v94_v32, %v61_v44 }
 0x110   :  { %v67_v46 = vmul.f32 %v65_v45, %v33_v18 }
 0x112   :  { %v73_v47 = vmul.f32 %v87_v35, %v67_v46 }
 0x114   :  { %v79_v48 = vadd.f32 %v88_v38, %v73_v47 }
 0x116   :  { %81 = vst.msk [vmem:[%s143_s3 + $0x8] sm:$0xff] %vm16_vm0, %v79_v48 }

// kernel: bert_lstm_classifier_forward.6
= control target key start
LH: loop header
LB: loop body
LE: loop exit
PB: predicated region body
PF: predicated region fallthrough
CT: control target
= control target key end

     0   :  { %s1746_s29 = smov 0   ;;  %s1997_s0 = inlined_call_operand.vmem [shape: f32[2,8,32], index: 0, kind: input, shape index: {}]   ;;  %s1998_s1 = inlined_call_operand.vmem [shape: f32[2,1,8], index: 1, kind: input, shape index: {}]   ;;  %s1999_s2 = inlined_call_operand.vmem [shape: bf16[4,32,8], index: 2, kind: input, shape index: {}]   ;;  %s2000_s3 = inlined_call_operand.vmem [shape: bf16[4,32,8], index: 3, kind: input, shape index: {}]   ;;  %s2001_s4 = inlined_call_operand.vmem [shape: bf16[4,32,8], index: 4, kind: input, shape index: {}]   ;;  %s2002_s5 = inlined_call_operand.vmem [shape: f32[3,4,1,8], index: 5, kind: input, shape index: {}]   ;;  %s2003_s6 = inlined_call_operand.vmem [shape: bf16[4,8,32], index: 6, kind: input, shape index: {}]   ;;  %s2004_s7 = inlined_call_operand.vmem [shape: f32[1,32], index: 7, kind: input, shape index: {}]   ;;  %s2005_s8 = inlined_call_operand.vmem [shape: f32[2,32], index: 8, kind: input, shape index: {}]   ;;  %s2006_s9 = inlined_call_operand.vmem [shape: bf16[32,64], index: 9, kind: input, shape index: {}]   ;;  %s2007_s10 = inlined_call_operand.vmem [shape: f32[1,64], index: 10, kind: input, shape index: {}]   ;;  %s2008_s11 = inlined_call_operand.vmem [shape: bf16[64,32], index: 11, kind: input, shape index: {}]   ;;  %s2009_s12 = inlined_call_operand.vmem [shape: f32[1,32], index: 12, kind: input, shape index: {}]   ;;  %s2010_s13 = inlined_call_operand.vmem [shape: f32[2,32], index: 13, kind: input, shape index: {}]   ;;  %s2011_s14 = inlined_call_operand.vmem [shape: f32[2,8,32], index: 14, kind: output, shape index: {}]  }
   0x1 LB: > { %s1428_s30 = sadd.s32 4294967295, %s1668_s29   ;;  %p1432_p0 = scmp.ge.s32.totalorder %s1668_s29, 1  ;;  %s1668_s29 = sphi %s1746_s29, %s24_s29  }
   0x2   : > { %p419_p1 = scmp.lt.s32.totalorder %s1668_s29, 3 }
   0x4   : > { %p420_p2 = pnand %p1432_p0, %p419_p1 }
   0x5   : > { %p466_p3 = scmp.lt.s32.totalorder (!%p420_p2), %s1428_s30, 1 }
   0x6   : > { %423 = sbr.rel (%p420_p2) target bundleno = 1676 (0x68c), region = 76 }
   0xb   : > { %v1584_v0 = vld [vmem:[%s1999_s2 + $0x8] sm:$0xff]  ;;  %v1586_v1 = vld [vmem:[%s1999_s2 + $0x18] sm:$0xff]  ;;  %v1583_v4 = vld [vmem:[%s1999_s2] sm:$0xff]  ;;  %s2013_s30 = smov (!%p466_p3, %s1428_s30), 1  ;;  %vm532_vm0 = vcmask 261120   ;;  %vm888_vm1 = vcmask 64512  }
   0xc   : > { %v1588_v2 = vld [vmem:[%s1999_s2 + $0x28] sm:$0xff]  ;;  %v1590_v3 = vld [vmem:[%s1999_s2 + $0x38] sm:$0xff]  ;;  %542 = vmatpush.bf16.msra.mxu0 %v1584_v0  ;;  %567 = vmatpush.bf16.msra.mxu1 %v1586_v1  ;;  %v1585_v5 = vld [vmem:[%s1999_s2 + $0x10] sm:$0xff]  ;;  %s1433_s17 = sshll.u32 %s2013_s30, 3  ;;  %s472_s19 = scalar_lea.vmem %s1998_s1, %s2013_s30  ;;  %vm1032_vm2 = vcmask 1043456   ;;  %vm1320_vm7 = vcmask 523264  }
   0xd   : > { %592 = vmatpush.bf16.msra.mxu2 %v1588_v2  ;;  %617 = vmatpush.bf16.msra.mxu3 %v1590_v3  ;;  %v1587_v6 = vld [vmem:[%s1999_s2 + $0x20] sm:$0xff]  ;;  %v1589_v7 = vld [vmem:[%s1999_s2 + $0x30] sm:$0xff]  ;;  %v1592_v8 = vld [vmem:[%s2000_s3 + $0x8] sm:$0xff]  ;;  %s469_s24 = scalar_lea.vmem %s1997_s0, %s1433_s17  ;;  %s476_s23 = scalar_lea.vmem %s2011_s14, %s1433_s17 }
   0xe   : > { %v1594_v9 = vld [vmem:[%s2000_s3 + $0x18] sm:$0xff]  ;;  %v1596_v10 = vld [vmem:[%s2000_s3 + $0x28] sm:$0xff]  ;;  %v1798_v12 = vld [vmem:[%s469_s24] sm:$0xff] }
   0xf   : > { %v1598_v11 = vld [vmem:[%s2000_s3 + $0x38] sm:$0xff]  ;;  %v1591_v13 = vld [vmem:[%s2000_s3] sm:$0xff]  ;;  %v1593_v14 = vld [vmem:[%s2000_s3 + $0x10] sm:$0xff]  ;;  %v479_v15 = vpack.c.bf16 %v1798_v12, %v1798_v12 }
  0x10   : > { %543 = vmatpush.bf16.msra.mxu0 %v1583_v4  ;;  %568 = vmatpush.bf16.msra.mxu1 %v1585_v5  ;;  %v1595_v16 = vld [vmem:[%s2000_s3 + $0x20] sm:$0xff]  ;;  %v1597_v17 = vld [vmem:[%s2000_s3 + $0x30] sm:$0xff]  ;;  %v1604_v18 = vld [vmem:[%s2001_s4 + $0x28] sm:$0xff] }
  0x11   : > { %593 = vmatpush.bf16.msra.mxu2 %v1587_v6  ;;  %618 = vmatpush.bf16.msra.mxu3 %v1589_v7  ;;  %v1600_v19 = vld [vmem:[%s2001_s4 + $0x8] sm:$0xff]  ;;  %v1602_v20 = vld [vmem:[%s2001_s4 + $0x18] sm:$0xff]  ;;  %v1603_v21 = vld [vmem:[%s2001_s4 + $0x20] sm:$0xff] }
  0x12   : > { %v1599_v22 = vld [vmem:[%s2001_s4] sm:$0xff]  ;;  %v1601_v23 = vld [vmem:[%s2001_s4 + $0x10] sm:$0xff]  ;;  %v1606_v24 = vld [vmem:[%s2001_s4 + $0x38] sm:$0xff] }
  0x13   : > { %1443 = vmatmul.msk.bf16.vlgmr.msra.gmra.mxu0 %vm532_vm0, %v479_v15  ;;  %1452 = vmatmul.msk.bf16.vlgmr.msra.gmra.mxu1 %vm532_vm0, %v479_v15  ;;  %v1605_v25 = vld [vmem:[%s2001_s4 + $0x30] sm:$0xff]  ;;  %v1626_v32 = vld [vmem:[%s2002_s5 + $0x4] ss:$0 sm:$0xff]  ;;  %v1627_v33 = vld [vmem:[%s2002_s5 + $0x5] ss:$0 sm:$0xff] }
  0x14   : > { %670 = vmatpush.bf16.msrb.mxu0 %v1592_v8  ;;  %695 = vmatpush.bf16.msrb.mxu1 %v1594_v9  ;;  %v1623_v40 = vld [vmem:[%s2002_s5 + $0x1] ss:$0 sm:$0xff]  ;;  %v1622_v43 = vld [vmem:[%s2002_s5] ss:$0 sm:$0xff]  ;;  %v1628_v44 = vld [vmem:[%s2002_s5 + $0x6] ss:$0 sm:$0xff] }
  0x15   : > { %1461 = vmatmul.msk.bf16.vlgmr.msra.gmra.mxu2 %vm532_vm0, %v479_v15  ;;  %1470 = vmatmul.msk.bf16.vlgmr.msra.gmra.mxu3 %vm532_vm0, %v479_v15  ;;  %v1629_v45 = vld [vmem:[%s2002_s5 + $0x7] ss:$0 sm:$0xff]  ;;  %v1624_v57 = vld [vmem:[%s2002_s5 + $0x2] ss:$0 sm:$0xff]  ;;  %v1625_v58 = vld [vmem:[%s2002_s5 + $0x3] ss:$0 sm:$0xff] }
  0x16   : > { %720 = vmatpush.bf16.msrb.mxu2 %v1596_v10  ;;  %745 = vmatpush.bf16.msrb.mxu3 %v1598_v11  ;;  %v1630_v6 = vld [vmem:[%s2002_s5 + $0x8] ss:$0 sm:$0xff]  ;;  %v1631_v7 = vld [vmem:[%s2002_s5 + $0x9] ss:$0 sm:$0xff] }
  0x18   : > { %671 = vmatpush.bf16.msrb.mxu0 %v1591_v13  ;;  %696 = vmatpush.bf16.msrb.mxu1 %v1593_v14  ;;  %v1632_v13 = vld [vmem:[%s2002_s5 + $0xa] ss:$0 sm:$0xff] }
  0x1a   : > { %721 = vmatpush.bf16.msrb.mxu2 %v1595_v16  ;;  %746 = vmatpush.bf16.msrb.mxu3 %v1597_v17 }
  0x1c   : > { %798 = vmatpush.bf16.msra.mxu0 %v1600_v19  ;;  %823 = vmatpush.bf16.msra.mxu1 %v1602_v20 }
  0x1e   : > { %848 = vmatpush.bf16.msra.mxu2 %v1604_v18  ;;  %873 = vmatpush.bf16.msra.mxu3 %v1606_v24  ;;  %v1633_v24 = vld [vmem:[%s2002_s5 + $0xb] ss:$0 sm:$0xff] }
  0x20   : > { %799 = vmatpush.bf16.msra.mxu0 %v1599_v22  ;;  %824 = vmatpush.bf16.msra.mxu1 %v1601_v23 }
  0x22   : > { %849 = vmatpush.bf16.msra.mxu2 %v1603_v21  ;;  %874 = vmatpush.bf16.msra.mxu3 %v1605_v25 }
  0x23   : > { %1479 = vmatmul.msk.bf16.vlgmr.msrb.gmra.mxu0 %vm532_vm0, %v479_v15  ;;  %1488 = vmatmul.msk.bf16.vlgmr.msrb.gmra.mxu1 %vm532_vm0, %v479_v15 }
  0x25   : > { %1497 = vmatmul.msk.bf16.vlgmr.msrb.gmra.mxu2 %vm532_vm0, %v479_v15  ;;  %1506 = vmatmul.msk.bf16.vlgmr.msrb.gmra.mxu3 %vm532_vm0, %v479_v15 }
  0x33   : > { %1515 = vmatmul.msk.bf16.vlgmr.msra.gmra.mxu0 %vm532_vm0, %v479_v15  ;;  %1524 = vmatmul.msk.bf16.vlgmr.msra.gmra.mxu1 %vm532_vm0, %v479_v15 }
  0x35   : > { %1533 = vmatmul.msk.bf16.vlgmr.msra.gmra.mxu2 %vm532_vm0, %v479_v15  ;;  %1542 = vmatmul.msk.bf16.vlgmr.msra.gmra.mxu3 %vm532_vm0, %v479_v15 }
  0x90   : > { %v545_v26 = vpop.f32.mrf.mxu0  ;;  %v570_v27 = vpop.f32.mrf.mxu1 }
  0x91   : > { %v571_v48 = vadd.f32 %v1623_v40, %v570_v27  ;;  %v546_v51 = vadd.f32 %v1622_v43, %v545_v26 }
  0x93   : > { %v881_v56 = vpack.c.bf16 %v571_v48, %v571_v48  ;;  %v880_v61 = vpack.c.bf16 %v546_v51, %v546_v51 }
  0x98   : > { %v595_v28 = vpop.f32.mrf.mxu2  ;;  %v620_v29 = vpop.f32.mrf.mxu3 }
  0x99   : > { %v547_v30 = vpop.f32.mrf.mxu0  ;;  %v572_v31 = vpop.f32.mrf.mxu1  ;;  %v596_v0 = vadd.f32 %v1624_v57, %v595_v28  ;;  %v621_v1 = vadd.f32 %v1625_v58, %v620_v29 }
  0x9a   : > { %v1634_v31 = vld [vmem:[%s472_s19] ss:$0 sm:$0xff] }
  0x9b   : > { %v882_v4 = vpack.c.bf16 %v596_v0, %v596_v0  ;;  %v883_v5 = vpack.c.bf16 %v621_v1, %v621_v1 }
  0xa0   : > { %v597_v34 = vpop.f32.mrf.mxu2  ;;  %v622_v35 = vpop.f32.mrf.mxu3 }
  0xa1   : > { %v673_v36 = vpop.f32.mrf.mxu0  ;;  %v698_v37 = vpop.f32.mrf.mxu1 }
  0xa2   : > { %v674_v38 = vadd.f32 %v1626_v32, %v673_v36  ;;  %v699_v39 = vadd.f32 %v1627_v33, %v698_v37 }
  0xa4   : > { %v884_v41 = vpack.c.bf16 %v674_v38, %v674_v38  ;;  %v885_v42 = vpack.c.bf16 %v699_v39, %v699_v39 }
  0xa6   : > { %v893_v46 = vsel %vm888_vm1, %v884_v41, 0  ;;  %v912_v47 = vsel %vm888_vm1, %v885_v42, 0 }
  0xa7   : > { %902 = vmatpush.bf16.xpose.msrb.mxu0 %v893_v46  ;;  %921 = vmatpush.bf16.xpose.msrb.mxu1 %v912_v47 }
  0xa8   : > { %v723_v49 = vpop.f32.mrf.mxu2  ;;  %v748_v50 = vpop.f32.mrf.mxu3 }
  0xa9   : > { %v724_v52 = vadd.f32 %v1628_v44, %v723_v49  ;;  %v749_v53 = vadd.f32 %v1629_v45, %v748_v50  ;;  %v675_v54 = vpop.f32.mrf.mxu0  ;;  %v700_v55 = vpop.f32.mrf.mxu1 }
  0xab   : > { %v886_v59 = vpack.c.bf16 %v724_v52, %v724_v52  ;;  %v887_v60 = vpack.c.bf16 %v749_v53, %v749_v53 }
  0xad   : > { %v931_v62 = vsel %vm888_vm1, %v886_v59, 0  ;;  %v950_v63 = vsel %vm888_vm1, %v887_v60, 0 }
  0xae   : > { %940 = vmatpush.bf16.xpose.msrb.mxu2 %v931_v62  ;;  %959 = vmatpush.bf16.xpose.msrb.mxu3 %v950_v63 }
  0xaf   : > { %1543 = vmatmul.msk.bf16.vlgmr.msrb.gmra.mxu0 %vm888_vm1, %v880_v61  ;;  %1544 = vmatmul.msk.bf16.vlgmr.msrb.gmra.mxu1 %vm888_vm1, %v881_v56 }
  0xb0   : > { %v725_v2 = vpop.f32.mrf.mxu2  ;;  %v750_v3 = vpop.f32.mrf.mxu3 }
  0xb1   : > { %v801_v8 = vpop.f32.mrf.mxu0  ;;  %v826_v9 = vpop.f32.mrf.mxu1 }
  0xb2   : > { %v802_v10 = vadd.f32 %v1630_v6, %v801_v8  ;;  %v827_v11 = vadd.f32 %v1631_v7, %v826_v9 }
  0xb4   : > { %v1025_v14 = vpack.c.bf16 %v802_v10, %v802_v10  ;;  %v1026_v15 = vpack.c.bf16 %v827_v11, %v827_v11 }
  0xb5   : > { %1545 = vmatmul.msk.bf16.vlgmr.msrb.gmra.mxu2 %vm888_vm1, %v882_v4  ;;  %1546 = vmatmul.msk.bf16.vlgmr.msrb.gmra.mxu3 %vm888_vm1, %v883_v5 }
  0xb6   : > { %v1034_v17 = vsel %vm1032_vm2, %v1025_v14, 0  ;;  %v1053_v18 = vsel %vm1032_vm2, %v1026_v15, 0 }
  0xb7   : > { %1043 = vmatpush.bf16.msra.mxu0 %v1034_v17  ;;  %1062 = vmatpush.bf16.msra.mxu1 %v1053_v18 }
  0xb8   : > { %v851_v16 = vpop.f32.mrf.mxu2  ;;  %v876_v25 = vpop.f32.mrf.mxu3 }
  0xb9   : > { %v852_v19 = vadd.f32 %v1632_v13, %v851_v16  ;;  %v803_v21 = vpop.f32.mrf.mxu0  ;;  %v828_v22 = vpop.f32.mrf.mxu1  ;;  %v877_v27 = vadd.f32 %v1633_v24, %v876_v25  ;;  %v1110_v25 = vld [vmem:[%s2003_s6] sm:$0xf] }
  0xbb   : > { %v1027_v20 = vpack.c.bf16 %v852_v19, %v852_v19  ;;  %v1028_v28 = vpack.c.bf16 %v877_v27, %v877_v27  ;;  %v1111_v27 = vld [vmem:[%s2003_s6 + $0x4] sm:$0xf] }
  0xbd   : > { %v1072_v23 = vsel %vm1032_vm2, %v1027_v20, 0  ;;  %v1091_v29 = vsel %vm1032_vm2, %v1028_v28, 0  ;;  %v1137_v28 = vsel %vm1032_vm2, %v1111_v27, 0 }
  0xbe   : > { %1081 = vmatpush.bf16.msra.mxu2 %v1072_v23  ;;  %1100 = vmatpush.bf16.msra.mxu3 %v1091_v29  ;;  %v1112_v29 = vld [vmem:[%s2003_s6 + $0x8] sm:$0xf] }
  0xbf   : > { %1146 = vmatpush.bf16.msrb.mxu1 %v1137_v28 }
  0xc0   : > { %v853_v26 = vpop.f32.mrf.mxu2  ;;  %v878_v30 = vpop.f32.mrf.mxu3 }
  0xc1   : > { %v1118_v26 = vsel %vm1032_vm2, %v1110_v25, 0  ;;  %v1156_v30 = vsel %vm1032_vm2, %v1112_v29, 0 }
  0xc2   : > { %1127 = vmatpush.bf16.msrb.mxu0 %v1118_v26  ;;  %1165 = vmatpush.bf16.msrb.mxu2 %v1156_v30 }
 0x12c   : > { %v904_v32 = vpop.f32.mrf.mxu0  ;;  %v923_v33 = vpop.f32.mrf.mxu1 }
 0x12d   : > { %v965_v34 = vmul.f32 0.35355338, %v904_v32  ;;  %v966_v36 = vmul.f32 0.35355338, %v923_v33 }
 0x12f   : > { %v973_v35 = vadd.f32 %v1634_v31, %v965_v34  ;;  %v974_v40 = vadd.f32 %v1634_v31, %v966_v36 }
 0x131   : > { %v977_v37 = vsel %vm888_vm1, %v973_v35, -inf  ;;  %v980_v44 = vsel %vm888_vm1, %v974_v40, -inf }
 0x132   : > { %978 = vmax.xlane.f32.xlu1 %v977_v37 }
 0x134   : > { %v906_v38 = vpop.f32.mrf.mxu0  ;;  %v925_v39 = vpop.f32.mrf.mxu1 }
 0x138   : > { %v942_v41 = vpop.f32.mrf.mxu2  ;;  %v961_v42 = vpop.f32.mrf.mxu3 }
 0x139   : > { %v967_v43 = vmul.f32 0.35355338, %v942_v41  ;;  %v968_v46 = vmul.f32 0.35355338, %v961_v42 }
 0x13a   : > { %981 = vmax.xlane.f32.xlu1 %v980_v44 }
 0x13b   : > { %v975_v45 = vadd.f32 %v1634_v31, %v967_v43  ;;  %v976_v50 = vadd.f32 %v1634_v31, %v968_v46  ;;  %v1113_v31 = vld [vmem:[%s2003_s6 + $0xc] sm:$0xf] }
 0x13c   : > { %v1175_v32 = vsel %vm1032_vm2, %v1113_v31, 0  ;;  %v1612_v31 = vld [vmem:[%s2008_s11 + $0x18] sm:$0xff] }
 0x13d   : > { %v983_v47 = vsel %vm888_vm1, %v975_v45, -inf  ;;  %v986_v51 = vsel %vm888_vm1, %v976_v50, -inf  ;;  %1184 = vmatpush.bf16.msrb.mxu3 %v1175_v32  ;;  %v1611_v32 = vld [vmem:[%s2008_s11 + $0x10] sm:$0xff] }
 0x13e   : > { %984 = vmax.xlane.f32.xlu0 %v983_v47 }
 0x140   : > { %v944_v48 = vpop.f32.mrf.mxu2  ;;  %v963_v49 = vpop.f32.mrf.mxu3 }
 0x146   : > { %987 = vmax.xlane.f32.xlu0 %v986_v51 }
 0x1a5   : > { %v979_v52 = vpop.xlane.xlu1 %978 }
 0x1a6   : > { %v989_v53 = vsub.f32 %v973_v35, %v979_v52 }
 0x1a8   : > { %v993_v54 = vmul.f32 1.442695, %v989_v53 }
 0x1aa   : > { %1638 = vpow2.f32 %v993_v54 }
 0x1ad   : > { %v982_v55 = vpop.xlane.xlu1 %981 }
 0x1ae   : > { %v990_v56 = vsub.f32 %v974_v40, %v982_v55 }
 0x1b0   : > { %v1639_v57 = vpop.eup %1638  ;;  %v995_v58 = vmul.f32 1.442695, %v990_v56 }
 0x1b1   : > { %v985_v59 = vpop.xlane.xlu0 %984  ;;  %v1001_v60 = vsel %vm888_vm1, %v1639_v57, 0.0 }
 0x1b2   : > { %1640 = vpow2.f32 %v995_v58  ;;  %v991_v61 = vsub.f32 %v975_v45, %v985_v59  ;;  %1002 = vadd.xlane.f32.xlu0 %v1001_v60 }
 0x1b4   : > { %v997_v62 = vmul.f32 1.442695, %v991_v61 }
 0x1b6   : > { %1642 = vpow2.f32 %v997_v62 }
 0x1b8   : > { %v1641_v63 = vpop.eup %1640 }
 0x1b9   : > { %v988_v0 = vpop.xlane.xlu0 %987  ;;  %v1004_v1 = vsel %vm888_vm1, %v1641_v63, 0.0 }
 0x1ba   : > { %v992_v2 = vsub.f32 %v976_v50, %v988_v0  ;;  %1005 = vadd.xlane.f32.xlu1 %v1004_v1  ;;  %v1670_v0 = vmov 32.0  }
 0x1bc   : > { %v1643_v3 = vpop.eup %1642  ;;  %v999_v4 = vmul.f32 1.442695, %v992_v2 }
 0x1bd   : > { %v1007_v5 = vsel %vm888_vm1, %v1643_v3, 0.0 }
 0x1be   : > { %1644 = vpow2.f32 %v999_v4  ;;  %1008 = vadd.xlane.f32.xlu2 %v1007_v5 }
 0x1c4   : > { %v1645_v6 = vpop.eup %1644 }
 0x1c5   : > { %v1010_v7 = vsel %vm888_vm1, %v1645_v6, 0.0 }
 0x1c6   : > { %1011 = vadd.xlane.f32.xlu2 %v1010_v7 }
 0x225   : > { %v1003_v8 = vpop.xlane.xlu0 %1002 }
 0x226   : > { %1646 = vrcp.f32 %v1003_v8 }
 0x22c   : > { %v1647_v9 = vpop.eup %1646 }
 0x22d   : > { %v1017_v10 = vmul.f32 %v1647_v9, %v1639_v57  ;;  %v1006_v11 = vpop.xlane.xlu1 %1005  ;;  %v1635_v57 = vld [vmem:[%s2004_s7] ss:$0 sm:$0xff] }
 0x22e   : > { %1648 = vrcp.f32 %v1006_v11  ;;  %v1608_v11 = vld [vmem:[%s2006_s9 + $0x8] sm:$0xff] }
 0x22f   : > { %v1021_v13 = vpack.c.bf16 %v1017_v10, %v1017_v10 }
 0x231   : > { %v1009_v14 = vpop.xlane.xlu2 %1008  ;;  %1547 = vmatmul.msk.bf16.vlgmr.msra.gmra.mxu0 %vm888_vm1, %v1021_v13  ;;  %v1607_v13 = vld [vmem:[%s2006_s9] sm:$0xff] }
 0x232   : > { %1650 = vrcp.f32 %v1009_v14  ;;  %1267 = vmatpush.bf16.msra.mxu0 %v1608_v11 }
 0x234   : > { %v1649_v15 = vpop.eup %1648 }
 0x235   : > { %v1018_v16 = vmul.f32 %v1649_v15, %v1641_v63 }
 0x236   : > { %1268 = vmatpush.bf16.msra.mxu0 %v1607_v13 }
 0x237   : > { %v1022_v17 = vpack.c.bf16 %v1018_v16, %v1018_v16 }
 0x238   : > { %v1651_v18 = vpop.eup %1650 }
 0x239   : > { %v1019_v19 = vmul.f32 %v1651_v18, %v1643_v3  ;;  %v1012_v20 = vpop.xlane.xlu2 %1011  ;;  %1548 = vmatmul.msk.bf16.vlgmr.msra.gmra.mxu1 %vm888_vm1, %v1022_v17 }
 0x23a   : > { %1652 = vrcp.f32 %v1012_v20  ;;  %1328 = vmatpush.bf16.msra.mxu1 %v1612_v31 }
 0x23b   : > { %v1023_v21 = vpack.c.bf16 %v1019_v19, %v1019_v19  ;;  %1654 = vrcp.f32 %v1670_v0 }
 0x23d   : > { %1549 = vmatmul.msk.bf16.vlgmr.msra.gmra.mxu2 %vm888_vm1, %v1023_v21  ;;  %v1232_v21 = vld [vmem:[%s2005_s8] sm:$0x3] }
 0x23e   : > { %v1235_v26 = vperm.slane %v1232_v21, 1  ;;  %1329 = vmatpush.bf16.msra.mxu1 %v1611_v32 }
 0x240   : > { %v1653_v22 = vpop.eup %1652 }
 0x241   : > { %v1020_v23 = vmul.f32 %v1653_v22, %v1645_v6  ;;  %v1655_v1 = vpop.eup %1654 }
 0x242   : > { %v1207_v2 = vmul.f32 32.0, %v1655_v1  ;;  %vm1211_vm3 = vweird.f32 %v1655_v1 }
 0x243   : > { %v1024_v24 = vpack.c.bf16 %v1020_v23, %v1020_v23 }
 0x244   : > { %v1208_v3 = vsub.f32 1.0, %v1207_v2 }
 0x245   : > { %1550 = vmatmul.msk.bf16.vlgmr.msra.gmra.mxu3 %vm888_vm1, %v1024_v24  ;;  %v1233_v24 = vperm.slane %v1232_v21, 0 }
 0x246   : > { %v1209_v4 = vmul.f32 %v1655_v1, %v1208_v3  ;;  %v1360_v3 = vld [vmem:[%s2010_s13] sm:$0x3] }
 0x248   : > { %v1210_v5 = vadd.f32 %v1655_v1, %v1209_v4 }
 0x24a   : > { %v1948_v6 = vsel %vm1211_vm3, %v1655_v1, %v1210_v5 }
 0x2ae   : > { %v1045_v33 = vpop.f32.mrf.mxu0 }
 0x2af   : > { %v1106_v34 = vpack.c.bf16 %v1045_v33, %v1045_v33  ;;  %v1610_v33 = vld [vmem:[%s2008_s11 + $0x8] sm:$0xff] }
 0x2b0   : > { %1330 = vmatpush.bf16.msra.mxu1 %v1610_v33 }
 0x2b1   : > { %1551 = vmatmul.msk.bf16.vlgmr.msrb.gmra.mxu0 %vm888_vm1, %v1106_v34  ;;  %v1609_v34 = vld [vmem:[%s2008_s11] sm:$0xff] }
 0x2b4   : > { %1331 = vmatpush.bf16.msra.mxu1 %v1609_v34 }
 0x2b6   : > { %v1047_v35 = vpop.f32.mrf.mxu0  ;;  %v1064_v36 = vpop.f32.mrf.mxu1 }
 0x2b7   : > { %v1107_v37 = vpack.c.bf16 %v1064_v36, %v1064_v36  ;;  %v1636_v35 = vld [vmem:[%s2007_s10] ss:$0 sm:$0xff] }
 0x2b9   : > { %1552 = vmatmul.msk.bf16.vlgmr.msrb.gmra.mxu1 %vm888_vm1, %v1107_v37 }
 0x2be   : > { %v1066_v38 = vpop.f32.mrf.mxu1 }
 0x2c0   : > { %v1083_v39 = vpop.f32.mrf.mxu2 }
 0x2c1   : > { %v1108_v40 = vpack.c.bf16 %v1083_v39, %v1083_v39 }
 0x2c3   : > { %1553 = vmatmul.msk.bf16.vlgmr.msrb.gmra.mxu2 %vm888_vm1, %v1108_v40 }
 0x2c8   : > { %v1085_v41 = vpop.f32.mrf.mxu2  ;;  %v1102_v42 = vpop.f32.mrf.mxu3 }
 0x2c9   : > { %v1109_v43 = vpack.c.bf16 %v1102_v42, %v1102_v42 }
 0x2cb   : > { %1554 = vmatmul.msk.bf16.vlgmr.msrb.gmra.mxu3 %vm888_vm1, %v1109_v43 }
 0x2d0   : > { %v1104_v44 = vpop.f32.mrf.mxu3 }
 0x32e   : > { %v1129_v45 = vpop.f32.mrf.mxu0 }
 0x32f   : > { %v1190_v51 = vsel %vm532_vm0, %v1129_v45, 0.0 }
 0x336   : > { %v1131_v46 = vpop.f32.mrf.mxu0  ;;  %v1148_v47 = vpop.f32.mrf.mxu1 }
 0x337   : > { %v1191_v50 = vsel %vm532_vm0, %v1148_v47, 0.0 }
 0x338   : > { %v1192_v53 = vadd.f32 %v1191_v50, %v1190_v51 }
 0x33e   : > { %v1150_v48 = vpop.f32.mrf.mxu1 }
 0x346   : > { %v1167_v49 = vpop.f32.mrf.mxu2 }
 0x347   : > { %v1193_v52 = vsel %vm532_vm0, %v1167_v49, 0.0  ;;  %v1637_v49 = vld [vmem:[%s2009_s12] ss:$0 sm:$0xff] }
 0x348   : > { %v1194_v54 = vadd.f32 %v1193_v52, %v1192_v53 }
 0x34e   : > { %v1169_v55 = vpop.f32.mrf.mxu2  ;;  %v1186_v56 = vpop.f32.mrf.mxu3 }
 0x34f   : > { %v1195_v58 = vsel %vm532_vm0, %v1186_v56, 0.0 }
 0x350   : > { %v1196_v59 = vadd.f32 %v1195_v58, %v1194_v54 }
 0x352   : > { %v1201_v60 = vadd.f32 %v1635_v57, %v1196_v59 }
 0x354   : > { %v1202_v61 = vadd.f32 %v1201_v60, %v1798_v12 }
 0x356   : > { %v1188_v62 = vpop.f32.mrf.mxu3  ;;  %v1203_v63 = vsel %vm532_vm0, %v1202_v61, 0.0 }
 0x357   : > { %1204 = vadd.xlane.f32.xlu2 %v1203_v63 }
 0x3ca   : > { %v1205_v7 = vpop.xlane.xlu2 %1204 }
 0x3cb   : > { %v1213_v8 = vmul.f32 %v1948_v6, %v1205_v7  ;;  %v1361_v7 = vperm.slane %v1360_v3, 0 }
 0x3cd   : > { %v1214_v9 = vsub.f32 %v1202_v61, %v1213_v8 }
 0x3cf   : > { %v1215_v10 = vmul.f32 %v1214_v9, %v1214_v9 }
 0x3d1   : > { %v1216_v12 = vsel %vm532_vm0, %v1215_v10, 0.0 }
 0x3d2   : > { %1217 = vadd.xlane.f32.xlu0 %v1216_v12 }
 0x445   : > { %v1218_v14 = vpop.xlane.xlu0 %1217 }
 0x446   : > { %v1219_v15 = vmul.f32 %v1218_v14, %v1948_v6 }
 0x448   : > { %v1220_v16 = vadd.f32 1e-12, %v1219_v15 }
 0x44a   : > { %1656 = vrsqrt.f32 %v1220_v16  ;;  %vm1227_vm5 = vweird.f32 %v1220_v16 }
 0x450   : > { %v1657_v17 = vpop.eup %1656 }
 0x451   : > { %v1222_v18 = vmul.f32 %v1657_v17, %v1220_v16  ;;  %vm1228_vm4 = vweird.f32 %v1657_v17 }
 0x452   : > { %vm1229_vm6 = vmor %vm1227_vm5, %vm1228_vm4 }
 0x453   : > { %v1223_v19 = vmul.f32 %v1657_v17, %v1222_v18 }
 0x455   : > { %v1224_v20 = vmul.f32 0.5, %v1223_v19 }
 0x457   : > { %v1225_v22 = vsub.f32 1.5, %v1224_v20 }
 0x459   : > { %v1226_v23 = vmul.f32 %v1657_v17, %v1225_v22 }
 0x45b   : > { %v1230_v25 = vsel %vm1229_vm6, %v1657_v17, %v1226_v23 }
 0x45c   : > { %v1231_v27 = vmul.f32 %v1230_v25, %v1214_v9  ;;  %v1363_v9 = vperm.slane %v1360_v3, 1 }
 0x45e   : > { %v1234_v28 = vmul.f32 %v1233_v24, %v1231_v27 }
 0x460   : > { %v1236_v29 = vadd.f32 %v1235_v26, %v1234_v28 }
 0x462   : > { %v1237_v30 = vpack.c.bf16 %v1236_v29, %v1236_v29 }
 0x464   : > { %1563 = vmatmul.msk.bf16.vlgmr.msra.gmra.mxu0 %vm532_vm0, %v1237_v30 }
 0x4e1   : > { %v1270_v36 = vpop.f32.mrf.mxu0 }
 0x4e2   : > { %v1271_v37 = vadd.f32 %v1636_v35, %v1270_v36 }
 0x4e4   : > { %v1274_v38 = vmul.f32 %v1271_v37, %v1271_v37 }
 0x4e6   : > { %v1275_v39 = vmul.f32 %v1274_v38, %v1271_v37 }
 0x4e8   : > { %v1276_v40 = vmul.f32 0.044715, %v1275_v39 }
 0x4e9   : > { %v1272_v41 = vpop.f32.mrf.mxu0 }
 0x4ea   : > { %v1277_v42 = vadd.f32 %v1276_v40, %v1271_v37 }
 0x4ec   : > { %v1278_v43 = vmul.f32 0.7978846, %v1277_v42 }
 0x4ee   : > { %1658 = vtanh.f32 %v1278_v43 }
 0x4f4   : > { %v1659_v44 = vpop.eup %1658 }
 0x4f5   : > { %v1280_v45 = vadd.f32 1.0, %v1659_v44 }
 0x4f7   : > { %v1281_v46 = vmul.f32 0.5, %v1280_v45 }
 0x4f9   : > { %v1282_v47 = vmul.f32 %v1281_v46, %v1271_v37 }
 0x4fb   : > { %v1283_v48 = vpack.c.bf16 %v1282_v47, %v1282_v47 }
 0x4fd   : > { %1580 = vmatmul.msk.bf16.vlgmr.msra.gmra.mxu1 %vm1320_vm7, %v1283_v48 }
 0x57a   : > { %v1333_v50 = vpop.f32.mrf.mxu1 }
 0x57b   : > { %v1334_v51 = vadd.f32 %v1637_v49, %v1333_v50 }
 0x57d   : > { %v1337_v52 = vadd.f32 %v1334_v51, %v1236_v29 }
 0x57f   : > { %v1338_v53 = vsel %vm532_vm0, %v1337_v52, 0.0 }
 0x580   : > { %1339 = vadd.xlane.f32.xlu1 %v1338_v53 }
 0x582   : > { %v1335_v54 = vpop.f32.mrf.mxu1 }
 0x5f3   : > { %v1340_v55 = vpop.xlane.xlu1 %1339 }
 0x5f4   : > { %v1341_v56 = vmul.f32 %v1340_v55, %v1948_v6 }
 0x5f6   : > { %v1342_v57 = vsub.f32 %v1337_v52, %v1341_v56 }
 0x5f8   : > { %v1343_v58 = vmul.f32 %v1342_v57, %v1342_v57 }
 0x5fa   : > { %v1344_v59 = vsel %vm532_vm0, %v1343_v58, 0.0 }
 0x5fb   : > { %1345 = vadd.xlane.f32.xlu2 %v1344_v59 }
 0x66e   : > { %v1346_v60 = vpop.xlane.xlu2 %1345 }
 0x66f   : > { %v1347_v61 = vmul.f32 %v1346_v60, %v1948_v6 }
 0x671   : > { %v1348_v62 = vadd.f32 1e-12, %v1347_v61 }
 0x673   : > { %1660 = vrsqrt.f32 %v1348_v62  ;;  %vm1355_vm9 = vweird.f32 %v1348_v62 }
 0x679   : > { %v1661_v63 = vpop.eup %1660 }
 0x67a   : > { %v1350_v0 = vmul.f32 %v1661_v63, %v1348_v62  ;;  %vm1356_vm8 = vweird.f32 %v1661_v63 }
 0x67b   : > { %vm1357_vm10 = vmor %vm1355_vm9, %vm1356_vm8 }
 0x67c   : > { %v1351_v1 = vmul.f32 %v1661_v63, %v1350_v0 }
 0x67e   : > { %v1352_v2 = vmul.f32 0.5, %v1351_v1 }
 0x680   : > { %v1353_v4 = vsub.f32 1.5, %v1352_v2 }
 0x682   : > { %v1354_v5 = vmul.f32 %v1661_v63, %v1353_v4 }
 0x684   : > { %v1358_v8 = vsel %vm1357_vm10, %v1661_v63, %v1354_v5 }
 0x685   : > { %v1359_v6 = vmul.f32 %v1358_v8, %v1342_v57 }
 0x687   : > { %v1362_v10 = vmul.f32 %v1361_v7, %v1359_v6 }
 0x689   : > { %v1364_v12 = vadd.f32 %v1363_v9, %v1362_v10 }
 0x68b   : > { %1365 = vst.msk [vmem:[%s476_s23] sm:$0xff] %vm532_vm0, %v1364_v12 }
 0x68c PF: > { %s24_s29 = sadd.s32 1, %s1668_s29  }
 0x68d   : > { %p21_p4 = scmp.ge.s32.totalorder %s24_s29, 4  }
 0x68f   :  { %23 = sbr.rel (!%p21_p4) target bundleno = 1 (0x1), region = 109 }

// kernel: bert_lstm_classifier_forward.8
= control target key start
LH: loop header
LB: loop body
LE: loop exit
PB: predicated region body
PF: predicated region fallthrough
CT: control target
= control target key end

     0   :  { %vm74_vm0 = vcmask 261120   ;;  %v1962_v23 = vmov 0   ;;  %vm92_vm1 = vcmask 130048   ;;  %vm370_vm14 = vcmask 123904   ;;  %s2240_s1 = inlined_call_operand.vmem [shape: bf16[4,32,16], index: 1, kind: input, shape index: {}]   ;;  %s2241_s0 = inlined_call_operand.vmem [shape: f32[8,2,32], index: 0, kind: input, shape index: {}]   ;;  %s2242_s2 = inlined_call_operand.vmem [shape: bf16[4,16,16], index: 2, kind: input, shape index: {}]   ;;  %s2243_s3 = inlined_call_operand.vmem [shape: f32[4,1,16], index: 3, kind: input, shape index: {}]   ;;  %s2244_s4 = inlined_call_operand.vmem [shape: f32[8,2,16], index: 4, kind: output, shape index: {}]  }
   0x1   :  { %v1790_v0 = vld [vmem:[%s2240_s1 + $0x8] sm:$0xff]  ;;  %v1792_v1 = vld [vmem:[%s2240_s1 + $0x18] sm:$0xff]  ;;  %v1789_v3 = vld [vmem:[%s2240_s1] sm:$0xff] }
   0x2   :  { %v1796_v2 = vld [vmem:[%s2240_s1 + $0x38] sm:$0xff]  ;;  %84 = vmatpush.bf16.msra.mxu0 %v1790_v0  ;;  %123 = vmatpush.bf16.msra.mxu1 %v1792_v1  ;;  %v1791_v4 = vld [vmem:[%s2240_s1 + $0x10] sm:$0xff]  ;;  %v18_v5 = vld [vmem:[%s2241_s0] sm:$0x3] }
   0x3   :  { %v19_v6 = vld [vmem:[%s2241_s0 + $0x2] sm:$0x3]  ;;  %199 = vmatpush.bf16.msra.mxu3 %v1796_v2  ;;  %v1795_v7 = vld [vmem:[%s2240_s1 + $0x30] sm:$0xff]  ;;  %v20_v8 = vld [vmem:[%s2241_s0 + $0x4] sm:$0x3] }
   0x4   :  { %v21_v9 = vld [vmem:[%s2241_s0 + $0x6] sm:$0x3]  ;;  %v22_v10 = vld [vmem:[%s2241_s0 + $0x8] sm:$0x3]  ;;  %v23_v11 = vld [vmem:[%s2241_s0 + $0xa] sm:$0x3] }
   0x5   :  { %34 = vst [vmem:[#allocation1] ss:$4 sm:$0xff] %v18_v5  ;;  %v24_v12 = vld [vmem:[%s2241_s0 + $0xc] sm:$0x3]  ;;  %v1797_v14 = vld [vmem:[%s2242_s2] sm:$0xff]  ;;  %v1800_v17 = vld [vmem:[%s2242_s2 + $0x18] sm:$0xff] }
   0x6   :  { %36 = vst [vmem:[#allocation1 + $0x1] ss:$4 sm:$0xff] %v19_v6  ;;  %v1794_v13 = vld [vmem:[%s2240_s1 + $0x28] sm:$0xff]  ;;  %85 = vmatpush.bf16.msra.mxu0 %v1789_v3  ;;  %124 = vmatpush.bf16.msra.mxu1 %v1791_v4  ;;  %v1793_v18 = vld [vmem:[%s2240_s1 + $0x20] sm:$0xff]  ;;  %v1799_v19 = vld [vmem:[%s2242_s2 + $0x10] sm:$0xff] }
   0x7   :  { %v1798_v15 = vld [vmem:[%s2242_s2 + $0x8] sm:$0xff]  ;;  %38 = vst [vmem:[#allocation1 + $0x2] ss:$4 sm:$0xff] %v20_v8  ;;  %200 = vmatpush.bf16.msra.mxu3 %v1795_v7  ;;  %161 = vmatpush.bf16.msra.mxu2 %v1794_v13  ;;  %v1830_v24 = vld [vmem:[%s2243_s3] ss:$0 sm:$0xff]  ;;  %v1804_v55 = vld [vmem:[%s2242_s2 + $0x18] sm:$0xff] }
   0x8   :  { %v25_v16 = vld [vmem:[%s2241_s0 + $0xe] sm:$0x3]  ;;  %40 = vst [vmem:[#allocation1 + $0x3] ss:$4 sm:$0xff] %v21_v9  ;;  %v1831_v25 = vld [vmem:[%s2243_s3 + $0x1] ss:$0 sm:$0xff] }
   0x9   :  { %42 = vst [vmem:[#allocation1 + $0x20] ss:$4 sm:$0xff] %v22_v10  ;;  %v1832_v30 = vld [vmem:[%s2243_s3 + $0x3] ss:$0 sm:$0xff]  ;;  %v1833_v31 = vld [vmem:[%s2243_s3 + $0x2] ss:$0 sm:$0xff] }
   0xa   :  { %228 = vmatpush.bf16.msrb.mxu0 %v1797_v14  ;;  %271 = vmatpush.bf16.msrb.mxu1 %v1798_v15  ;;  %44 = vst [vmem:[#allocation1 + $0x21] ss:$4 sm:$0xff] %v23_v11  ;;  %v1801_v52 = vld [vmem:[%s2242_s2] sm:$0xff]  ;;  %v1802_v53 = vld [vmem:[%s2242_s2 + $0x8] sm:$0xff]  ;;  %v1803_v56 = vld [vmem:[%s2242_s2 + $0x10] sm:$0xff] }
   0xb   :  { %339 = vmatpush.bf16.msrb.mxu3 %v1800_v17  ;;  %46 = vst [vmem:[#allocation1 + $0x22] ss:$4 sm:$0xff] %v24_v12  ;;  %162 = vmatpush.bf16.msra.mxu2 %v1793_v18 }
   0xc   :  { %48 = vst [vmem:[#allocation1 + $0x23] ss:$4 sm:$0xff] %v25_v16 }
   0xf   :  { %314 = vmatpush.bf16.msrb.mxu2 %v1799_v19  ;;  %v49_v20 = vld.sshfl [vmem:[#allocation1] sm:$0xff pattern:$0x73625140] }
  0x13   :  { %v50_v21 = vld.sshfl [vmem:[#allocation1 + $0x20] sm:$0xff pattern:$0x73625140] }
  0x14   :  { %v53_v22 = vpack.c.bf16 %v50_v21, %v49_v20 }
  0x16   :  { %1511 = vmatmul.msk.bf16.vlgmr.msra.gmra.mxu0 %vm74_vm0, %v53_v22  ;;  %1525 = vmatmul.msk.bf16.vlgmr.msra.gmra.mxu1 %vm74_vm0, %v53_v22 }
  0x17   :  { %1553 = vmatmul.msk.bf16.vlgmr.msra.gmra.mxu3 %vm74_vm0, %v53_v22  ;;  %1539 = vmatmul.msk.bf16.vlgmr.msra.gmra.mxu2 %vm74_vm0, %v53_v22 }
  0x18   :  { %392 = vmatpush.bf16.msra.mxu0 %v1801_v52  ;;  %434 = vmatpush.bf16.msra.mxu1 %v1802_v53 }
  0x19   :  { %500 = vmatpush.bf16.msra.mxu3 %v1804_v55  ;;  %476 = vmatpush.bf16.msra.mxu2 %v1803_v56  ;;  %v1806_v55 = vld [vmem:[%s2242_s2 + $0x8] sm:$0xff]  ;;  %v1808_v56 = vld [vmem:[%s2242_s2 + $0x18] sm:$0xff] }
  0x26   :  { %229 = vmatmul.bf16.vlgmr.msrb.gmra.mxu0 %v1962_v23  ;;  %272 = vmatmul.bf16.vlgmr.msrb.gmra.mxu1 %v1962_v23 }
  0x27   :  { %340 = vmatmul.bf16.vlgmr.msrb.gmra.mxu3 %v1962_v23  ;;  %315 = vmatmul.bf16.vlgmr.msrb.gmra.mxu2 %v1962_v23 }
  0x28   :  { %595 = vmatpush.bf16.msrb.mxu1 %v1806_v55  ;;  %661 = vmatpush.bf16.msrb.mxu3 %v1808_v56  ;;  %v1809_v56 = vld [vmem:[%s2242_s2] sm:$0xff] }
  0x93   :  { %v87_v26 = vpop.f32.mrf.mxu0  ;;  %v126_v27 = vpop.f32.mrf.mxu1 }
  0x94   :  { %v88_v28 = vadd.f32 %v1830_v24, %v87_v26  ;;  %v127_v29 = vadd.f32 %v1831_v25, %v126_v27 }
  0x96   :  { %93 = vst.msk [vmem:[#allocation2] sm:$0xff] %vm92_vm1, %v88_v28 }
  0x97   :  { %131 = vst.msk [vmem:[#allocation3] sm:$0xff] %vm92_vm1, %v127_v29 }
  0x9a   :  { %v202_v32 = vpop.f32.mrf.mxu3  ;;  %v164_v33 = vpop.f32.mrf.mxu2 }
  0x9b   :  { %v203_v34 = vadd.f32 %v1832_v30, %v202_v32  ;;  %v89_v35 = vpop.f32.mrf.mxu0  ;;  %v128_v36 = vpop.f32.mrf.mxu1  ;;  %v165_v39 = vadd.f32 %v1833_v31, %v164_v33 }
  0x9c   :  { %v90_v37 = vadd.f32 %v1830_v24, %v89_v35  ;;  %v129_v38 = vadd.f32 %v1831_v25, %v128_v36 }
  0x9d   :  { %207 = vst.msk [vmem:[#allocation5] sm:$0xff] %vm92_vm1, %v203_v34  ;;  %v209_v43 = vld [vmem:[#allocation2] sm:$0x3] }
  0x9e   :  { %94 = vst.msk [vmem:[#allocation2 + $0x8] sm:$0xff] %vm92_vm1, %v90_v37  ;;  %v254_v45 = vld [vmem:[#allocation3] sm:$0x3] }
  0x9f   :  { %132 = vst.msk [vmem:[#allocation3 + $0x8] sm:$0xff] %vm92_vm1, %v129_v38 }
  0xa0   :  { %169 = vst.msk [vmem:[#allocation4] sm:$0xff] %vm92_vm1, %v165_v39 }
  0xa2   :  { %v204_v40 = vpop.f32.mrf.mxu3  ;;  %v166_v41 = vpop.f32.mrf.mxu2 }
  0xa3   :  { %v205_v42 = vadd.f32 %v1832_v30, %v204_v40  ;;  %v230_v44 = vpop.f32.mrf.mxu0  ;;  %v273_v46 = vpop.f32.mrf.mxu1  ;;  %v167_v47 = vadd.f32 %v1833_v31, %v166_v41 }
  0xa4   :  { %v234_v48 = vadd.f32 %v230_v44, %v209_v43  ;;  %v277_v49 = vadd.f32 %v273_v46, %v254_v45  ;;  %v322_v54 = vld [vmem:[#allocation5] sm:$0x3]  ;;  %v373_v46 = vld [vmem:[#allocation2 + $0x2] sm:$0x3] }
  0xa5   :  { %208 = vst.msk [vmem:[#allocation5 + $0x8] sm:$0xff] %vm92_vm1, %v205_v42 }
  0xa6   :  { %v1558_v50 = vmul.f32 -1.442695, %v234_v48  ;;  %v1565_v51 = vmul.f32 -1.442695, %v277_v49  ;;  %170 = vst.msk [vmem:[#allocation4 + $0x8] sm:$0xff] %vm92_vm1, %v167_v47 }
  0xa7   :  { %v297_v5 = vld [vmem:[#allocation4] sm:$0x3]  ;;  %v418_v48 = vld [vmem:[#allocation3 + $0x2] sm:$0x3] }
  0xa8   :  { %1834 = vpow2.f32 %v1558_v50 }
  0xa9   :  { %1836 = vpow2.f32 %v1565_v51 }
  0xaa   :  { %v341_v57 = vpop.f32.mrf.mxu3  ;;  %v316_v58 = vpop.f32.mrf.mxu2 }
  0xab   :  { %v345_v59 = vadd.f32 %v341_v57, %v322_v54  ;;  %v232_v60 = vpop.f32.mrf.mxu0  ;;  %v275_v61 = vpop.f32.mrf.mxu1  ;;  %v320_v9 = vadd.f32 %v316_v58, %v297_v5  ;;  %v1805_v54 = vld [vmem:[%s2242_s2] sm:$0xff]  ;;  %v1807_v57 = vld [vmem:[%s2242_s2 + $0x10] sm:$0xff] }
  0xac   :  { %553 = vmatpush.bf16.msrb.mxu0 %v1805_v54  ;;  %637 = vmatpush.bf16.msrb.mxu2 %v1807_v57  ;;  %v1810_v57 = vld [vmem:[%s2242_s2 + $0x8] sm:$0xff] }
  0xad   :  { %v1578_v62 = vmul.f32 -1.442695, %v345_v59  ;;  %v484_v59 = vld [vmem:[#allocation5 + $0x2] sm:$0x3] }
  0xae   :  { %v1835_v63 = vpop.eup %1834 }
  0xaf   :  { %v1837_v0 = vpop.eup %1836  ;;  %v238_v1 = vadd.f32 1.0, %v1835_v63  ;;  %1838 = vpow2.f32 %v1578_v62 }
  0xb0   :  { %v281_v2 = vadd.f32 1.0, %v1837_v0 }
  0xb1   :  { %1840 = vrcp.f32 %v238_v1  ;;  %v250_v15 = vand.u32 2147483648, %v238_v1  ;;  %v248_v18 = vand.u32 2147483647, %v238_v1  ;;  %vm244_vm4 = vweird.f32 %v238_v1 }
  0xb2   :  { %1842 = vrcp.f32 %v281_v2  ;;  %v343_v3 = vpop.f32.mrf.mxu3  ;;  %v318_v4 = vpop.f32.mrf.mxu2  ;;  %v293_v16 = vand.u32 2147483648, %v281_v2  ;;  %v291_v20 = vand.u32 2147483647, %v281_v2  ;;  %vm287_vm5 = vweird.f32 %v281_v2 }
  0xb3   :  { %v251_v24 = vor.u32 1.1754944e-38, %v250_v15  ;;  %vm249_vm7 = vcmp.eq.f32.partialorder %v248_v18, 8.507059e+37 }
  0xb4   :  { %v294_v26 = vor.u32 1.1754944e-38, %v293_v16  ;;  %vm292_vm9 = vcmp.eq.f32.partialorder %v291_v20, 8.507059e+37 }
  0xb5   :  { %v1839_v6 = vpop.eup %1838 }
  0xb6   :  { %v349_v7 = vadd.f32 1.0, %v1839_v6 }
  0xb7   :  { %v1841_v8 = vpop.eup %1840 }
  0xb8   :  { %v1843_v10 = vpop.eup %1842  ;;  %v240_v11 = vmul.f32 %v1841_v8, %v238_v1  ;;  %1844 = vrcp.f32 %v349_v7  ;;  %vm245_vm2 = vweird.f32 %v1841_v8  ;;  %v361_v38 = vand.u32 2147483648, %v349_v7 }
  0xb9   :  { %v283_v12 = vmul.f32 %v1843_v10, %v281_v2  ;;  %1846 = vtanh.f32 %v320_v9  ;;  %vm288_vm3 = vweird.f32 %v1843_v10  ;;  %vm246_vm6 = vmor %vm244_vm4, %vm245_vm2  ;;  %vm355_vm11 = vweird.f32 %v349_v7 }
  0xba   :  { %v241_v13 = vsub.f32 1.0, %v240_v11  ;;  %vm289_vm8 = vmor %vm287_vm5, %vm288_vm3  ;;  %v359_v39 = vand.u32 2147483647, %v349_v7  ;;  %v362_v41 = vor.u32 1.1754944e-38, %v361_v38 }
  0xbb   :  { %v284_v14 = vsub.f32 1.0, %v283_v12 }
  0xbc   :  { %v242_v17 = vmul.f32 %v1841_v8, %v241_v13  ;;  %vm360_vm13 = vcmp.eq.f32.partialorder %v359_v39, 8.507059e+37 }
  0xbd   :  { %v285_v19 = vmul.f32 %v1843_v10, %v284_v14 }
  0xbe   :  { %v1845_v21 = vpop.eup %1844  ;;  %v243_v22 = vadd.f32 %v1841_v8, %v242_v17 }
  0xbf   :  { %v351_v23 = vmul.f32 %v1845_v21, %v349_v7  ;;  %v286_v25 = vadd.f32 %v1843_v10, %v285_v19  ;;  %v1847_v28 = vpop.eup %1846  ;;  %vm356_vm10 = vweird.f32 %v1845_v21 }
  0xc0   :  { %v247_v27 = vsel %vm246_vm6, %v1841_v8, %v243_v22  ;;  %vm357_vm12 = vmor %vm355_vm11, %vm356_vm10  ;;  %v460_v8 = vld [vmem:[#allocation4 + $0x2] sm:$0x3] }
  0xc1   :  { %v352_v29 = vsub.f32 1.0, %v351_v23  ;;  %v252_v30 = vsel %vm249_vm7, %v251_v24, %v247_v27  ;;  %v290_v31 = vsel %vm289_vm8, %v1843_v10, %v286_v25 }
  0xc2   :  { %v295_v32 = vsel %vm292_vm9, %v294_v26, %v290_v31  ;;  %v366_v33 = vmul.f32 %v1847_v28, %v252_v30 }
  0xc3   :  { %v353_v34 = vmul.f32 %v1845_v21, %v352_v29  ;;  %v365_v35 = vmul.f32 0.0, %v295_v32 }
  0xc5   :  { %v2080_v36 = vadd.f32 %v366_v33, %v365_v35  ;;  %v354_v37 = vadd.f32 %v1845_v21, %v353_v34 }
  0xc7   :  { %1848 = vtanh.f32 %v2080_v36  ;;  %v358_v40 = vsel %vm357_vm12, %v1845_v21, %v354_v37 }
  0xc8   :  { %v363_v43 = vsel %vm360_vm13, %v362_v41, %v358_v40 }
  0xcd   :  { %v1849_v42 = vpop.eup %1848 }
  0xce   :  { %v369_v44 = vmul.f32 %v1849_v42, %v363_v43 }
  0xd0   :  { %371 = vst.msk [vmem:[%s2244_s4] sm:$0x3] %vm370_vm14, %v369_v44  ;;  %v372_v45 = vpack.c.bf16 %v369_v44, %v369_v44 }
  0xd2   :  { %1583 = vmatmul.msk.bf16.vlgmr.msra.gmra.mxu0 %vm92_vm1, %v372_v45  ;;  %1591 = vmatmul.msk.bf16.vlgmr.msra.gmra.mxu1 %vm92_vm1, %v372_v45 }
  0xd3   :  { %1599 = vmatmul.msk.bf16.vlgmr.msra.gmra.mxu2 %vm92_vm1, %v372_v45  ;;  %1606 = vmatmul.msk.bf16.vlgmr.msra.gmra.mxu3 %vm92_vm1, %v372_v45 }
  0xd4   :  { %714 = vmatpush.bf16.msra.mxu0 %v1809_v56  ;;  %756 = vmatpush.bf16.msra.mxu1 %v1810_v57 }
 0x14f   :  { %v394_v47 = vpop.f32.mrf.mxu0  ;;  %v436_v49 = vpop.f32.mrf.mxu1 }
 0x150   :  { %v398_v50 = vadd.f32 %v394_v47, %v373_v46  ;;  %v440_v51 = vadd.f32 %v436_v49, %v418_v48  ;;  %v534_v48 = vld [vmem:[#allocation2 + $0x4] sm:$0x3] }
 0x152   :  { %v1584_v52 = vmul.f32 -1.442695, %v398_v50  ;;  %v1592_v53 = vmul.f32 -1.442695, %v440_v51  ;;  %v579_v50 = vld [vmem:[#allocation3 + $0x4] sm:$0x3] }
 0x154   :  { %1850 = vpow2.f32 %v1584_v52 }
 0x155   :  { %1852 = vpow2.f32 %v1592_v53 }
 0x156   :  { %v478_v58 = vpop.f32.mrf.mxu2  ;;  %v502_v60 = vpop.f32.mrf.mxu3 }
 0x157   :  { %v506_v61 = vadd.f32 %v502_v60, %v484_v59  ;;  %v396_v62 = vpop.f32.mrf.mxu0  ;;  %v438_v63 = vpop.f32.mrf.mxu1  ;;  %v482_v11 = vadd.f32 %v478_v58, %v460_v8  ;;  %v1812_v58 = vld [vmem:[%s2242_s2 + $0x18] sm:$0xff]  ;;  %v1811_v59 = vld [vmem:[%s2242_s2 + $0x10] sm:$0xff] }
 0x158   :  { %822 = vmatpush.bf16.msra.mxu3 %v1812_v58  ;;  %798 = vmatpush.bf16.msra.mxu2 %v1811_v59  ;;  %v1813_v58 = vld [vmem:[%s2242_s2] sm:$0xff]  ;;  %v1814_v59 = vld [vmem:[%s2242_s2 + $0x8] sm:$0xff] }
 0x159   :  { %v1607_v0 = vmul.f32 -1.442695, %v506_v61  ;;  %v645_v61 = vld [vmem:[#allocation5 + $0x4] sm:$0x3] }
 0x15a   :  { %v1851_v1 = vpop.eup %1850 }
 0x15b   :  { %v1853_v2 = vpop.eup %1852  ;;  %v402_v3 = vadd.f32 1.0, %v1851_v1  ;;  %1854 = vpow2.f32 %v1607_v0 }
 0x15c   :  { %v444_v4 = vadd.f32 1.0, %v1853_v2 }
 0x15d   :  { %1856 = vrcp.f32 %v402_v3  ;;  %v414_v17 = vand.u32 2147483648, %v402_v3  ;;  %v412_v20 = vand.u32 2147483647, %v402_v3  ;;  %vm408_vm2 = vweird.f32 %v402_v3 }
 0x15e   :  { %1858 = vrcp.f32 %v444_v4  ;;  %v480_v5 = vpop.f32.mrf.mxu2  ;;  %v504_v6 = vpop.f32.mrf.mxu3  ;;  %v456_v18 = vand.u32 2147483648, %v444_v4  ;;  %v454_v22 = vand.u32 2147483647, %v444_v4  ;;  %vm450_vm3 = vweird.f32 %v444_v4 }
 0x15f   :  { %v415_v25 = vor.u32 1.1754944e-38, %v414_v17  ;;  %vm413_vm6 = vcmp.eq.f32.partialorder %v412_v20, 8.507059e+37 }
 0x160   :  { %v457_v28 = vor.u32 1.1754944e-38, %v456_v18  ;;  %vm455_vm7 = vcmp.eq.f32.partialorder %v454_v22, 8.507059e+37 }
 0x161   :  { %v1855_v7 = vpop.eup %1854 }
 0x162   :  { %v510_v9 = vadd.f32 1.0, %v1855_v7 }
 0x163   :  { %v1857_v10 = vpop.eup %1856 }
 0x164   :  { %v1859_v12 = vpop.eup %1858  ;;  %v404_v13 = vmul.f32 %v1857_v10, %v402_v3  ;;  %1860 = vrcp.f32 %v510_v9  ;;  %vm409_vm15 = vweird.f32 %v1857_v10  ;;  %v522_v41 = vand.u32 2147483648, %v510_v9 }
 0x165   :  { %v446_v14 = vmul.f32 %v1859_v12, %v444_v4  ;;  %1862 = vtanh.f32 %v482_v11  ;;  %vm451_vm0 = vweird.f32 %v1859_v12  ;;  %vm410_vm4 = vmor %vm408_vm2, %vm409_vm15  ;;  %vm516_vm9 = vweird.f32 %v510_v9 }
 0x166   :  { %v405_v15 = vsub.f32 1.0, %v404_v13  ;;  %vm452_vm5 = vmor %vm450_vm3, %vm451_vm0  ;;  %v520_v42 = vand.u32 2147483647, %v510_v9  ;;  %v523_v44 = vor.u32 1.1754944e-38, %v522_v41 }
 0x167   :  { %v447_v16 = vsub.f32 1.0, %v446_v14 }
 0x168   :  { %v406_v19 = vmul.f32 %v1857_v10, %v405_v15  ;;  %vm521_vm11 = vcmp.eq.f32.partialorder %v520_v42, 8.507059e+37 }
 0x169   :  { %v448_v21 = vmul.f32 %v1859_v12, %v447_v16 }
 0x16a   :  { %v1861_v23 = vpop.eup %1860  ;;  %v407_v24 = vadd.f32 %v1857_v10, %v406_v19 }
 0x16b   :  { %v449_v26 = vadd.f32 %v1859_v12, %v448_v21  ;;  %v512_v27 = vmul.f32 %v1861_v23, %v510_v9  ;;  %v1863_v30 = vpop.eup %1862  ;;  %vm517_vm8 = vweird.f32 %v1861_v23 }
 0x16c   :  { %v411_v29 = vsel %vm410_vm4, %v1857_v10, %v407_v24  ;;  %vm518_vm10 = vmor %vm516_vm9, %vm517_vm8  ;;  %v621_v10 = vld [vmem:[#allocation4 + $0x4] sm:$0x3] }
 0x16d   :  { %v416_v31 = vsel %vm413_vm6, %v415_v25, %v411_v29  ;;  %v453_v32 = vsel %vm452_vm5, %v1859_v12, %v449_v26  ;;  %v513_v33 = vsub.f32 1.0, %v512_v27 }
 0x16e   :  { %v458_v34 = vsel %vm455_vm7, %v457_v28, %v453_v32  ;;  %v527_v35 = vmul.f32 %v1863_v30, %v416_v31 }
 0x16f   :  { %v526_v37 = vmul.f32 %v458_v34, %v2080_v36  ;;  %v514_v38 = vmul.f32 %v1861_v23, %v513_v33 }
 0x171   :  { %v2104_v39 = vadd.f32 %v527_v35, %v526_v37  ;;  %v515_v40 = vadd.f32 %v1861_v23, %v514_v38 }
 0x173   :  { %1864 = vtanh.f32 %v2104_v39  ;;  %v519_v43 = vsel %vm518_vm10, %v1861_v23, %v515_v40 }
 0x174   :  { %v524_v46 = vsel %vm521_vm11, %v523_v44, %v519_v43 }
 0x179   :  { %v1865_v45 = vpop.eup %1864 }
 0x17a   :  { %v530_v47 = vmul.f32 %v1865_v45, %v524_v46 }
 0x17c   :  { %1608 = vst.msk [vmem:[%s2244_s4 + $0x2] sm:$0x3] %vm370_vm14, %v530_v47  ;;  %v533_v36 = vpack.c.bf16 %v530_v47, %v530_v47 }
 0x17e   :  { %1613 = vmatmul.msk.bf16.vlgmr.msrb.gmra.mxu0 %vm92_vm1, %v533_v36  ;;  %1621 = vmatmul.msk.bf16.vlgmr.msrb.gmra.mxu1 %vm92_vm1, %v533_v36 }
 0x17f   :  { %1629 = vmatmul.msk.bf16.vlgmr.msrb.gmra.mxu2 %vm92_vm1, %v533_v36  ;;  %1636 = vmatmul.msk.bf16.vlgmr.msrb.gmra.mxu3 %vm92_vm1, %v533_v36 }
 0x180   :  { %875 = vmatpush.bf16.msrb.mxu0 %v1813_v58  ;;  %917 = vmatpush.bf16.msrb.mxu1 %v1814_v59 }
 0x1fb   :  { %v555_v49 = vpop.f32.mrf.mxu0  ;;  %v597_v51 = vpop.f32.mrf.mxu1 }
 0x1fc   :  { %v559_v52 = vadd.f32 %v555_v49, %v534_v48  ;;  %v601_v53 = vadd.f32 %v597_v51, %v579_v50  ;;  %v695_v50 = vld [vmem:[#allocation2 + $0x6] sm:$0x3] }
 0x1fe   :  { %v1614_v54 = vmul.f32 -1.442695, %v559_v52  ;;  %v1622_v55 = vmul.f32 -1.442695, %v601_v53  ;;  %v740_v52 = vld [vmem:[#allocation3 + $0x6] sm:$0x3] }
 0x200   :  { %1866 = vpow2.f32 %v1614_v54 }
 0x201   :  { %1868 = vpow2.f32 %v1622_v55 }
 0x202   :  { %v639_v60 = vpop.f32.mrf.mxu2  ;;  %v663_v62 = vpop.f32.mrf.mxu3 }
 0x203   :  { %v667_v63 = vadd.f32 %v663_v62, %v645_v61  ;;  %v557_v0 = vpop.f32.mrf.mxu0  ;;  %v599_v1 = vpop.f32.mrf.mxu1  ;;  %v643_v13 = vadd.f32 %v639_v60, %v621_v10  ;;  %v1816_v60 = vld [vmem:[%s2242_s2 + $0x18] sm:$0xff]  ;;  %v1815_v61 = vld [vmem:[%s2242_s2 + $0x10] sm:$0xff] }
 0x204   :  { %983 = vmatpush.bf16.msrb.mxu3 %v1816_v60  ;;  %959 = vmatpush.bf16.msrb.mxu2 %v1815_v61  ;;  %v1817_v60 = vld [vmem:[%s2242_s2] sm:$0xff]  ;;  %v1818_v61 = vld [vmem:[%s2242_s2 + $0x8] sm:$0xff] }
 0x205   :  { %v1637_v2 = vmul.f32 -1.442695, %v667_v63  ;;  %v806_v63 = vld [vmem:[#allocation5 + $0x6] sm:$0x3] }
 0x206   :  { %v1867_v3 = vpop.eup %1866 }
 0x207   :  { %v1869_v4 = vpop.eup %1868  ;;  %v563_v5 = vadd.f32 1.0, %v1867_v3  ;;  %1870 = vpow2.f32 %v1637_v2 }
 0x208   :  { %v605_v6 = vadd.f32 1.0, %v1869_v4 }
 0x209   :  { %1872 = vrcp.f32 %v563_v5  ;;  %v575_v19 = vand.u32 2147483648, %v563_v5  ;;  %v573_v22 = vand.u32 2147483647, %v563_v5  ;;  %vm569_vm15 = vweird.f32 %v563_v5 }
 0x20a   :  { %1874 = vrcp.f32 %v605_v6  ;;  %v641_v7 = vpop.f32.mrf.mxu2  ;;  %v665_v8 = vpop.f32.mrf.mxu3  ;;  %v617_v20 = vand.u32 2147483648, %v605_v6  ;;  %v615_v24 = vand.u32 2147483647, %v605_v6  ;;  %vm611_vm0 = vweird.f32 %v605_v6 }
 0x20b   :  { %v576_v27 = vor.u32 1.1754944e-38, %v575_v19  ;;  %vm574_vm4 = vcmp.eq.f32.partialorder %v573_v22, 8.507059e+37 }
 0x20c   :  { %v618_v30 = vor.u32 1.1754944e-38, %v617_v20  ;;  %vm616_vm5 = vcmp.eq.f32.partialorder %v615_v24, 8.507059e+37 }
 0x20d   :  { %v1871_v9 = vpop.eup %1870 }
 0x20e   :  { %v671_v11 = vadd.f32 1.0, %v1871_v9 }
 0x20f   :  { %v1873_v12 = vpop.eup %1872 }
 0x210   :  { %v1875_v14 = vpop.eup %1874  ;;  %v565_v15 = vmul.f32 %v1873_v12, %v563_v5  ;;  %1876 = vrcp.f32 %v671_v11  ;;  %vm570_vm12 = vweird.f32 %v1873_v12  ;;  %v683_v44 = vand.u32 2147483648, %v671_v11 }
 0x211   :  { %v607_v16 = vmul.f32 %v1875_v14, %v605_v6  ;;  %1878 = vtanh.f32 %v643_v13  ;;  %vm612_vm13 = vweird.f32 %v1875_v14  ;;  %vm571_vm2 = vmor %vm569_vm15, %vm570_vm12  ;;  %vm677_vm7 = vweird.f32 %v671_v11 }
 0x212   :  { %v566_v17 = vsub.f32 1.0, %v565_v15  ;;  %vm613_vm3 = vmor %vm611_vm0, %vm612_vm13  ;;  %v681_v45 = vand.u32 2147483647, %v671_v11  ;;  %v684_v47 = vor.u32 1.1754944e-38, %v683_v44 }
 0x213   :  { %v608_v18 = vsub.f32 1.0, %v607_v16 }
 0x214   :  { %v567_v21 = vmul.f32 %v1873_v12, %v566_v17  ;;  %vm682_vm9 = vcmp.eq.f32.partialorder %v681_v45, 8.507059e+37 }
 0x215   :  { %v609_v23 = vmul.f32 %v1875_v14, %v608_v18 }
 0x216   :  { %v1877_v25 = vpop.eup %1876  ;;  %v568_v26 = vadd.f32 %v1873_v12, %v567_v21 }
 0x217   :  { %v610_v28 = vadd.f32 %v1875_v14, %v609_v23  ;;  %v673_v29 = vmul.f32 %v1877_v25, %v671_v11  ;;  %v1879_v32 = vpop.eup %1878  ;;  %vm678_vm6 = vweird.f32 %v1877_v25 }
 0x218   :  { %v572_v31 = vsel %vm571_vm2, %v1873_v12, %v568_v26  ;;  %vm679_vm8 = vmor %vm677_vm7, %vm678_vm6  ;;  %v782_v12 = vld [vmem:[#allocation4 + $0x6] sm:$0x3] }
 0x219   :  { %v577_v33 = vsel %vm574_vm4, %v576_v27, %v572_v31  ;;  %v614_v34 = vsel %vm613_vm3, %v1875_v14, %v610_v28  ;;  %v674_v35 = vsub.f32 1.0, %v673_v29 }
 0x21a   :  { %v619_v37 = vsel %vm616_vm5, %v618_v30, %v614_v34  ;;  %v688_v38 = vmul.f32 %v1879_v32, %v577_v33 }
 0x21b   :  { %v687_v40 = vmul.f32 %v619_v37, %v2104_v39  ;;  %v675_v41 = vmul.f32 %v1877_v25, %v674_v35 }
 0x21d   :  { %v2128_v42 = vadd.f32 %v688_v38, %v687_v40  ;;  %v676_v43 = vadd.f32 %v1877_v25, %v675_v41 }
 0x21f   :  { %1880 = vtanh.f32 %v2128_v42  ;;  %v680_v46 = vsel %vm679_vm8, %v1877_v25, %v676_v43 }
 0x220   :  { %v685_v48 = vsel %vm682_vm9, %v684_v47, %v680_v46 }
 0x225   :  { %v1881_v36 = vpop.eup %1880 }
 0x226   :  { %v691_v49 = vmul.f32 %v1881_v36, %v685_v48 }
 0x228   :  { %1638 = vst.msk [vmem:[%s2244_s4 + $0x4] sm:$0x3] %vm370_vm14, %v691_v49  ;;  %v694_v39 = vpack.c.bf16 %v691_v49, %v691_v49 }
 0x22a   :  { %1643 = vmatmul.msk.bf16.vlgmr.msra.gmra.mxu0 %vm92_vm1, %v694_v39  ;;  %1651 = vmatmul.msk.bf16.vlgmr.msra.gmra.mxu1 %vm92_vm1, %v694_v39 }
 0x22b   :  { %1659 = vmatmul.msk.bf16.vlgmr.msra.gmra.mxu2 %vm92_vm1, %v694_v39  ;;  %1666 = vmatmul.msk.bf16.vlgmr.msra.gmra.mxu3 %vm92_vm1, %v694_v39 }
 0x22c   :  { %1036 = vmatpush.bf16.msra.mxu0 %v1817_v60  ;;  %1078 = vmatpush.bf16.msra.mxu1 %v1818_v61 }
 0x2a7   :  { %v716_v51 = vpop.f32.mrf.mxu0  ;;  %v758_v53 = vpop.f32.mrf.mxu1 }
 0x2a8   :  { %v720_v54 = vadd.f32 %v716_v51, %v695_v50  ;;  %v762_v55 = vadd.f32 %v758_v53, %v740_v52  ;;  %v856_v52 = vld [vmem:[#allocation2 + $0x8] sm:$0x3] }
 0x2aa   :  { %v1644_v56 = vmul.f32 -1.442695, %v720_v54  ;;  %v1652_v57 = vmul.f32 -1.442695, %v762_v55  ;;  %v901_v54 = vld [vmem:[#allocation3 + $0x8] sm:$0x3] }
 0x2ac   :  { %1882 = vpow2.f32 %v1644_v56 }
 0x2ad   :  { %1884 = vpow2.f32 %v1652_v57 }
 0x2ae   :  { %v800_v62 = vpop.f32.mrf.mxu2  ;;  %v824_v0 = vpop.f32.mrf.mxu3 }
 0x2af   :  { %v828_v1 = vadd.f32 %v824_v0, %v806_v63  ;;  %v718_v2 = vpop.f32.mrf.mxu0  ;;  %v760_v3 = vpop.f32.mrf.mxu1  ;;  %v804_v15 = vadd.f32 %v800_v62, %v782_v12  ;;  %v1820_v62 = vld [vmem:[%s2242_s2 + $0x18] sm:$0xff]  ;;  %v1819_v63 = vld [vmem:[%s2242_s2 + $0x10] sm:$0xff] }
 0x2b0   :  { %1144 = vmatpush.bf16.msra.mxu3 %v1820_v62  ;;  %1120 = vmatpush.bf16.msra.mxu2 %v1819_v63  ;;  %v1821_v62 = vld [vmem:[%s2242_s2] sm:$0xff]  ;;  %v1822_v63 = vld [vmem:[%s2242_s2 + $0x8] sm:$0xff] }
 0x2b1   :  { %v1667_v4 = vmul.f32 -1.442695, %v828_v1  ;;  %v967_v1 = vld [vmem:[#allocation5 + $0x8] sm:$0x3] }
 0x2b2   :  { %v1883_v5 = vpop.eup %1882 }
 0x2b3   :  { %v1885_v6 = vpop.eup %1884  ;;  %v724_v7 = vadd.f32 1.0, %v1883_v5  ;;  %1886 = vpow2.f32 %v1667_v4 }
 0x2b4   :  { %v766_v8 = vadd.f32 1.0, %v1885_v6 }
 0x2b5   :  { %1888 = vrcp.f32 %v724_v7  ;;  %v736_v21 = vand.u32 2147483648, %v724_v7  ;;  %v734_v24 = vand.u32 2147483647, %v724_v7  ;;  %vm730_vm12 = vweird.f32 %v724_v7 }
 0x2b6   :  { %1890 = vrcp.f32 %v766_v8  ;;  %v802_v9 = vpop.f32.mrf.mxu2  ;;  %v826_v10 = vpop.f32.mrf.mxu3  ;;  %v778_v22 = vand.u32 2147483648, %v766_v8  ;;  %v776_v26 = vand.u32 2147483647, %v766_v8  ;;  %vm772_vm13 = vweird.f32 %v766_v8 }
 0x2b7   :  { %v737_v29 = vor.u32 1.1754944e-38, %v736_v21  ;;  %vm735_vm2 = vcmp.eq.f32.partialorder %v734_v24, 8.507059e+37 }
 0x2b8   :  { %v779_v32 = vor.u32 1.1754944e-38, %v778_v22  ;;  %vm777_vm3 = vcmp.eq.f32.partialorder %v776_v26, 8.507059e+37 }
 0x2b9   :  { %v1887_v11 = vpop.eup %1886 }
 0x2ba   :  { %v832_v13 = vadd.f32 1.0, %v1887_v11 }
 0x2bb   :  { %v1889_v14 = vpop.eup %1888 }
 0x2bc   :  { %v1891_v16 = vpop.eup %1890  ;;  %v726_v17 = vmul.f32 %v1889_v14, %v724_v7  ;;  %1892 = vrcp.f32 %v832_v13  ;;  %vm731_vm10 = vweird.f32 %v1889_v14  ;;  %v844_v47 = vand.u32 2147483648, %v832_v13 }
 0x2bd   :  { %v768_v18 = vmul.f32 %v1891_v16, %v766_v8  ;;  %1894 = vtanh.f32 %v804_v15  ;;  %vm773_vm11 = vweird.f32 %v1891_v16  ;;  %vm732_vm15 = vmor %vm730_vm12, %vm731_vm10  ;;  %vm838_vm5 = vweird.f32 %v832_v13 }
 0x2be   :  { %v727_v19 = vsub.f32 1.0, %v726_v17  ;;  %vm774_vm0 = vmor %vm772_vm13, %vm773_vm11  ;;  %v842_v36 = vand.u32 2147483647, %v832_v13  ;;  %v845_v49 = vor.u32 1.1754944e-38, %v844_v47 }
 0x2bf   :  { %v769_v20 = vsub.f32 1.0, %v768_v18 }
 0x2c0   :  { %v728_v23 = vmul.f32 %v1889_v14, %v727_v19  ;;  %vm843_vm7 = vcmp.eq.f32.partialorder %v842_v36, 8.507059e+37 }
 0x2c1   :  { %v770_v25 = vmul.f32 %v1891_v16, %v769_v20 }
 0x2c2   :  { %v1893_v27 = vpop.eup %1892  ;;  %v729_v28 = vadd.f32 %v1889_v14, %v728_v23 }
 0x2c3   :  { %v771_v30 = vadd.f32 %v1891_v16, %v770_v25  ;;  %v834_v31 = vmul.f32 %v1893_v27, %v832_v13  ;;  %v1895_v34 = vpop.eup %1894  ;;  %vm839_vm4 = vweird.f32 %v1893_v27 }
 0x2c4   :  { %v733_v33 = vsel %vm732_vm15, %v1889_v14, %v729_v28  ;;  %vm840_vm6 = vmor %vm838_vm5, %vm839_vm4  ;;  %v943_v14 = vld [vmem:[#allocation4 + $0x8] sm:$0x3] }
 0x2c5   :  { %v738_v35 = vsel %vm735_vm2, %v737_v29, %v733_v33  ;;  %v775_v37 = vsel %vm774_vm0, %v1891_v16, %v771_v30  ;;  %v835_v38 = vsub.f32 1.0, %v834_v31 }
 0x2c6   :  { %v780_v40 = vsel %vm777_vm3, %v779_v32, %v775_v37  ;;  %v849_v41 = vmul.f32 %v1895_v34, %v738_v35 }
 0x2c7   :  { %v848_v43 = vmul.f32 %v780_v40, %v2128_v42  ;;  %v836_v44 = vmul.f32 %v1893_v27, %v835_v38 }
 0x2c9   :  { %v2152_v45 = vadd.f32 %v849_v41, %v848_v43  ;;  %v837_v46 = vadd.f32 %v1893_v27, %v836_v44 }
 0x2cb   :  { %1896 = vtanh.f32 %v2152_v45  ;;  %v841_v48 = vsel %vm840_vm6, %v1893_v27, %v837_v46 }
 0x2cc   :  { %v846_v50 = vsel %vm843_vm7, %v845_v49, %v841_v48 }
 0x2d1   :  { %v1897_v39 = vpop.eup %1896 }
 0x2d2   :  { %v852_v51 = vmul.f32 %v1897_v39, %v846_v50 }
 0x2d4   :  { %1668 = vst.msk [vmem:[%s2244_s4 + $0x6] sm:$0x3] %vm370_vm14, %v852_v51  ;;  %v855_v42 = vpack.c.bf16 %v852_v51, %v852_v51 }
 0x2d6   :  { %1673 = vmatmul.msk.bf16.vlgmr.msrb.gmra.mxu0 %vm92_vm1, %v855_v42  ;;  %1681 = vmatmul.msk.bf16.vlgmr.msrb.gmra.mxu1 %vm92_vm1, %v855_v42 }
 0x2d7   :  { %1689 = vmatmul.msk.bf16.vlgmr.msrb.gmra.mxu2 %vm92_vm1, %v855_v42  ;;  %1696 = vmatmul.msk.bf16.vlgmr.msrb.gmra.mxu3 %vm92_vm1, %v855_v42 }
 0x2d8   :  { %1197 = vmatpush.bf16.msrb.mxu0 %v1821_v62  ;;  %1239 = vmatpush.bf16.msrb.mxu1 %v1822_v63 }
 0x353   :  { %v877_v53 = vpop.f32.mrf.mxu0  ;;  %v919_v55 = vpop.f32.mrf.mxu1 }
 0x354   :  { %v881_v56 = vadd.f32 %v877_v53, %v856_v52  ;;  %v923_v57 = vadd.f32 %v919_v55, %v901_v54  ;;  %v1017_v54 = vld [vmem:[#allocation2 + $0xa] sm:$0x3] }
 0x356   :  { %v1674_v58 = vmul.f32 -1.442695, %v881_v56  ;;  %v1682_v59 = vmul.f32 -1.442695, %v923_v57  ;;  %v1062_v56 = vld [vmem:[#allocation3 + $0xa] sm:$0x3] }
 0x358   :  { %1898 = vpow2.f32 %v1674_v58 }
 0x359   :  { %1900 = vpow2.f32 %v1682_v59 }
 0x35a   :  { %v961_v0 = vpop.f32.mrf.mxu2  ;;  %v985_v2 = vpop.f32.mrf.mxu3 }
 0x35b   :  { %v989_v3 = vadd.f32 %v985_v2, %v967_v1  ;;  %v879_v4 = vpop.f32.mrf.mxu0  ;;  %v921_v5 = vpop.f32.mrf.mxu1  ;;  %v965_v17 = vadd.f32 %v961_v0, %v943_v14  ;;  %v1824_v0 = vld [vmem:[%s2242_s2 + $0x18] sm:$0xff]  ;;  %v1823_v1 = vld [vmem:[%s2242_s2 + $0x10] sm:$0xff] }
 0x35c   :  { %1305 = vmatpush.bf16.msrb.mxu3 %v1824_v0  ;;  %1281 = vmatpush.bf16.msrb.mxu2 %v1823_v1  ;;  %v1825_v0 = vld [vmem:[%s2242_s2] sm:$0xff]  ;;  %v1826_v1 = vld [vmem:[%s2242_s2 + $0x8] sm:$0xff] }
 0x35d   :  { %v1697_v6 = vmul.f32 -1.442695, %v989_v3  ;;  %v1128_v3 = vld [vmem:[#allocation5 + $0xa] sm:$0x3] }
 0x35e   :  { %v1899_v7 = vpop.eup %1898 }
 0x35f   :  { %v1901_v8 = vpop.eup %1900  ;;  %v885_v9 = vadd.f32 1.0, %v1899_v7  ;;  %1902 = vpow2.f32 %v1697_v6 }
 0x360   :  { %v927_v10 = vadd.f32 1.0, %v1901_v8 }
 0x361   :  { %1904 = vrcp.f32 %v885_v9  ;;  %v897_v23 = vand.u32 2147483648, %v885_v9  ;;  %v895_v26 = vand.u32 2147483647, %v885_v9  ;;  %vm891_vm10 = vweird.f32 %v885_v9 }
 0x362   :  { %1906 = vrcp.f32 %v927_v10  ;;  %v963_v11 = vpop.f32.mrf.mxu2  ;;  %v987_v12 = vpop.f32.mrf.mxu3  ;;  %v939_v24 = vand.u32 2147483648, %v927_v10  ;;  %v937_v28 = vand.u32 2147483647, %v927_v10  ;;  %vm933_vm11 = vweird.f32 %v927_v10 }
 0x363   :  { %v898_v31 = vor.u32 1.1754944e-38, %v897_v23  ;;  %vm896_vm15 = vcmp.eq.f32.partialorder %v895_v26, 8.507059e+37 }
 0x364   :  { %v940_v34 = vor.u32 1.1754944e-38, %v939_v24  ;;  %vm938_vm0 = vcmp.eq.f32.partialorder %v937_v28, 8.507059e+37 }
 0x365   :  { %v1903_v13 = vpop.eup %1902 }
 0x366   :  { %v993_v15 = vadd.f32 1.0, %v1903_v13 }
 0x367   :  { %v1905_v16 = vpop.eup %1904 }
 0x368   :  { %v1907_v18 = vpop.eup %1906  ;;  %v887_v19 = vmul.f32 %v1905_v16, %v885_v9  ;;  %1908 = vrcp.f32 %v993_v15  ;;  %vm892_vm8 = vweird.f32 %v1905_v16  ;;  %v1005_v49 = vand.u32 2147483648, %v993_v15 }
 0x369   :  { %v929_v20 = vmul.f32 %v1907_v18, %v927_v10  ;;  %1910 = vtanh.f32 %v965_v17  ;;  %vm934_vm9 = vweird.f32 %v1907_v18  ;;  %vm893_vm12 = vmor %vm891_vm10, %vm892_vm8  ;;  %vm999_vm3 = vweird.f32 %v993_v15 }
 0x36a   :  { %v888_v21 = vsub.f32 1.0, %v887_v19  ;;  %vm935_vm13 = vmor %vm933_vm11, %vm934_vm9  ;;  %v1003_v39 = vand.u32 2147483647, %v993_v15  ;;  %v1006_v51 = vor.u32 1.1754944e-38, %v1005_v49 }
 0x36b   :  { %v930_v22 = vsub.f32 1.0, %v929_v20 }
 0x36c   :  { %v889_v25 = vmul.f32 %v1905_v16, %v888_v21  ;;  %vm1004_vm5 = vcmp.eq.f32.partialorder %v1003_v39, 8.507059e+37 }
 0x36d   :  { %v931_v27 = vmul.f32 %v1907_v18, %v930_v22 }
 0x36e   :  { %v1909_v29 = vpop.eup %1908  ;;  %v890_v30 = vadd.f32 %v1905_v16, %v889_v25 }
 0x36f   :  { %v932_v32 = vadd.f32 %v1907_v18, %v931_v27  ;;  %v995_v33 = vmul.f32 %v1909_v29, %v993_v15  ;;  %v1911_v37 = vpop.eup %1910  ;;  %vm1000_vm2 = vweird.f32 %v1909_v29 }
 0x370   :  { %v894_v35 = vsel %vm893_vm12, %v1905_v16, %v890_v30  ;;  %vm1001_vm4 = vmor %vm999_vm3, %vm1000_vm2  ;;  %v1104_v16 = vld [vmem:[#allocation4 + $0xa] sm:$0x3] }
 0x371   :  { %v899_v38 = vsel %vm896_vm15, %v898_v31, %v894_v35  ;;  %v936_v40 = vsel %vm935_vm13, %v1907_v18, %v932_v32  ;;  %v996_v41 = vsub.f32 1.0, %v995_v33 }
 0x372   :  { %v941_v43 = vsel %vm938_vm0, %v940_v34, %v936_v40  ;;  %v1010_v44 = vmul.f32 %v1911_v37, %v899_v38 }
 0x373   :  { %v1009_v46 = vmul.f32 %v941_v43, %v2152_v45  ;;  %v997_v47 = vmul.f32 %v1909_v29, %v996_v41 }
 0x375   :  { %v2176_v36 = vadd.f32 %v1010_v44, %v1009_v46  ;;  %v998_v48 = vadd.f32 %v1909_v29, %v997_v47 }
 0x377   :  { %1912 = vtanh.f32 %v2176_v36  ;;  %v1002_v50 = vsel %vm1001_vm4, %v1909_v29, %v998_v48 }
 0x378   :  { %v1007_v52 = vsel %vm1004_vm5, %v1006_v51, %v1002_v50 }
 0x37d   :  { %v1913_v42 = vpop.eup %1912 }
 0x37e   :  { %v1013_v53 = vmul.f32 %v1913_v42, %v1007_v52 }
 0x380   :  { %1698 = vst.msk [vmem:[%s2244_s4 + $0x8] sm:$0x3] %vm370_vm14, %v1013_v53  ;;  %v1016_v45 = vpack.c.bf16 %v1013_v53, %v1013_v53 }
 0x382   :  { %1703 = vmatmul.msk.bf16.vlgmr.msra.gmra.mxu0 %vm92_vm1, %v1016_v45  ;;  %1711 = vmatmul.msk.bf16.vlgmr.msra.gmra.mxu1 %vm92_vm1, %v1016_v45 }
 0x383   :  { %1719 = vmatmul.msk.bf16.vlgmr.msra.gmra.mxu2 %vm92_vm1, %v1016_v45  ;;  %1726 = vmatmul.msk.bf16.vlgmr.msra.gmra.mxu3 %vm92_vm1, %v1016_v45 }
 0x384   :  { %1358 = vmatpush.bf16.msra.mxu0 %v1825_v0  ;;  %1400 = vmatpush.bf16.msra.mxu1 %v1826_v1 }
 0x3ff   :  { %v1038_v55 = vpop.f32.mrf.mxu0  ;;  %v1080_v57 = vpop.f32.mrf.mxu1 }
 0x400   :  { %v1042_v58 = vadd.f32 %v1038_v55, %v1017_v54  ;;  %v1084_v59 = vadd.f32 %v1080_v57, %v1062_v56  ;;  %v1178_v56 = vld [vmem:[#allocation2 + $0xc] sm:$0x3] }
 0x402   :  { %v1704_v60 = vmul.f32 -1.442695, %v1042_v58  ;;  %v1712_v61 = vmul.f32 -1.442695, %v1084_v59  ;;  %v1223_v58 = vld [vmem:[#allocation3 + $0xc] sm:$0x3] }
 0x404   :  { %1914 = vpow2.f32 %v1704_v60 }
 0x405   :  { %1916 = vpow2.f32 %v1712_v61 }
 0x406   :  { %v1122_v2 = vpop.f32.mrf.mxu2  ;;  %v1146_v4 = vpop.f32.mrf.mxu3 }
 0x407   :  { %v1150_v5 = vadd.f32 %v1146_v4, %v1128_v3  ;;  %v1040_v6 = vpop.f32.mrf.mxu0  ;;  %v1082_v7 = vpop.f32.mrf.mxu1  ;;  %v1126_v19 = vadd.f32 %v1122_v2, %v1104_v16  ;;  %v1828_v2 = vld [vmem:[%s2242_s2 + $0x18] sm:$0xff]  ;;  %v1827_v3 = vld [vmem:[%s2242_s2 + $0x10] sm:$0xff] }
 0x408   :  { %1466 = vmatpush.bf16.msra.mxu3 %v1828_v2  ;;  %1442 = vmatpush.bf16.msra.mxu2 %v1827_v3  ;;  %v1450_v3 = vld [vmem:[#allocation5 + $0xe] sm:$0x3] }
 0x409   :  { %v1727_v8 = vmul.f32 -1.442695, %v1150_v5  ;;  %v1289_v5 = vld [vmem:[#allocation5 + $0xc] sm:$0x3] }
 0x40a   :  { %v1915_v9 = vpop.eup %1914 }
 0x40b   :  { %v1917_v10 = vpop.eup %1916  ;;  %v1046_v11 = vadd.f32 1.0, %v1915_v9  ;;  %1918 = vpow2.f32 %v1727_v8 }
 0x40c   :  { %v1088_v12 = vadd.f32 1.0, %v1917_v10 }
 0x40d   :  { %1920 = vrcp.f32 %v1046_v11  ;;  %v1058_v25 = vand.u32 2147483648, %v1046_v11  ;;  %v1056_v28 = vand.u32 2147483647, %v1046_v11  ;;  %vm1052_vm8 = vweird.f32 %v1046_v11 }
 0x40e   :  { %1922 = vrcp.f32 %v1088_v12  ;;  %v1124_v13 = vpop.f32.mrf.mxu2  ;;  %v1148_v14 = vpop.f32.mrf.mxu3  ;;  %v1100_v26 = vand.u32 2147483648, %v1088_v12  ;;  %v1098_v30 = vand.u32 2147483647, %v1088_v12  ;;  %vm1094_vm9 = vweird.f32 %v1088_v12 }
 0x40f   :  { %v1059_v33 = vor.u32 1.1754944e-38, %v1058_v25  ;;  %vm1057_vm12 = vcmp.eq.f32.partialorder %v1056_v28, 8.507059e+37 }
 0x410   :  { %v1101_v37 = vor.u32 1.1754944e-38, %v1100_v26  ;;  %vm1099_vm13 = vcmp.eq.f32.partialorder %v1098_v30, 8.507059e+37 }
 0x411   :  { %v1919_v15 = vpop.eup %1918 }
 0x412   :  { %v1154_v17 = vadd.f32 1.0, %v1919_v15 }
 0x413   :  { %v1921_v18 = vpop.eup %1920 }
 0x414   :  { %v1923_v20 = vpop.eup %1922  ;;  %v1048_v21 = vmul.f32 %v1921_v18, %v1046_v11  ;;  %1924 = vrcp.f32 %v1154_v17  ;;  %vm1053_vm6 = vweird.f32 %v1921_v18  ;;  %v1166_v51 = vand.u32 2147483648, %v1154_v17 }
 0x415   :  { %v1090_v22 = vmul.f32 %v1923_v20, %v1088_v12  ;;  %1926 = vtanh.f32 %v1126_v19  ;;  %vm1095_vm7 = vweird.f32 %v1923_v20  ;;  %vm1054_vm10 = vmor %vm1052_vm8, %vm1053_vm6  ;;  %vm1160_vm0 = vweird.f32 %v1154_v17 }
 0x416   :  { %v1049_v23 = vsub.f32 1.0, %v1048_v21  ;;  %vm1096_vm11 = vmor %vm1094_vm9, %vm1095_vm7  ;;  %v1164_v42 = vand.u32 2147483647, %v1154_v17  ;;  %v1167_v53 = vor.u32 1.1754944e-38, %v1166_v51 }
 0x417   :  { %v1091_v24 = vsub.f32 1.0, %v1090_v22 }
 0x418   :  { %v1050_v27 = vmul.f32 %v1921_v18, %v1049_v23  ;;  %vm1165_vm3 = vcmp.eq.f32.partialorder %v1164_v42, 8.507059e+37 }
 0x419   :  { %v1092_v29 = vmul.f32 %v1923_v20, %v1091_v24 }
 0x41a   :  { %v1925_v31 = vpop.eup %1924  ;;  %v1051_v32 = vadd.f32 %v1921_v18, %v1050_v27 }
 0x41b   :  { %v1093_v34 = vadd.f32 %v1923_v20, %v1092_v29  ;;  %v1156_v35 = vmul.f32 %v1925_v31, %v1154_v17  ;;  %v1927_v40 = vpop.eup %1926  ;;  %vm1161_vm15 = vweird.f32 %v1925_v31 }
 0x41c   :  { %v1055_v38 = vsel %vm1054_vm10, %v1921_v18, %v1051_v32  ;;  %vm1162_vm2 = vmor %vm1160_vm0, %vm1161_vm15  ;;  %v1265_v18 = vld [vmem:[#allocation4 + $0xc] sm:$0x3] }
 0x41d   :  { %v1060_v41 = vsel %vm1057_vm12, %v1059_v33, %v1055_v38  ;;  %v1097_v43 = vsel %vm1096_vm11, %v1923_v20, %v1093_v34  ;;  %v1157_v44 = vsub.f32 1.0, %v1156_v35 }
 0x41e   :  { %v1102_v46 = vsel %vm1099_vm13, %v1101_v37, %v1097_v43  ;;  %v1171_v47 = vmul.f32 %v1927_v40, %v1060_v41 }
 0x41f   :  { %v1170_v48 = vmul.f32 %v1102_v46, %v2176_v36  ;;  %v1158_v49 = vmul.f32 %v1925_v31, %v1157_v44 }
 0x421   :  { %v2200_v39 = vadd.f32 %v1171_v47, %v1170_v48  ;;  %v1159_v50 = vadd.f32 %v1925_v31, %v1158_v49 }
 0x423   :  { %1928 = vtanh.f32 %v2200_v39  ;;  %v1163_v52 = vsel %vm1162_vm2, %v1925_v31, %v1159_v50 }
 0x424   :  { %v1168_v54 = vsel %vm1165_vm3, %v1167_v53, %v1163_v52 }
 0x429   :  { %v1929_v45 = vpop.eup %1928 }
 0x42a   :  { %v1174_v55 = vmul.f32 %v1929_v45, %v1168_v54 }
 0x42c   :  { %1728 = vst.msk [vmem:[%s2244_s4 + $0xa] sm:$0x3] %vm370_vm14, %v1174_v55  ;;  %v1177_v36 = vpack.c.bf16 %v1174_v55, %v1174_v55 }
 0x42e   :  { %1733 = vmatmul.msk.bf16.vlgmr.msrb.gmra.mxu0 %vm92_vm1, %v1177_v36  ;;  %1741 = vmatmul.msk.bf16.vlgmr.msrb.gmra.mxu1 %vm92_vm1, %v1177_v36 }
 0x42f   :  { %1749 = vmatmul.msk.bf16.vlgmr.msrb.gmra.mxu2 %vm92_vm1, %v1177_v36  ;;  %1756 = vmatmul.msk.bf16.vlgmr.msrb.gmra.mxu3 %vm92_vm1, %v1177_v36 }
 0x4ab   :  { %v1199_v57 = vpop.f32.mrf.mxu0  ;;  %v1241_v59 = vpop.f32.mrf.mxu1 }
 0x4ac   :  { %v1203_v60 = vadd.f32 %v1199_v57, %v1178_v56  ;;  %v1245_v61 = vadd.f32 %v1241_v59, %v1223_v58  ;;  %v1339_v58 = vld [vmem:[#allocation2 + $0xe] sm:$0x3] }
 0x4ae   :  { %v1734_v62 = vmul.f32 -1.442695, %v1203_v60  ;;  %v1742_v63 = vmul.f32 -1.442695, %v1245_v61  ;;  %v1384_v60 = vld [vmem:[#allocation3 + $0xe] sm:$0x3] }
 0x4b0   :  { %1930 = vpow2.f32 %v1734_v62 }
 0x4b1   :  { %1932 = vpow2.f32 %v1742_v63 }
 0x4b2   :  { %v1283_v4 = vpop.f32.mrf.mxu2  ;;  %v1307_v6 = vpop.f32.mrf.mxu3 }
 0x4b3   :  { %v1311_v7 = vadd.f32 %v1307_v6, %v1289_v5  ;;  %v1201_v8 = vpop.f32.mrf.mxu0  ;;  %v1243_v9 = vpop.f32.mrf.mxu1  ;;  %v1287_v21 = vadd.f32 %v1283_v4, %v1265_v18 }
 0x4b5   :  { %v1757_v10 = vmul.f32 -1.442695, %v1311_v7 }
 0x4b6   :  { %v1931_v11 = vpop.eup %1930 }
 0x4b7   :  { %v1933_v12 = vpop.eup %1932  ;;  %v1207_v13 = vadd.f32 1.0, %v1931_v11  ;;  %1934 = vpow2.f32 %v1757_v10 }
 0x4b8   :  { %v1249_v14 = vadd.f32 1.0, %v1933_v12 }
 0x4b9   :  { %1936 = vrcp.f32 %v1207_v13  ;;  %v1219_v27 = vand.u32 2147483648, %v1207_v13  ;;  %v1217_v30 = vand.u32 2147483647, %v1207_v13  ;;  %vm1213_vm6 = vweird.f32 %v1207_v13 }
 0x4ba   :  { %1938 = vrcp.f32 %v1249_v14  ;;  %v1285_v15 = vpop.f32.mrf.mxu2  ;;  %v1309_v16 = vpop.f32.mrf.mxu3  ;;  %v1261_v28 = vand.u32 2147483648, %v1249_v14  ;;  %v1259_v32 = vand.u32 2147483647, %v1249_v14  ;;  %vm1255_vm7 = vweird.f32 %v1249_v14 }
 0x4bb   :  { %v1220_v35 = vor.u32 1.1754944e-38, %v1219_v27  ;;  %vm1218_vm10 = vcmp.eq.f32.partialorder %v1217_v30, 8.507059e+37  ;;  %v1426_v16 = vld [vmem:[#allocation4 + $0xe] sm:$0x3] }
 0x4bc   :  { %v1262_v40 = vor.u32 1.1754944e-38, %v1261_v28  ;;  %vm1260_vm11 = vcmp.eq.f32.partialorder %v1259_v32, 8.507059e+37 }
 0x4bd   :  { %v1935_v17 = vpop.eup %1934 }
 0x4be   :  { %v1315_v19 = vadd.f32 1.0, %v1935_v17 }
 0x4bf   :  { %v1937_v20 = vpop.eup %1936 }
 0x4c0   :  { %v1939_v22 = vpop.eup %1938  ;;  %v1209_v23 = vmul.f32 %v1937_v20, %v1207_v13  ;;  %1940 = vrcp.f32 %v1315_v19  ;;  %vm1214_vm4 = vweird.f32 %v1937_v20  ;;  %v1327_v53 = vand.u32 2147483648, %v1315_v19 }
 0x4c1   :  { %v1251_v24 = vmul.f32 %v1939_v22, %v1249_v14  ;;  %1942 = vtanh.f32 %v1287_v21  ;;  %vm1256_vm5 = vweird.f32 %v1939_v22  ;;  %vm1215_vm8 = vmor %vm1213_vm6, %vm1214_vm4  ;;  %vm1321_vm13 = vweird.f32 %v1315_v19 }
 0x4c2   :  { %v1210_v25 = vsub.f32 1.0, %v1209_v23  ;;  %vm1257_vm9 = vmor %vm1255_vm7, %vm1256_vm5  ;;  %v1325_v45 = vand.u32 2147483647, %v1315_v19  ;;  %v1328_v55 = vor.u32 1.1754944e-38, %v1327_v53 }
 0x4c3   :  { %v1252_v26 = vsub.f32 1.0, %v1251_v24 }
 0x4c4   :  { %v1211_v29 = vmul.f32 %v1937_v20, %v1210_v25  ;;  %vm1326_vm0 = vcmp.eq.f32.partialorder %v1325_v45, 8.507059e+37 }
 0x4c5   :  { %v1253_v31 = vmul.f32 %v1939_v22, %v1252_v26 }
 0x4c6   :  { %v1941_v33 = vpop.eup %1940  ;;  %v1212_v34 = vadd.f32 %v1937_v20, %v1211_v29 }
 0x4c7   :  { %v1254_v37 = vadd.f32 %v1939_v22, %v1253_v31  ;;  %v1317_v38 = vmul.f32 %v1941_v33, %v1315_v19  ;;  %v1943_v43 = vpop.eup %1942  ;;  %vm1322_vm12 = vweird.f32 %v1941_v33 }
 0x4c8   :  { %v1216_v41 = vsel %vm1215_vm8, %v1937_v20, %v1212_v34  ;;  %vm1323_vm15 = vmor %vm1321_vm13, %vm1322_vm12 }
 0x4c9   :  { %v1221_v44 = vsel %vm1218_vm10, %v1220_v35, %v1216_v41  ;;  %v1258_v46 = vsel %vm1257_vm9, %v1939_v22, %v1254_v37  ;;  %v1318_v47 = vsub.f32 1.0, %v1317_v38 }
 0x4ca   :  { %v1263_v48 = vsel %vm1260_vm11, %v1262_v40, %v1258_v46  ;;  %v1332_v49 = vmul.f32 %v1943_v43, %v1221_v44 }
 0x4cb   :  { %v1331_v50 = vmul.f32 %v1263_v48, %v2200_v39  ;;  %v1319_v51 = vmul.f32 %v1941_v33, %v1318_v47 }
 0x4cd   :  { %v2224_v42 = vadd.f32 %v1332_v49, %v1331_v50  ;;  %v1320_v52 = vadd.f32 %v1941_v33, %v1319_v51 }
 0x4cf   :  { %1944 = vtanh.f32 %v2224_v42  ;;  %v1324_v54 = vsel %vm1323_vm15, %v1941_v33, %v1320_v52 }
 0x4d0   :  { %v1329_v56 = vsel %vm1326_vm0, %v1328_v55, %v1324_v54 }
 0x4d5   :  { %v1945_v36 = vpop.eup %1944 }
 0x4d6   :  { %v1335_v57 = vmul.f32 %v1945_v36, %v1329_v56 }
 0x4d8   :  { %1758 = vst.msk [vmem:[%s2244_s4 + $0xc] sm:$0x3] %vm370_vm14, %v1335_v57  ;;  %v1338_v39 = vpack.c.bf16 %v1335_v57, %v1335_v57 }
 0x4da   :  { %1763 = vmatmul.msk.bf16.vlgmr.msra.gmra.mxu0 %vm92_vm1, %v1338_v39  ;;  %1771 = vmatmul.msk.bf16.vlgmr.msra.gmra.mxu1 %vm92_vm1, %v1338_v39 }
 0x4db   :  { %1779 = vmatmul.msk.bf16.vlgmr.msra.gmra.mxu2 %vm92_vm1, %v1338_v39  ;;  %1786 = vmatmul.msk.bf16.vlgmr.msra.gmra.mxu3 %vm92_vm1, %v1338_v39 }
 0x557   :  { %v1360_v59 = vpop.f32.mrf.mxu0  ;;  %v1402_v61 = vpop.f32.mrf.mxu1 }
 0x558   :  { %v1364_v62 = vadd.f32 %v1360_v59, %v1339_v58  ;;  %v1406_v63 = vadd.f32 %v1402_v61, %v1384_v60 }
 0x55a   :  { %v1764_v0 = vmul.f32 -1.442695, %v1364_v62  ;;  %v1772_v1 = vmul.f32 -1.442695, %v1406_v63 }
 0x55c   :  { %1946 = vpow2.f32 %v1764_v0 }
 0x55d   :  { %1948 = vpow2.f32 %v1772_v1 }
 0x55e   :  { %v1444_v2 = vpop.f32.mrf.mxu2  ;;  %v1468_v4 = vpop.f32.mrf.mxu3 }
 0x55f   :  { %v1472_v5 = vadd.f32 %v1468_v4, %v1450_v3  ;;  %v1362_v6 = vpop.f32.mrf.mxu0  ;;  %v1404_v7 = vpop.f32.mrf.mxu1  ;;  %v1448_v19 = vadd.f32 %v1444_v2, %v1426_v16 }
 0x561   :  { %v1787_v8 = vmul.f32 -1.442695, %v1472_v5 }
 0x562   :  { %v1947_v9 = vpop.eup %1946 }
 0x563   :  { %v1949_v10 = vpop.eup %1948  ;;  %v1368_v11 = vadd.f32 1.0, %v1947_v9  ;;  %1950 = vpow2.f32 %v1787_v8 }
 0x564   :  { %v1410_v12 = vadd.f32 1.0, %v1949_v10 }
 0x565   :  { %1952 = vrcp.f32 %v1368_v11  ;;  %v1380_v25 = vand.u32 2147483648, %v1368_v11  ;;  %v1378_v28 = vand.u32 2147483647, %v1368_v11  ;;  %vm1374_vm3 = vweird.f32 %v1368_v11 }
 0x566   :  { %1954 = vrcp.f32 %v1410_v12  ;;  %v1446_v13 = vpop.f32.mrf.mxu2  ;;  %v1470_v14 = vpop.f32.mrf.mxu3  ;;  %v1422_v26 = vand.u32 2147483648, %v1410_v12  ;;  %v1420_v30 = vand.u32 2147483647, %v1410_v12  ;;  %vm1416_vm4 = vweird.f32 %v1410_v12 }
 0x567   :  { %v1381_v33 = vor.u32 1.1754944e-38, %v1380_v25  ;;  %vm1379_vm7 = vcmp.eq.f32.partialorder %v1378_v28, 8.507059e+37 }
 0x568   :  { %v1423_v37 = vor.u32 1.1754944e-38, %v1422_v26  ;;  %vm1421_vm8 = vcmp.eq.f32.partialorder %v1420_v30, 8.507059e+37 }
 0x569   :  { %v1951_v15 = vpop.eup %1950 }
 0x56a   :  { %v1476_v17 = vadd.f32 1.0, %v1951_v15 }
 0x56b   :  { %v1953_v18 = vpop.eup %1952 }
 0x56c   :  { %v1955_v20 = vpop.eup %1954  ;;  %v1370_v21 = vmul.f32 %v1953_v18, %v1368_v11  ;;  %1956 = vrcp.f32 %v1476_v17  ;;  %vm1375_vm1 = vweird.f32 %v1953_v18  ;;  %v1488_v52 = vand.u32 2147483648, %v1476_v17 }
 0x56d   :  { %v1412_v22 = vmul.f32 %v1955_v20, %v1410_v12  ;;  %1958 = vtanh.f32 %v1448_v19  ;;  %vm1417_vm2 = vweird.f32 %v1955_v20  ;;  %vm1376_vm5 = vmor %vm1374_vm3, %vm1375_vm1  ;;  %vm1482_vm10 = vweird.f32 %v1476_v17 }
 0x56e   :  { %v1371_v23 = vsub.f32 1.0, %v1370_v21  ;;  %vm1418_vm6 = vmor %vm1416_vm4, %vm1417_vm2  ;;  %v1486_v53 = vand.u32 2147483647, %v1476_v17  ;;  %v1489_v54 = vor.u32 1.1754944e-38, %v1488_v52 }
 0x56f   :  { %v1413_v24 = vsub.f32 1.0, %v1412_v22 }
 0x570   :  { %v1372_v27 = vmul.f32 %v1953_v18, %v1371_v23  ;;  %vm1487_vm12 = vcmp.eq.f32.partialorder %v1486_v53, 8.507059e+37 }
 0x571   :  { %v1414_v29 = vmul.f32 %v1955_v20, %v1413_v24 }
 0x572   :  { %v1957_v31 = vpop.eup %1956  ;;  %v1373_v32 = vadd.f32 %v1953_v18, %v1372_v27 }
 0x573   :  { %v1415_v34 = vadd.f32 %v1955_v20, %v1414_v29  ;;  %v1478_v35 = vmul.f32 %v1957_v31, %v1476_v17  ;;  %v1959_v40 = vpop.eup %1958  ;;  %vm1483_vm9 = vweird.f32 %v1957_v31 }
 0x574   :  { %v1377_v38 = vsel %vm1376_vm5, %v1953_v18, %v1373_v32  ;;  %vm1484_vm11 = vmor %vm1482_vm10, %vm1483_vm9 }
 0x575   :  { %v1382_v41 = vsel %vm1379_vm7, %v1381_v33, %v1377_v38  ;;  %v1419_v43 = vsel %vm1418_vm6, %v1955_v20, %v1415_v34  ;;  %v1479_v44 = vsub.f32 1.0, %v1478_v35 }
 0x576   :  { %v1424_v46 = vsel %vm1421_vm8, %v1423_v37, %v1419_v43  ;;  %v1493_v47 = vmul.f32 %v1959_v40, %v1382_v41 }
 0x577   :  { %v1492_v48 = vmul.f32 %v1424_v46, %v2224_v42  ;;  %v1480_v49 = vmul.f32 %v1957_v31, %v1479_v44 }
 0x579   :  { %v1494_v50 = vadd.f32 %v1493_v47, %v1492_v48  ;;  %v1481_v51 = vadd.f32 %v1957_v31, %v1480_v49 }
 0x57b   :  { %1960 = vtanh.f32 %v1494_v50  ;;  %v1485_v45 = vsel %vm1484_vm11, %v1957_v31, %v1481_v51 }
 0x57c   :  { %v1490_v36 = vsel %vm1487_vm12, %v1489_v54, %v1485_v45 }
 0x581   :  { %v1961_v55 = vpop.eup %1960 }
 0x582   :  { %v1496_v56 = vmul.f32 %v1961_v55, %v1490_v36 }
 0x584   :  { %1788 = vst.msk [vmem:[%s2244_s4 + $0xe] sm:$0x3] %vm370_vm14, %v1496_v56 }

// kernel: bert_lstm_classifier_forward.9
= control target key start
LH: loop header
LB: loop body
LE: loop exit
PB: predicated region body
PF: predicated region fallthrough
CT: control target
= control target key end

     0   :  { %vm66_vm0 = vcmask 130048   ;;  %v1903_v19 = vmov 0   ;;  %vm337_vm13 = vcmask 123904   ;;  %s2173_s1 = inlined_call_operand.vmem [shape: bf16[4,16,16], index: 1, kind: input, shape index: {}]   ;;  %s2174_s0 = inlined_call_operand.vmem [shape: f32[8,2,16], index: 0, kind: input, shape index: {}]   ;;  %s2175_s2 = inlined_call_operand.vmem [shape: bf16[4,16,16], index: 2, kind: input, shape index: {}]   ;;  %s2176_s3 = inlined_call_operand.vmem [shape: f32[4,1,16], index: 3, kind: input, shape index: {}]   ;;  %s2177_s4 = inlined_call_operand.vmem [shape: f32[8,2,16], index: 4, kind: output, shape index: {}]  }
   0x1   :  { %v1734_v0 = vld [vmem:[%s2173_s1] sm:$0xff]  ;;  %v1735_v1 = vld [vmem:[%s2173_s1 + $0x8] sm:$0xff]  ;;  %v1737_v2 = vld [vmem:[%s2173_s1 + $0x18] sm:$0xff] }
   0x2   :  { %v18_v3 = vld [vmem:[%s2174_s0] sm:$0x3]  ;;  %v19_v4 = vld [vmem:[%s2174_s0 + $0x2] sm:$0x3]  ;;  %77 = vmatpush.bf16.msra.mxu0 %v1734_v0  ;;  %107 = vmatpush.bf16.msra.mxu1 %v1735_v1  ;;  %v20_v5 = vld [vmem:[%s2174_s0 + $0x4] sm:$0x3] }
   0x3   :  { %v21_v6 = vld [vmem:[%s2174_s0 + $0x6] sm:$0x3]  ;;  %167 = vmatpush.bf16.msra.mxu3 %v1737_v2  ;;  %v22_v7 = vld [vmem:[%s2174_s0 + $0x8] sm:$0x3]  ;;  %v23_v8 = vld [vmem:[%s2174_s0 + $0xa] sm:$0x3] }
   0x4   :  { %34 = vst [vmem:[#allocation1] ss:$4 sm:$0xff] %v18_v3  ;;  %v24_v9 = vld [vmem:[%s2174_s0 + $0xc] sm:$0x3]  ;;  %v1738_v10 = vld [vmem:[%s2175_s2] sm:$0xff]  ;;  %v1736_v12 = vld [vmem:[%s2173_s1 + $0x10] sm:$0xff] }
   0x5   :  { %36 = vst [vmem:[#allocation1 + $0x1] ss:$4 sm:$0xff] %v19_v4  ;;  %v1739_v11 = vld [vmem:[%s2175_s2 + $0x8] sm:$0xff]  ;;  %v1741_v13 = vld [vmem:[%s2175_s2 + $0x18] sm:$0xff]  ;;  %v1740_v14 = vld [vmem:[%s2175_s2 + $0x10] sm:$0xff]  ;;  %137 = vmatpush.bf16.msra.mxu2 %v1736_v12 }
   0x6   :  { %38 = vst [vmem:[#allocation1 + $0x2] ss:$4 sm:$0xff] %v20_v5  ;;  %v25_v15 = vld [vmem:[%s2174_s0 + $0xe] sm:$0x3]  ;;  %195 = vmatpush.bf16.msrb.mxu0 %v1738_v10  ;;  %238 = vmatpush.bf16.msrb.mxu1 %v1739_v11  ;;  %v1771_v20 = vld [vmem:[%s2176_s3] ss:$0 sm:$0xff] }
   0x7   :  { %40 = vst [vmem:[#allocation1 + $0x3] ss:$4 sm:$0xff] %v21_v6  ;;  %306 = vmatpush.bf16.msrb.mxu3 %v1741_v13  ;;  %v1772_v21 = vld [vmem:[%s2176_s3 + $0x1] ss:$0 sm:$0xff]  ;;  %v1773_v26 = vld [vmem:[%s2176_s3 + $0x3] ss:$0 sm:$0xff] }
   0x8   :  { %42 = vst [vmem:[#allocation1 + $0x20] ss:$4 sm:$0xff] %v22_v7  ;;  %v1774_v27 = vld [vmem:[%s2176_s3 + $0x2] ss:$0 sm:$0xff]  ;;  %v1743_v49 = vld [vmem:[%s2175_s2 + $0x8] sm:$0xff]  ;;  %v1745_v51 = vld [vmem:[%s2175_s2 + $0x18] sm:$0xff] }
   0x9   :  { %44 = vst [vmem:[#allocation1 + $0x21] ss:$4 sm:$0xff] %v23_v8  ;;  %281 = vmatpush.bf16.msrb.mxu2 %v1740_v14  ;;  %v1742_v48 = vld [vmem:[%s2175_s2] sm:$0xff]  ;;  %v1744_v52 = vld [vmem:[%s2175_s2 + $0x10] sm:$0xff] }
   0xa   :  { %46 = vst [vmem:[#allocation1 + $0x22] ss:$4 sm:$0xff] %v24_v9 }
   0xb   :  { %48 = vst [vmem:[#allocation1 + $0x23] ss:$4 sm:$0xff] %v25_v15 }
   0xe   :  { %v49_v16 = vld.sshfl [vmem:[#allocation1] sm:$0xff pattern:$0x73625140] }
  0x12   :  { %v50_v17 = vld.sshfl [vmem:[#allocation1 + $0x20] sm:$0xff pattern:$0x73625140] }
  0x13   :  { %v53_v18 = vpack.c.bf16 %v50_v17, %v49_v16 }
  0x15   :  { %1474 = vmatmul.msk.bf16.vlgmr.msra.gmra.mxu0 %vm66_vm0, %v53_v18  ;;  %1482 = vmatmul.msk.bf16.vlgmr.msra.gmra.mxu1 %vm66_vm0, %v53_v18 }
  0x16   :  { %1498 = vmatmul.msk.bf16.vlgmr.msra.gmra.mxu3 %vm66_vm0, %v53_v18  ;;  %1490 = vmatmul.msk.bf16.vlgmr.msra.gmra.mxu2 %vm66_vm0, %v53_v18 }
  0x17   :  { %359 = vmatpush.bf16.msra.mxu0 %v1742_v48  ;;  %401 = vmatpush.bf16.msra.mxu1 %v1743_v49 }
  0x18   :  { %467 = vmatpush.bf16.msra.mxu3 %v1745_v51  ;;  %443 = vmatpush.bf16.msra.mxu2 %v1744_v52  ;;  %v1747_v51 = vld [vmem:[%s2175_s2 + $0x8] sm:$0xff]  ;;  %v1749_v52 = vld [vmem:[%s2175_s2 + $0x18] sm:$0xff] }
  0x25   :  { %196 = vmatmul.bf16.vlgmr.msrb.gmra.mxu0 %v1903_v19  ;;  %239 = vmatmul.bf16.vlgmr.msrb.gmra.mxu1 %v1903_v19 }
  0x26   :  { %307 = vmatmul.bf16.vlgmr.msrb.gmra.mxu3 %v1903_v19  ;;  %282 = vmatmul.bf16.vlgmr.msrb.gmra.mxu2 %v1903_v19 }
  0x27   :  { %562 = vmatpush.bf16.msrb.mxu1 %v1747_v51  ;;  %628 = vmatpush.bf16.msrb.mxu3 %v1749_v52  ;;  %v1750_v52 = vld [vmem:[%s2175_s2] sm:$0xff] }
  0x92   :  { %v79_v22 = vpop.f32.mrf.mxu0  ;;  %v109_v23 = vpop.f32.mrf.mxu1 }
  0x93   :  { %v80_v24 = vadd.f32 %v1771_v20, %v79_v22  ;;  %v110_v25 = vadd.f32 %v1772_v21, %v109_v23 }
  0x95   :  { %84 = vst.msk [vmem:[#allocation2] sm:$0xff] %vm66_vm0, %v80_v24 }
  0x96   :  { %114 = vst.msk [vmem:[#allocation3] sm:$0xff] %vm66_vm0, %v110_v25 }
  0x99   :  { %v169_v28 = vpop.f32.mrf.mxu3  ;;  %v139_v29 = vpop.f32.mrf.mxu2 }
  0x9a   :  { %v170_v30 = vadd.f32 %v1773_v26, %v169_v28  ;;  %v81_v31 = vpop.f32.mrf.mxu0  ;;  %v111_v32 = vpop.f32.mrf.mxu1  ;;  %v140_v35 = vadd.f32 %v1774_v27, %v139_v29 }
  0x9b   :  { %v82_v33 = vadd.f32 %v1771_v20, %v81_v31  ;;  %v112_v34 = vadd.f32 %v1772_v21, %v111_v32 }
  0x9c   :  { %174 = vst.msk [vmem:[#allocation5] sm:$0xff] %vm66_vm0, %v170_v30  ;;  %v176_v39 = vld [vmem:[#allocation2] sm:$0x3] }
  0x9d   :  { %85 = vst.msk [vmem:[#allocation2 + $0x8] sm:$0xff] %vm66_vm0, %v82_v33  ;;  %v221_v41 = vld [vmem:[#allocation3] sm:$0x3] }
  0x9e   :  { %115 = vst.msk [vmem:[#allocation3 + $0x8] sm:$0xff] %vm66_vm0, %v112_v34 }
  0x9f   :  { %144 = vst.msk [vmem:[#allocation4] sm:$0xff] %vm66_vm0, %v140_v35 }
  0xa1   :  { %v171_v36 = vpop.f32.mrf.mxu3  ;;  %v141_v37 = vpop.f32.mrf.mxu2 }
  0xa2   :  { %v172_v38 = vadd.f32 %v1773_v26, %v171_v36  ;;  %v197_v40 = vpop.f32.mrf.mxu0  ;;  %v240_v42 = vpop.f32.mrf.mxu1  ;;  %v142_v43 = vadd.f32 %v1774_v27, %v141_v37 }
  0xa3   :  { %v201_v44 = vadd.f32 %v197_v40, %v176_v39  ;;  %v244_v45 = vadd.f32 %v240_v42, %v221_v41  ;;  %v289_v50 = vld [vmem:[#allocation5] sm:$0x3]  ;;  %v340_v42 = vld [vmem:[#allocation2 + $0x2] sm:$0x3] }
  0xa4   :  { %175 = vst.msk [vmem:[#allocation5 + $0x8] sm:$0xff] %vm66_vm0, %v172_v38 }
  0xa5   :  { %v1503_v46 = vmul.f32 -1.442695, %v201_v44  ;;  %v1510_v47 = vmul.f32 -1.442695, %v244_v45  ;;  %145 = vst.msk [vmem:[#allocation4 + $0x8] sm:$0xff] %vm66_vm0, %v142_v43 }
  0xa6   :  { %v264_v1 = vld [vmem:[#allocation4] sm:$0x3]  ;;  %v385_v44 = vld [vmem:[#allocation3 + $0x2] sm:$0x3] }
  0xa7   :  { %1775 = vpow2.f32 %v1503_v46 }
  0xa8   :  { %1777 = vpow2.f32 %v1510_v47 }
  0xa9   :  { %v308_v53 = vpop.f32.mrf.mxu3  ;;  %v283_v54 = vpop.f32.mrf.mxu2 }
  0xaa   :  { %v312_v55 = vadd.f32 %v308_v53, %v289_v50  ;;  %v199_v56 = vpop.f32.mrf.mxu0  ;;  %v242_v57 = vpop.f32.mrf.mxu1  ;;  %v287_v5 = vadd.f32 %v283_v54, %v264_v1  ;;  %v1746_v50 = vld [vmem:[%s2175_s2] sm:$0xff]  ;;  %v1748_v53 = vld [vmem:[%s2175_s2 + $0x10] sm:$0xff] }
  0xab   :  { %520 = vmatpush.bf16.msrb.mxu0 %v1746_v50  ;;  %604 = vmatpush.bf16.msrb.mxu2 %v1748_v53  ;;  %v1751_v53 = vld [vmem:[%s2175_s2 + $0x8] sm:$0xff] }
  0xac   :  { %v1523_v58 = vmul.f32 -1.442695, %v312_v55  ;;  %v451_v55 = vld [vmem:[#allocation5 + $0x2] sm:$0x3] }
  0xad   :  { %v1776_v59 = vpop.eup %1775 }
  0xae   :  { %v1778_v60 = vpop.eup %1777  ;;  %v205_v61 = vadd.f32 1.0, %v1776_v59  ;;  %1779 = vpow2.f32 %v1523_v58 }
  0xaf   :  { %v248_v62 = vadd.f32 1.0, %v1778_v60 }
  0xb0   :  { %1781 = vrcp.f32 %v205_v61  ;;  %v217_v11 = vand.u32 2147483648, %v205_v61  ;;  %v215_v14 = vand.u32 2147483647, %v205_v61  ;;  %vm211_vm3 = vweird.f32 %v205_v61 }
  0xb1   :  { %1783 = vrcp.f32 %v248_v62  ;;  %v310_v63 = vpop.f32.mrf.mxu3  ;;  %v285_v0 = vpop.f32.mrf.mxu2  ;;  %v260_v12 = vand.u32 2147483648, %v248_v62  ;;  %v258_v16 = vand.u32 2147483647, %v248_v62  ;;  %vm254_vm4 = vweird.f32 %v248_v62 }
  0xb2   :  { %v218_v20 = vor.u32 1.1754944e-38, %v217_v11  ;;  %vm216_vm6 = vcmp.eq.f32.partialorder %v215_v14, 8.507059e+37 }
  0xb3   :  { %v261_v22 = vor.u32 1.1754944e-38, %v260_v12  ;;  %vm259_vm8 = vcmp.eq.f32.partialorder %v258_v16, 8.507059e+37 }
  0xb4   :  { %v1780_v2 = vpop.eup %1779 }
  0xb5   :  { %v316_v3 = vadd.f32 1.0, %v1780_v2 }
  0xb6   :  { %v1782_v4 = vpop.eup %1781 }
  0xb7   :  { %v1784_v6 = vpop.eup %1783  ;;  %v207_v7 = vmul.f32 %v1782_v4, %v205_v61  ;;  %1785 = vrcp.f32 %v316_v3  ;;  %vm212_vm1 = vweird.f32 %v1782_v4  ;;  %v328_v34 = vand.u32 2147483648, %v316_v3 }
  0xb8   :  { %v250_v8 = vmul.f32 %v1784_v6, %v248_v62  ;;  %1787 = vtanh.f32 %v287_v5  ;;  %vm255_vm2 = vweird.f32 %v1784_v6  ;;  %vm213_vm5 = vmor %vm211_vm3, %vm212_vm1  ;;  %vm322_vm10 = vweird.f32 %v316_v3 }
  0xb9   :  { %v208_v9 = vsub.f32 1.0, %v207_v7  ;;  %vm256_vm7 = vmor %vm254_vm4, %vm255_vm2  ;;  %v326_v35 = vand.u32 2147483647, %v316_v3  ;;  %v329_v37 = vor.u32 1.1754944e-38, %v328_v34 }
  0xba   :  { %v251_v10 = vsub.f32 1.0, %v250_v8 }
  0xbb   :  { %v209_v13 = vmul.f32 %v1782_v4, %v208_v9  ;;  %vm327_vm12 = vcmp.eq.f32.partialorder %v326_v35, 8.507059e+37 }
  0xbc   :  { %v252_v15 = vmul.f32 %v1784_v6, %v251_v10 }
  0xbd   :  { %v1786_v17 = vpop.eup %1785  ;;  %v210_v18 = vadd.f32 %v1782_v4, %v209_v13 }
  0xbe   :  { %v318_v19 = vmul.f32 %v1786_v17, %v316_v3  ;;  %v253_v21 = vadd.f32 %v1784_v6, %v252_v15  ;;  %v1788_v24 = vpop.eup %1787  ;;  %vm323_vm9 = vweird.f32 %v1786_v17 }
  0xbf   :  { %v214_v23 = vsel %vm213_vm5, %v1782_v4, %v210_v18  ;;  %vm324_vm11 = vmor %vm322_vm10, %vm323_vm9  ;;  %v427_v4 = vld [vmem:[#allocation4 + $0x2] sm:$0x3] }
  0xc0   :  { %v319_v25 = vsub.f32 1.0, %v318_v19  ;;  %v219_v26 = vsel %vm216_vm6, %v218_v20, %v214_v23  ;;  %v257_v27 = vsel %vm256_vm7, %v1784_v6, %v253_v21 }
  0xc1   :  { %v262_v28 = vsel %vm259_vm8, %v261_v22, %v257_v27  ;;  %v333_v29 = vmul.f32 %v1788_v24, %v219_v26 }
  0xc2   :  { %v320_v30 = vmul.f32 %v1786_v17, %v319_v25  ;;  %v332_v31 = vmul.f32 0.0, %v262_v28 }
  0xc4   :  { %v2013_v32 = vadd.f32 %v333_v29, %v332_v31  ;;  %v321_v33 = vadd.f32 %v1786_v17, %v320_v30 }
  0xc6   :  { %1789 = vtanh.f32 %v2013_v32  ;;  %v325_v36 = vsel %vm324_vm11, %v1786_v17, %v321_v33 }
  0xc7   :  { %v330_v39 = vsel %vm327_vm12, %v329_v37, %v325_v36 }
  0xcc   :  { %v1790_v38 = vpop.eup %1789 }
  0xcd   :  { %v336_v40 = vmul.f32 %v1790_v38, %v330_v39 }
  0xcf   :  { %338 = vst.msk [vmem:[%s2177_s4] sm:$0x3] %vm337_vm13, %v336_v40  ;;  %v339_v41 = vpack.c.bf16 %v336_v40, %v336_v40 }
  0xd1   :  { %1528 = vmatmul.msk.bf16.vlgmr.msra.gmra.mxu0 %vm66_vm0, %v339_v41  ;;  %1536 = vmatmul.msk.bf16.vlgmr.msra.gmra.mxu1 %vm66_vm0, %v339_v41 }
  0xd2   :  { %1544 = vmatmul.msk.bf16.vlgmr.msra.gmra.mxu2 %vm66_vm0, %v339_v41  ;;  %1551 = vmatmul.msk.bf16.vlgmr.msra.gmra.mxu3 %vm66_vm0, %v339_v41 }
  0xd3   :  { %681 = vmatpush.bf16.msra.mxu0 %v1750_v52  ;;  %723 = vmatpush.bf16.msra.mxu1 %v1751_v53 }
 0x14e   :  { %v361_v43 = vpop.f32.mrf.mxu0  ;;  %v403_v45 = vpop.f32.mrf.mxu1 }
 0x14f   :  { %v365_v46 = vadd.f32 %v361_v43, %v340_v42  ;;  %v407_v47 = vadd.f32 %v403_v45, %v385_v44  ;;  %v501_v44 = vld [vmem:[#allocation2 + $0x4] sm:$0x3] }
 0x151   :  { %v1529_v48 = vmul.f32 -1.442695, %v365_v46  ;;  %v1537_v49 = vmul.f32 -1.442695, %v407_v47  ;;  %v546_v46 = vld [vmem:[#allocation3 + $0x4] sm:$0x3] }
 0x153   :  { %1791 = vpow2.f32 %v1529_v48 }
 0x154   :  { %1793 = vpow2.f32 %v1537_v49 }
 0x155   :  { %v445_v54 = vpop.f32.mrf.mxu2  ;;  %v469_v56 = vpop.f32.mrf.mxu3 }
 0x156   :  { %v473_v57 = vadd.f32 %v469_v56, %v451_v55  ;;  %v363_v58 = vpop.f32.mrf.mxu0  ;;  %v405_v59 = vpop.f32.mrf.mxu1  ;;  %v449_v7 = vadd.f32 %v445_v54, %v427_v4  ;;  %v1753_v54 = vld [vmem:[%s2175_s2 + $0x18] sm:$0xff]  ;;  %v1752_v55 = vld [vmem:[%s2175_s2 + $0x10] sm:$0xff] }
 0x157   :  { %789 = vmatpush.bf16.msra.mxu3 %v1753_v54  ;;  %765 = vmatpush.bf16.msra.mxu2 %v1752_v55  ;;  %v1754_v54 = vld [vmem:[%s2175_s2] sm:$0xff]  ;;  %v1755_v55 = vld [vmem:[%s2175_s2 + $0x8] sm:$0xff] }
 0x158   :  { %v1552_v60 = vmul.f32 -1.442695, %v473_v57  ;;  %v612_v57 = vld [vmem:[#allocation5 + $0x4] sm:$0x3] }
 0x159   :  { %v1792_v61 = vpop.eup %1791 }
 0x15a   :  { %v1794_v62 = vpop.eup %1793  ;;  %v369_v63 = vadd.f32 1.0, %v1792_v61  ;;  %1795 = vpow2.f32 %v1552_v60 }
 0x15b   :  { %v411_v0 = vadd.f32 1.0, %v1794_v62 }
 0x15c   :  { %1797 = vrcp.f32 %v369_v63  ;;  %v381_v13 = vand.u32 2147483648, %v369_v63  ;;  %v379_v16 = vand.u32 2147483647, %v369_v63  ;;  %vm375_vm1 = vweird.f32 %v369_v63 }
 0x15d   :  { %1799 = vrcp.f32 %v411_v0  ;;  %v447_v1 = vpop.f32.mrf.mxu2  ;;  %v471_v2 = vpop.f32.mrf.mxu3  ;;  %v423_v14 = vand.u32 2147483648, %v411_v0  ;;  %v421_v18 = vand.u32 2147483647, %v411_v0  ;;  %vm417_vm2 = vweird.f32 %v411_v0 }
 0x15e   :  { %v382_v21 = vor.u32 1.1754944e-38, %v381_v13  ;;  %vm380_vm5 = vcmp.eq.f32.partialorder %v379_v16, 8.507059e+37 }
 0x15f   :  { %v424_v24 = vor.u32 1.1754944e-38, %v423_v14  ;;  %vm422_vm6 = vcmp.eq.f32.partialorder %v421_v18, 8.507059e+37 }
 0x160   :  { %v1796_v3 = vpop.eup %1795 }
 0x161   :  { %v477_v5 = vadd.f32 1.0, %v1796_v3 }
 0x162   :  { %v1798_v6 = vpop.eup %1797 }
 0x163   :  { %v1800_v8 = vpop.eup %1799  ;;  %v371_v9 = vmul.f32 %v1798_v6, %v369_v63  ;;  %1801 = vrcp.f32 %v477_v5  ;;  %vm376_vm14 = vweird.f32 %v1798_v6  ;;  %v489_v37 = vand.u32 2147483648, %v477_v5 }
 0x164   :  { %v413_v10 = vmul.f32 %v1800_v8, %v411_v0  ;;  %1803 = vtanh.f32 %v449_v7  ;;  %vm418_vm15 = vweird.f32 %v1800_v8  ;;  %vm377_vm3 = vmor %vm375_vm1, %vm376_vm14  ;;  %vm483_vm8 = vweird.f32 %v477_v5 }
 0x165   :  { %v372_v11 = vsub.f32 1.0, %v371_v9  ;;  %vm419_vm4 = vmor %vm417_vm2, %vm418_vm15  ;;  %v487_v38 = vand.u32 2147483647, %v477_v5  ;;  %v490_v40 = vor.u32 1.1754944e-38, %v489_v37 }
 0x166   :  { %v414_v12 = vsub.f32 1.0, %v413_v10 }
 0x167   :  { %v373_v15 = vmul.f32 %v1798_v6, %v372_v11  ;;  %vm488_vm10 = vcmp.eq.f32.partialorder %v487_v38, 8.507059e+37 }
 0x168   :  { %v415_v17 = vmul.f32 %v1800_v8, %v414_v12 }
 0x169   :  { %v1802_v19 = vpop.eup %1801  ;;  %v374_v20 = vadd.f32 %v1798_v6, %v373_v15 }
 0x16a   :  { %v416_v22 = vadd.f32 %v1800_v8, %v415_v17  ;;  %v479_v23 = vmul.f32 %v1802_v19, %v477_v5  ;;  %v1804_v26 = vpop.eup %1803  ;;  %vm484_vm7 = vweird.f32 %v1802_v19 }
 0x16b   :  { %v378_v25 = vsel %vm377_vm3, %v1798_v6, %v374_v20  ;;  %vm485_vm9 = vmor %vm483_vm8, %vm484_vm7  ;;  %v588_v6 = vld [vmem:[#allocation4 + $0x4] sm:$0x3] }
 0x16c   :  { %v383_v27 = vsel %vm380_vm5, %v382_v21, %v378_v25  ;;  %v420_v28 = vsel %vm419_vm4, %v1800_v8, %v416_v22  ;;  %v480_v29 = vsub.f32 1.0, %v479_v23 }
 0x16d   :  { %v425_v30 = vsel %vm422_vm6, %v424_v24, %v420_v28  ;;  %v494_v31 = vmul.f32 %v1804_v26, %v383_v27 }
 0x16e   :  { %v493_v33 = vmul.f32 %v425_v30, %v2013_v32  ;;  %v481_v34 = vmul.f32 %v1802_v19, %v480_v29 }
 0x170   :  { %v2037_v35 = vadd.f32 %v494_v31, %v493_v33  ;;  %v482_v36 = vadd.f32 %v1802_v19, %v481_v34 }
 0x172   :  { %1805 = vtanh.f32 %v2037_v35  ;;  %v486_v39 = vsel %vm485_vm9, %v1802_v19, %v482_v36 }
 0x173   :  { %v491_v42 = vsel %vm488_vm10, %v490_v40, %v486_v39 }
 0x178   :  { %v1806_v41 = vpop.eup %1805 }
 0x179   :  { %v497_v43 = vmul.f32 %v1806_v41, %v491_v42 }
 0x17b   :  { %1553 = vst.msk [vmem:[%s2177_s4 + $0x2] sm:$0x3] %vm337_vm13, %v497_v43  ;;  %v500_v32 = vpack.c.bf16 %v497_v43, %v497_v43 }
 0x17d   :  { %1558 = vmatmul.msk.bf16.vlgmr.msrb.gmra.mxu0 %vm66_vm0, %v500_v32  ;;  %1566 = vmatmul.msk.bf16.vlgmr.msrb.gmra.mxu1 %vm66_vm0, %v500_v32 }
 0x17e   :  { %1574 = vmatmul.msk.bf16.vlgmr.msrb.gmra.mxu2 %vm66_vm0, %v500_v32  ;;  %1581 = vmatmul.msk.bf16.vlgmr.msrb.gmra.mxu3 %vm66_vm0, %v500_v32 }
 0x17f   :  { %842 = vmatpush.bf16.msrb.mxu0 %v1754_v54  ;;  %884 = vmatpush.bf16.msrb.mxu1 %v1755_v55 }
 0x1fa   :  { %v522_v45 = vpop.f32.mrf.mxu0  ;;  %v564_v47 = vpop.f32.mrf.mxu1 }
 0x1fb   :  { %v526_v48 = vadd.f32 %v522_v45, %v501_v44  ;;  %v568_v49 = vadd.f32 %v564_v47, %v546_v46  ;;  %v662_v46 = vld [vmem:[#allocation2 + $0x6] sm:$0x3] }
 0x1fd   :  { %v1559_v50 = vmul.f32 -1.442695, %v526_v48  ;;  %v1567_v51 = vmul.f32 -1.442695, %v568_v49  ;;  %v707_v48 = vld [vmem:[#allocation3 + $0x6] sm:$0x3] }
 0x1ff   :  { %1807 = vpow2.f32 %v1559_v50 }
 0x200   :  { %1809 = vpow2.f32 %v1567_v51 }
 0x201   :  { %v606_v56 = vpop.f32.mrf.mxu2  ;;  %v630_v58 = vpop.f32.mrf.mxu3 }
 0x202   :  { %v634_v59 = vadd.f32 %v630_v58, %v612_v57  ;;  %v524_v60 = vpop.f32.mrf.mxu0  ;;  %v566_v61 = vpop.f32.mrf.mxu1  ;;  %v610_v9 = vadd.f32 %v606_v56, %v588_v6  ;;  %v1757_v56 = vld [vmem:[%s2175_s2 + $0x18] sm:$0xff]  ;;  %v1756_v57 = vld [vmem:[%s2175_s2 + $0x10] sm:$0xff] }
 0x203   :  { %950 = vmatpush.bf16.msrb.mxu3 %v1757_v56  ;;  %926 = vmatpush.bf16.msrb.mxu2 %v1756_v57  ;;  %v1758_v56 = vld [vmem:[%s2175_s2] sm:$0xff]  ;;  %v1759_v57 = vld [vmem:[%s2175_s2 + $0x8] sm:$0xff] }
 0x204   :  { %v1582_v62 = vmul.f32 -1.442695, %v634_v59  ;;  %v773_v59 = vld [vmem:[#allocation5 + $0x6] sm:$0x3] }
 0x205   :  { %v1808_v63 = vpop.eup %1807 }
 0x206   :  { %v1810_v0 = vpop.eup %1809  ;;  %v530_v1 = vadd.f32 1.0, %v1808_v63  ;;  %1811 = vpow2.f32 %v1582_v62 }
 0x207   :  { %v572_v2 = vadd.f32 1.0, %v1810_v0 }
 0x208   :  { %1813 = vrcp.f32 %v530_v1  ;;  %v542_v15 = vand.u32 2147483648, %v530_v1  ;;  %v540_v18 = vand.u32 2147483647, %v530_v1  ;;  %vm536_vm14 = vweird.f32 %v530_v1 }
 0x209   :  { %1815 = vrcp.f32 %v572_v2  ;;  %v608_v3 = vpop.f32.mrf.mxu2  ;;  %v632_v4 = vpop.f32.mrf.mxu3  ;;  %v584_v16 = vand.u32 2147483648, %v572_v2  ;;  %v582_v20 = vand.u32 2147483647, %v572_v2  ;;  %vm578_vm15 = vweird.f32 %v572_v2 }
 0x20a   :  { %v543_v23 = vor.u32 1.1754944e-38, %v542_v15  ;;  %vm541_vm3 = vcmp.eq.f32.partialorder %v540_v18, 8.507059e+37 }
 0x20b   :  { %v585_v26 = vor.u32 1.1754944e-38, %v584_v16  ;;  %vm583_vm4 = vcmp.eq.f32.partialorder %v582_v20, 8.507059e+37 }
 0x20c   :  { %v1812_v5 = vpop.eup %1811 }
 0x20d   :  { %v638_v7 = vadd.f32 1.0, %v1812_v5 }
 0x20e   :  { %v1814_v8 = vpop.eup %1813 }
 0x20f   :  { %v1816_v10 = vpop.eup %1815  ;;  %v532_v11 = vmul.f32 %v1814_v8, %v530_v1  ;;  %1817 = vrcp.f32 %v638_v7  ;;  %vm537_vm11 = vweird.f32 %v1814_v8  ;;  %v650_v40 = vand.u32 2147483648, %v638_v7 }
 0x210   :  { %v574_v12 = vmul.f32 %v1816_v10, %v572_v2  ;;  %1819 = vtanh.f32 %v610_v9  ;;  %vm579_vm12 = vweird.f32 %v1816_v10  ;;  %vm538_vm1 = vmor %vm536_vm14, %vm537_vm11  ;;  %vm644_vm6 = vweird.f32 %v638_v7 }
 0x211   :  { %v533_v13 = vsub.f32 1.0, %v532_v11  ;;  %vm580_vm2 = vmor %vm578_vm15, %vm579_vm12  ;;  %v648_v41 = vand.u32 2147483647, %v638_v7  ;;  %v651_v43 = vor.u32 1.1754944e-38, %v650_v40 }
 0x212   :  { %v575_v14 = vsub.f32 1.0, %v574_v12 }
 0x213   :  { %v534_v17 = vmul.f32 %v1814_v8, %v533_v13  ;;  %vm649_vm8 = vcmp.eq.f32.partialorder %v648_v41, 8.507059e+37 }
 0x214   :  { %v576_v19 = vmul.f32 %v1816_v10, %v575_v14 }
 0x215   :  { %v1818_v21 = vpop.eup %1817  ;;  %v535_v22 = vadd.f32 %v1814_v8, %v534_v17 }
 0x216   :  { %v577_v24 = vadd.f32 %v1816_v10, %v576_v19  ;;  %v640_v25 = vmul.f32 %v1818_v21, %v638_v7  ;;  %v1820_v28 = vpop.eup %1819  ;;  %vm645_vm5 = vweird.f32 %v1818_v21 }
 0x217   :  { %v539_v27 = vsel %vm538_vm1, %v1814_v8, %v535_v22  ;;  %vm646_vm7 = vmor %vm644_vm6, %vm645_vm5  ;;  %v749_v8 = vld [vmem:[#allocation4 + $0x6] sm:$0x3] }
 0x218   :  { %v544_v29 = vsel %vm541_vm3, %v543_v23, %v539_v27  ;;  %v581_v30 = vsel %vm580_vm2, %v1816_v10, %v577_v24  ;;  %v641_v31 = vsub.f32 1.0, %v640_v25 }
 0x219   :  { %v586_v33 = vsel %vm583_vm4, %v585_v26, %v581_v30  ;;  %v655_v34 = vmul.f32 %v1820_v28, %v544_v29 }
 0x21a   :  { %v654_v36 = vmul.f32 %v586_v33, %v2037_v35  ;;  %v642_v37 = vmul.f32 %v1818_v21, %v641_v31 }
 0x21c   :  { %v2061_v38 = vadd.f32 %v655_v34, %v654_v36  ;;  %v643_v39 = vadd.f32 %v1818_v21, %v642_v37 }
 0x21e   :  { %1821 = vtanh.f32 %v2061_v38  ;;  %v647_v42 = vsel %vm646_vm7, %v1818_v21, %v643_v39 }
 0x21f   :  { %v652_v44 = vsel %vm649_vm8, %v651_v43, %v647_v42 }
 0x224   :  { %v1822_v32 = vpop.eup %1821 }
 0x225   :  { %v658_v45 = vmul.f32 %v1822_v32, %v652_v44 }
 0x227   :  { %1583 = vst.msk [vmem:[%s2177_s4 + $0x4] sm:$0x3] %vm337_vm13, %v658_v45  ;;  %v661_v35 = vpack.c.bf16 %v658_v45, %v658_v45 }
 0x229   :  { %1588 = vmatmul.msk.bf16.vlgmr.msra.gmra.mxu0 %vm66_vm0, %v661_v35  ;;  %1596 = vmatmul.msk.bf16.vlgmr.msra.gmra.mxu1 %vm66_vm0, %v661_v35 }
 0x22a   :  { %1604 = vmatmul.msk.bf16.vlgmr.msra.gmra.mxu2 %vm66_vm0, %v661_v35  ;;  %1611 = vmatmul.msk.bf16.vlgmr.msra.gmra.mxu3 %vm66_vm0, %v661_v35 }
 0x22b   :  { %1003 = vmatpush.bf16.msra.mxu0 %v1758_v56  ;;  %1045 = vmatpush.bf16.msra.mxu1 %v1759_v57 }
 0x2a6   :  { %v683_v47 = vpop.f32.mrf.mxu0  ;;  %v725_v49 = vpop.f32.mrf.mxu1 }
 0x2a7   :  { %v687_v50 = vadd.f32 %v683_v47, %v662_v46  ;;  %v729_v51 = vadd.f32 %v725_v49, %v707_v48  ;;  %v823_v48 = vld [vmem:[#allocation2 + $0x8] sm:$0x3] }
 0x2a9   :  { %v1589_v52 = vmul.f32 -1.442695, %v687_v50  ;;  %v1597_v53 = vmul.f32 -1.442695, %v729_v51  ;;  %v868_v50 = vld [vmem:[#allocation3 + $0x8] sm:$0x3] }
 0x2ab   :  { %1823 = vpow2.f32 %v1589_v52 }
 0x2ac   :  { %1825 = vpow2.f32 %v1597_v53 }
 0x2ad   :  { %v767_v58 = vpop.f32.mrf.mxu2  ;;  %v791_v60 = vpop.f32.mrf.mxu3 }
 0x2ae   :  { %v795_v61 = vadd.f32 %v791_v60, %v773_v59  ;;  %v685_v62 = vpop.f32.mrf.mxu0  ;;  %v727_v63 = vpop.f32.mrf.mxu1  ;;  %v771_v11 = vadd.f32 %v767_v58, %v749_v8  ;;  %v1761_v58 = vld [vmem:[%s2175_s2 + $0x18] sm:$0xff]  ;;  %v1760_v59 = vld [vmem:[%s2175_s2 + $0x10] sm:$0xff] }
 0x2af   :  { %1111 = vmatpush.bf16.msra.mxu3 %v1761_v58  ;;  %1087 = vmatpush.bf16.msra.mxu2 %v1760_v59  ;;  %v1762_v58 = vld [vmem:[%s2175_s2] sm:$0xff]  ;;  %v1763_v59 = vld [vmem:[%s2175_s2 + $0x8] sm:$0xff] }
 0x2b0   :  { %v1612_v0 = vmul.f32 -1.442695, %v795_v61  ;;  %v934_v61 = vld [vmem:[#allocation5 + $0x8] sm:$0x3] }
 0x2b1   :  { %v1824_v1 = vpop.eup %1823 }
 0x2b2   :  { %v1826_v2 = vpop.eup %1825  ;;  %v691_v3 = vadd.f32 1.0, %v1824_v1  ;;  %1827 = vpow2.f32 %v1612_v0 }
 0x2b3   :  { %v733_v4 = vadd.f32 1.0, %v1826_v2 }
 0x2b4   :  { %1829 = vrcp.f32 %v691_v3  ;;  %v703_v17 = vand.u32 2147483648, %v691_v3  ;;  %v701_v20 = vand.u32 2147483647, %v691_v3  ;;  %vm697_vm11 = vweird.f32 %v691_v3 }
 0x2b5   :  { %1831 = vrcp.f32 %v733_v4  ;;  %v769_v5 = vpop.f32.mrf.mxu2  ;;  %v793_v6 = vpop.f32.mrf.mxu3  ;;  %v745_v18 = vand.u32 2147483648, %v733_v4  ;;  %v743_v22 = vand.u32 2147483647, %v733_v4  ;;  %vm739_vm12 = vweird.f32 %v733_v4 }
 0x2b6   :  { %v704_v25 = vor.u32 1.1754944e-38, %v703_v17  ;;  %vm702_vm1 = vcmp.eq.f32.partialorder %v701_v20, 8.507059e+37 }
 0x2b7   :  { %v746_v28 = vor.u32 1.1754944e-38, %v745_v18  ;;  %vm744_vm2 = vcmp.eq.f32.partialorder %v743_v22, 8.507059e+37 }
 0x2b8   :  { %v1828_v7 = vpop.eup %1827 }
 0x2b9   :  { %v799_v9 = vadd.f32 1.0, %v1828_v7 }
 0x2ba   :  { %v1830_v10 = vpop.eup %1829 }
 0x2bb   :  { %v1832_v12 = vpop.eup %1831  ;;  %v693_v13 = vmul.f32 %v1830_v10, %v691_v3  ;;  %1833 = vrcp.f32 %v799_v9  ;;  %vm698_vm9 = vweird.f32 %v1830_v10  ;;  %v811_v43 = vand.u32 2147483648, %v799_v9 }
 0x2bc   :  { %v735_v14 = vmul.f32 %v1832_v12, %v733_v4  ;;  %1835 = vtanh.f32 %v771_v11  ;;  %vm740_vm10 = vweird.f32 %v1832_v12  ;;  %vm699_vm14 = vmor %vm697_vm11, %vm698_vm9  ;;  %vm805_vm4 = vweird.f32 %v799_v9 }
 0x2bd   :  { %v694_v15 = vsub.f32 1.0, %v693_v13  ;;  %vm741_vm15 = vmor %vm739_vm12, %vm740_vm10  ;;  %v809_v32 = vand.u32 2147483647, %v799_v9  ;;  %v812_v45 = vor.u32 1.1754944e-38, %v811_v43 }
 0x2be   :  { %v736_v16 = vsub.f32 1.0, %v735_v14 }
 0x2bf   :  { %v695_v19 = vmul.f32 %v1830_v10, %v694_v15  ;;  %vm810_vm6 = vcmp.eq.f32.partialorder %v809_v32, 8.507059e+37 }
 0x2c0   :  { %v737_v21 = vmul.f32 %v1832_v12, %v736_v16 }
 0x2c1   :  { %v1834_v23 = vpop.eup %1833  ;;  %v696_v24 = vadd.f32 %v1830_v10, %v695_v19 }
 0x2c2   :  { %v738_v26 = vadd.f32 %v1832_v12, %v737_v21  ;;  %v801_v27 = vmul.f32 %v1834_v23, %v799_v9  ;;  %v1836_v30 = vpop.eup %1835  ;;  %vm806_vm3 = vweird.f32 %v1834_v23 }
 0x2c3   :  { %v700_v29 = vsel %vm699_vm14, %v1830_v10, %v696_v24  ;;  %vm807_vm5 = vmor %vm805_vm4, %vm806_vm3  ;;  %v910_v10 = vld [vmem:[#allocation4 + $0x8] sm:$0x3] }
 0x2c4   :  { %v705_v31 = vsel %vm702_vm1, %v704_v25, %v700_v29  ;;  %v742_v33 = vsel %vm741_vm15, %v1832_v12, %v738_v26  ;;  %v802_v34 = vsub.f32 1.0, %v801_v27 }
 0x2c5   :  { %v747_v36 = vsel %vm744_vm2, %v746_v28, %v742_v33  ;;  %v816_v37 = vmul.f32 %v1836_v30, %v705_v31 }
 0x2c6   :  { %v815_v39 = vmul.f32 %v747_v36, %v2061_v38  ;;  %v803_v40 = vmul.f32 %v1834_v23, %v802_v34 }
 0x2c8   :  { %v2085_v41 = vadd.f32 %v816_v37, %v815_v39  ;;  %v804_v42 = vadd.f32 %v1834_v23, %v803_v40 }
 0x2ca   :  { %1837 = vtanh.f32 %v2085_v41  ;;  %v808_v44 = vsel %vm807_vm5, %v1834_v23, %v804_v42 }
 0x2cb   :  { %v813_v46 = vsel %vm810_vm6, %v812_v45, %v808_v44 }
 0x2d0   :  { %v1838_v35 = vpop.eup %1837 }
 0x2d1   :  { %v819_v47 = vmul.f32 %v1838_v35, %v813_v46 }
 0x2d3   :  { %1613 = vst.msk [vmem:[%s2177_s4 + $0x6] sm:$0x3] %vm337_vm13, %v819_v47  ;;  %v822_v38 = vpack.c.bf16 %v819_v47, %v819_v47 }
 0x2d5   :  { %1618 = vmatmul.msk.bf16.vlgmr.msrb.gmra.mxu0 %vm66_vm0, %v822_v38  ;;  %1626 = vmatmul.msk.bf16.vlgmr.msrb.gmra.mxu1 %vm66_vm0, %v822_v38 }
 0x2d6   :  { %1634 = vmatmul.msk.bf16.vlgmr.msrb.gmra.mxu2 %vm66_vm0, %v822_v38  ;;  %1641 = vmatmul.msk.bf16.vlgmr.msrb.gmra.mxu3 %vm66_vm0, %v822_v38 }
 0x2d7   :  { %1164 = vmatpush.bf16.msrb.mxu0 %v1762_v58  ;;  %1206 = vmatpush.bf16.msrb.mxu1 %v1763_v59 }
 0x352   :  { %v844_v49 = vpop.f32.mrf.mxu0  ;;  %v886_v51 = vpop.f32.mrf.mxu1 }
 0x353   :  { %v848_v52 = vadd.f32 %v844_v49, %v823_v48  ;;  %v890_v53 = vadd.f32 %v886_v51, %v868_v50  ;;  %v984_v50 = vld [vmem:[#allocation2 + $0xa] sm:$0x3] }
 0x355   :  { %v1619_v54 = vmul.f32 -1.442695, %v848_v52  ;;  %v1627_v55 = vmul.f32 -1.442695, %v890_v53  ;;  %v1029_v52 = vld [vmem:[#allocation3 + $0xa] sm:$0x3] }
 0x357   :  { %1839 = vpow2.f32 %v1619_v54 }
 0x358   :  { %1841 = vpow2.f32 %v1627_v55 }
 0x359   :  { %v928_v60 = vpop.f32.mrf.mxu2  ;;  %v952_v62 = vpop.f32.mrf.mxu3 }
 0x35a   :  { %v956_v63 = vadd.f32 %v952_v62, %v934_v61  ;;  %v846_v0 = vpop.f32.mrf.mxu0  ;;  %v888_v1 = vpop.f32.mrf.mxu1  ;;  %v932_v13 = vadd.f32 %v928_v60, %v910_v10  ;;  %v1765_v60 = vld [vmem:[%s2175_s2 + $0x18] sm:$0xff]  ;;  %v1764_v61 = vld [vmem:[%s2175_s2 + $0x10] sm:$0xff] }
 0x35b   :  { %1272 = vmatpush.bf16.msrb.mxu3 %v1765_v60  ;;  %1248 = vmatpush.bf16.msrb.mxu2 %v1764_v61  ;;  %v1766_v60 = vld [vmem:[%s2175_s2] sm:$0xff]  ;;  %v1767_v61 = vld [vmem:[%s2175_s2 + $0x8] sm:$0xff] }
 0x35c   :  { %v1642_v2 = vmul.f32 -1.442695, %v956_v63  ;;  %v1095_v63 = vld [vmem:[#allocation5 + $0xa] sm:$0x3] }
 0x35d   :  { %v1840_v3 = vpop.eup %1839 }
 0x35e   :  { %v1842_v4 = vpop.eup %1841  ;;  %v852_v5 = vadd.f32 1.0, %v1840_v3  ;;  %1843 = vpow2.f32 %v1642_v2 }
 0x35f   :  { %v894_v6 = vadd.f32 1.0, %v1842_v4 }
 0x360   :  { %1845 = vrcp.f32 %v852_v5  ;;  %v864_v19 = vand.u32 2147483648, %v852_v5  ;;  %v862_v22 = vand.u32 2147483647, %v852_v5  ;;  %vm858_vm9 = vweird.f32 %v852_v5 }
 0x361   :  { %1847 = vrcp.f32 %v894_v6  ;;  %v930_v7 = vpop.f32.mrf.mxu2  ;;  %v954_v8 = vpop.f32.mrf.mxu3  ;;  %v906_v20 = vand.u32 2147483648, %v894_v6  ;;  %v904_v24 = vand.u32 2147483647, %v894_v6  ;;  %vm900_vm10 = vweird.f32 %v894_v6 }
 0x362   :  { %v865_v27 = vor.u32 1.1754944e-38, %v864_v19  ;;  %vm863_vm14 = vcmp.eq.f32.partialorder %v862_v22, 8.507059e+37 }
 0x363   :  { %v907_v30 = vor.u32 1.1754944e-38, %v906_v20  ;;  %vm905_vm15 = vcmp.eq.f32.partialorder %v904_v24, 8.507059e+37 }
 0x364   :  { %v1844_v9 = vpop.eup %1843 }
 0x365   :  { %v960_v11 = vadd.f32 1.0, %v1844_v9 }
 0x366   :  { %v1846_v12 = vpop.eup %1845 }
 0x367   :  { %v1848_v14 = vpop.eup %1847  ;;  %v854_v15 = vmul.f32 %v1846_v12, %v852_v5  ;;  %1849 = vrcp.f32 %v960_v11  ;;  %vm859_vm7 = vweird.f32 %v1846_v12  ;;  %v972_v45 = vand.u32 2147483648, %v960_v11 }
 0x368   :  { %v896_v16 = vmul.f32 %v1848_v14, %v894_v6  ;;  %1851 = vtanh.f32 %v932_v13  ;;  %vm901_vm8 = vweird.f32 %v1848_v14  ;;  %vm860_vm11 = vmor %vm858_vm9, %vm859_vm7  ;;  %vm966_vm2 = vweird.f32 %v960_v11 }
 0x369   :  { %v855_v17 = vsub.f32 1.0, %v854_v15  ;;  %vm902_vm12 = vmor %vm900_vm10, %vm901_vm8  ;;  %v970_v35 = vand.u32 2147483647, %v960_v11  ;;  %v973_v47 = vor.u32 1.1754944e-38, %v972_v45 }
 0x36a   :  { %v897_v18 = vsub.f32 1.0, %v896_v16 }
 0x36b   :  { %v856_v21 = vmul.f32 %v1846_v12, %v855_v17  ;;  %vm971_vm4 = vcmp.eq.f32.partialorder %v970_v35, 8.507059e+37 }
 0x36c   :  { %v898_v23 = vmul.f32 %v1848_v14, %v897_v18 }
 0x36d   :  { %v1850_v25 = vpop.eup %1849  ;;  %v857_v26 = vadd.f32 %v1846_v12, %v856_v21 }
 0x36e   :  { %v899_v28 = vadd.f32 %v1848_v14, %v898_v23  ;;  %v962_v29 = vmul.f32 %v1850_v25, %v960_v11  ;;  %v1852_v33 = vpop.eup %1851  ;;  %vm967_vm1 = vweird.f32 %v1850_v25 }
 0x36f   :  { %v861_v31 = vsel %vm860_vm11, %v1846_v12, %v857_v26  ;;  %vm968_vm3 = vmor %vm966_vm2, %vm967_vm1  ;;  %v1071_v12 = vld [vmem:[#allocation4 + $0xa] sm:$0x3] }
 0x370   :  { %v866_v34 = vsel %vm863_vm14, %v865_v27, %v861_v31  ;;  %v903_v36 = vsel %vm902_vm12, %v1848_v14, %v899_v28  ;;  %v963_v37 = vsub.f32 1.0, %v962_v29 }
 0x371   :  { %v908_v39 = vsel %vm905_vm15, %v907_v30, %v903_v36  ;;  %v977_v40 = vmul.f32 %v1852_v33, %v866_v34 }
 0x372   :  { %v976_v42 = vmul.f32 %v908_v39, %v2085_v41  ;;  %v964_v43 = vmul.f32 %v1850_v25, %v963_v37 }
 0x374   :  { %v2109_v32 = vadd.f32 %v977_v40, %v976_v42  ;;  %v965_v44 = vadd.f32 %v1850_v25, %v964_v43 }
 0x376   :  { %1853 = vtanh.f32 %v2109_v32  ;;  %v969_v46 = vsel %vm968_vm3, %v1850_v25, %v965_v44 }
 0x377   :  { %v974_v48 = vsel %vm971_vm4, %v973_v47, %v969_v46 }
 0x37c   :  { %v1854_v38 = vpop.eup %1853 }
 0x37d   :  { %v980_v49 = vmul.f32 %v1854_v38, %v974_v48 }
 0x37f   :  { %1643 = vst.msk [vmem:[%s2177_s4 + $0x8] sm:$0x3] %vm337_vm13, %v980_v49  ;;  %v983_v41 = vpack.c.bf16 %v980_v49, %v980_v49 }
 0x381   :  { %1648 = vmatmul.msk.bf16.vlgmr.msra.gmra.mxu0 %vm66_vm0, %v983_v41  ;;  %1656 = vmatmul.msk.bf16.vlgmr.msra.gmra.mxu1 %vm66_vm0, %v983_v41 }
 0x382   :  { %1664 = vmatmul.msk.bf16.vlgmr.msra.gmra.mxu2 %vm66_vm0, %v983_v41  ;;  %1671 = vmatmul.msk.bf16.vlgmr.msra.gmra.mxu3 %vm66_vm0, %v983_v41 }
 0x383   :  { %1325 = vmatpush.bf16.msra.mxu0 %v1766_v60  ;;  %1367 = vmatpush.bf16.msra.mxu1 %v1767_v61 }
 0x3fe   :  { %v1005_v51 = vpop.f32.mrf.mxu0  ;;  %v1047_v53 = vpop.f32.mrf.mxu1 }
 0x3ff   :  { %v1009_v54 = vadd.f32 %v1005_v51, %v984_v50  ;;  %v1051_v55 = vadd.f32 %v1047_v53, %v1029_v52  ;;  %v1145_v52 = vld [vmem:[#allocation2 + $0xc] sm:$0x3] }
 0x401   :  { %v1649_v56 = vmul.f32 -1.442695, %v1009_v54  ;;  %v1657_v57 = vmul.f32 -1.442695, %v1051_v55  ;;  %v1190_v54 = vld [vmem:[#allocation3 + $0xc] sm:$0x3] }
 0x403   :  { %1855 = vpow2.f32 %v1649_v56 }
 0x404   :  { %1857 = vpow2.f32 %v1657_v57 }
 0x405   :  { %v1089_v62 = vpop.f32.mrf.mxu2  ;;  %v1113_v0 = vpop.f32.mrf.mxu3 }
 0x406   :  { %v1117_v1 = vadd.f32 %v1113_v0, %v1095_v63  ;;  %v1007_v2 = vpop.f32.mrf.mxu0  ;;  %v1049_v3 = vpop.f32.mrf.mxu1  ;;  %v1093_v15 = vadd.f32 %v1089_v62, %v1071_v12  ;;  %v1769_v62 = vld [vmem:[%s2175_s2 + $0x18] sm:$0xff]  ;;  %v1768_v63 = vld [vmem:[%s2175_s2 + $0x10] sm:$0xff] }
 0x407   :  { %1433 = vmatpush.bf16.msra.mxu3 %v1769_v62  ;;  %1409 = vmatpush.bf16.msra.mxu2 %v1768_v63  ;;  %v1417_v63 = vld [vmem:[#allocation5 + $0xe] sm:$0x3] }
 0x408   :  { %v1672_v4 = vmul.f32 -1.442695, %v1117_v1  ;;  %v1256_v1 = vld [vmem:[#allocation5 + $0xc] sm:$0x3] }
 0x409   :  { %v1856_v5 = vpop.eup %1855 }
 0x40a   :  { %v1858_v6 = vpop.eup %1857  ;;  %v1013_v7 = vadd.f32 1.0, %v1856_v5  ;;  %1859 = vpow2.f32 %v1672_v4 }
 0x40b   :  { %v1055_v8 = vadd.f32 1.0, %v1858_v6 }
 0x40c   :  { %1861 = vrcp.f32 %v1013_v7  ;;  %v1025_v21 = vand.u32 2147483648, %v1013_v7  ;;  %v1023_v24 = vand.u32 2147483647, %v1013_v7  ;;  %vm1019_vm7 = vweird.f32 %v1013_v7 }
 0x40d   :  { %1863 = vrcp.f32 %v1055_v8  ;;  %v1091_v9 = vpop.f32.mrf.mxu2  ;;  %v1115_v10 = vpop.f32.mrf.mxu3  ;;  %v1067_v22 = vand.u32 2147483648, %v1055_v8  ;;  %v1065_v26 = vand.u32 2147483647, %v1055_v8  ;;  %vm1061_vm8 = vweird.f32 %v1055_v8 }
 0x40e   :  { %v1026_v29 = vor.u32 1.1754944e-38, %v1025_v21  ;;  %vm1024_vm11 = vcmp.eq.f32.partialorder %v1023_v24, 8.507059e+37 }
 0x40f   :  { %v1068_v33 = vor.u32 1.1754944e-38, %v1067_v22  ;;  %vm1066_vm12 = vcmp.eq.f32.partialorder %v1065_v26, 8.507059e+37 }
 0x410   :  { %v1860_v11 = vpop.eup %1859 }
 0x411   :  { %v1121_v13 = vadd.f32 1.0, %v1860_v11 }
 0x412   :  { %v1862_v14 = vpop.eup %1861 }
 0x413   :  { %v1864_v16 = vpop.eup %1863  ;;  %v1015_v17 = vmul.f32 %v1862_v14, %v1013_v7  ;;  %1865 = vrcp.f32 %v1121_v13  ;;  %vm1020_vm5 = vweird.f32 %v1862_v14  ;;  %v1133_v47 = vand.u32 2147483648, %v1121_v13 }
 0x414   :  { %v1057_v18 = vmul.f32 %v1864_v16, %v1055_v8  ;;  %1867 = vtanh.f32 %v1093_v15  ;;  %vm1062_vm6 = vweird.f32 %v1864_v16  ;;  %vm1021_vm9 = vmor %vm1019_vm7, %vm1020_vm5  ;;  %vm1127_vm15 = vweird.f32 %v1121_v13 }
 0x415   :  { %v1016_v19 = vsub.f32 1.0, %v1015_v17  ;;  %vm1063_vm10 = vmor %vm1061_vm8, %vm1062_vm6  ;;  %v1131_v38 = vand.u32 2147483647, %v1121_v13  ;;  %v1134_v49 = vor.u32 1.1754944e-38, %v1133_v47 }
 0x416   :  { %v1058_v20 = vsub.f32 1.0, %v1057_v18 }
 0x417   :  { %v1017_v23 = vmul.f32 %v1862_v14, %v1016_v19  ;;  %vm1132_vm2 = vcmp.eq.f32.partialorder %v1131_v38, 8.507059e+37 }
 0x418   :  { %v1059_v25 = vmul.f32 %v1864_v16, %v1058_v20 }
 0x419   :  { %v1866_v27 = vpop.eup %1865  ;;  %v1018_v28 = vadd.f32 %v1862_v14, %v1017_v23 }
 0x41a   :  { %v1060_v30 = vadd.f32 %v1864_v16, %v1059_v25  ;;  %v1123_v31 = vmul.f32 %v1866_v27, %v1121_v13  ;;  %v1868_v36 = vpop.eup %1867  ;;  %vm1128_vm14 = vweird.f32 %v1866_v27 }
 0x41b   :  { %v1022_v34 = vsel %vm1021_vm9, %v1862_v14, %v1018_v28  ;;  %vm1129_vm1 = vmor %vm1127_vm15, %vm1128_vm14  ;;  %v1232_v14 = vld [vmem:[#allocation4 + $0xc] sm:$0x3] }
 0x41c   :  { %v1027_v37 = vsel %vm1024_vm11, %v1026_v29, %v1022_v34  ;;  %v1064_v39 = vsel %vm1063_vm10, %v1864_v16, %v1060_v30  ;;  %v1124_v40 = vsub.f32 1.0, %v1123_v31 }
 0x41d   :  { %v1069_v42 = vsel %vm1066_vm12, %v1068_v33, %v1064_v39  ;;  %v1138_v43 = vmul.f32 %v1868_v36, %v1027_v37 }
 0x41e   :  { %v1137_v44 = vmul.f32 %v1069_v42, %v2109_v32  ;;  %v1125_v45 = vmul.f32 %v1866_v27, %v1124_v40 }
 0x420   :  { %v2133_v35 = vadd.f32 %v1138_v43, %v1137_v44  ;;  %v1126_v46 = vadd.f32 %v1866_v27, %v1125_v45 }
 0x422   :  { %1869 = vtanh.f32 %v2133_v35  ;;  %v1130_v48 = vsel %vm1129_vm1, %v1866_v27, %v1126_v46 }
 0x423   :  { %v1135_v50 = vsel %vm1132_vm2, %v1134_v49, %v1130_v48 }
 0x428   :  { %v1870_v41 = vpop.eup %1869 }
 0x429   :  { %v1141_v51 = vmul.f32 %v1870_v41, %v1135_v50 }
 0x42b   :  { %1673 = vst.msk [vmem:[%s2177_s4 + $0xa] sm:$0x3] %vm337_vm13, %v1141_v51  ;;  %v1144_v32 = vpack.c.bf16 %v1141_v51, %v1141_v51 }
 0x42d   :  { %1678 = vmatmul.msk.bf16.vlgmr.msrb.gmra.mxu0 %vm66_vm0, %v1144_v32  ;;  %1686 = vmatmul.msk.bf16.vlgmr.msrb.gmra.mxu1 %vm66_vm0, %v1144_v32 }
 0x42e   :  { %1694 = vmatmul.msk.bf16.vlgmr.msrb.gmra.mxu2 %vm66_vm0, %v1144_v32  ;;  %1701 = vmatmul.msk.bf16.vlgmr.msrb.gmra.mxu3 %vm66_vm0, %v1144_v32 }
 0x4aa   :  { %v1166_v53 = vpop.f32.mrf.mxu0  ;;  %v1208_v55 = vpop.f32.mrf.mxu1 }
 0x4ab   :  { %v1170_v56 = vadd.f32 %v1166_v53, %v1145_v52  ;;  %v1212_v57 = vadd.f32 %v1208_v55, %v1190_v54  ;;  %v1306_v54 = vld [vmem:[#allocation2 + $0xe] sm:$0x3] }
 0x4ad   :  { %v1679_v58 = vmul.f32 -1.442695, %v1170_v56  ;;  %v1687_v59 = vmul.f32 -1.442695, %v1212_v57  ;;  %v1351_v56 = vld [vmem:[#allocation3 + $0xe] sm:$0x3] }
 0x4af   :  { %1871 = vpow2.f32 %v1679_v58 }
 0x4b0   :  { %1873 = vpow2.f32 %v1687_v59 }
 0x4b1   :  { %v1250_v0 = vpop.f32.mrf.mxu2  ;;  %v1274_v2 = vpop.f32.mrf.mxu3 }
 0x4b2   :  { %v1278_v3 = vadd.f32 %v1274_v2, %v1256_v1  ;;  %v1168_v4 = vpop.f32.mrf.mxu0  ;;  %v1210_v5 = vpop.f32.mrf.mxu1  ;;  %v1254_v17 = vadd.f32 %v1250_v0, %v1232_v14 }
 0x4b4   :  { %v1702_v6 = vmul.f32 -1.442695, %v1278_v3 }
 0x4b5   :  { %v1872_v7 = vpop.eup %1871 }
 0x4b6   :  { %v1874_v8 = vpop.eup %1873  ;;  %v1174_v9 = vadd.f32 1.0, %v1872_v7  ;;  %1875 = vpow2.f32 %v1702_v6 }
 0x4b7   :  { %v1216_v10 = vadd.f32 1.0, %v1874_v8 }
 0x4b8   :  { %1877 = vrcp.f32 %v1174_v9  ;;  %v1186_v23 = vand.u32 2147483648, %v1174_v9  ;;  %v1184_v26 = vand.u32 2147483647, %v1174_v9  ;;  %vm1180_vm5 = vweird.f32 %v1174_v9 }
 0x4b9   :  { %1879 = vrcp.f32 %v1216_v10  ;;  %v1252_v11 = vpop.f32.mrf.mxu2  ;;  %v1276_v12 = vpop.f32.mrf.mxu3  ;;  %v1228_v24 = vand.u32 2147483648, %v1216_v10  ;;  %v1226_v28 = vand.u32 2147483647, %v1216_v10  ;;  %vm1222_vm6 = vweird.f32 %v1216_v10 }
 0x4ba   :  { %v1187_v31 = vor.u32 1.1754944e-38, %v1186_v23  ;;  %vm1185_vm9 = vcmp.eq.f32.partialorder %v1184_v26, 8.507059e+37  ;;  %v1393_v12 = vld [vmem:[#allocation4 + $0xe] sm:$0x3] }
 0x4bb   :  { %v1229_v36 = vor.u32 1.1754944e-38, %v1228_v24  ;;  %vm1227_vm10 = vcmp.eq.f32.partialorder %v1226_v28, 8.507059e+37 }
 0x4bc   :  { %v1876_v13 = vpop.eup %1875 }
 0x4bd   :  { %v1282_v15 = vadd.f32 1.0, %v1876_v13 }
 0x4be   :  { %v1878_v16 = vpop.eup %1877 }
 0x4bf   :  { %v1880_v18 = vpop.eup %1879  ;;  %v1176_v19 = vmul.f32 %v1878_v16, %v1174_v9  ;;  %1881 = vrcp.f32 %v1282_v15  ;;  %vm1181_vm3 = vweird.f32 %v1878_v16  ;;  %v1294_v49 = vand.u32 2147483648, %v1282_v15 }
 0x4c0   :  { %v1218_v20 = vmul.f32 %v1880_v18, %v1216_v10  ;;  %1883 = vtanh.f32 %v1254_v17  ;;  %vm1223_vm4 = vweird.f32 %v1880_v18  ;;  %vm1182_vm7 = vmor %vm1180_vm5, %vm1181_vm3  ;;  %vm1288_vm12 = vweird.f32 %v1282_v15 }
 0x4c1   :  { %v1177_v21 = vsub.f32 1.0, %v1176_v19  ;;  %vm1224_vm8 = vmor %vm1222_vm6, %vm1223_vm4  ;;  %v1292_v41 = vand.u32 2147483647, %v1282_v15  ;;  %v1295_v51 = vor.u32 1.1754944e-38, %v1294_v49 }
 0x4c2   :  { %v1219_v22 = vsub.f32 1.0, %v1218_v20 }
 0x4c3   :  { %v1178_v25 = vmul.f32 %v1878_v16, %v1177_v21  ;;  %vm1293_vm15 = vcmp.eq.f32.partialorder %v1292_v41, 8.507059e+37 }
 0x4c4   :  { %v1220_v27 = vmul.f32 %v1880_v18, %v1219_v22 }
 0x4c5   :  { %v1882_v29 = vpop.eup %1881  ;;  %v1179_v30 = vadd.f32 %v1878_v16, %v1178_v25 }
 0x4c6   :  { %v1221_v33 = vadd.f32 %v1880_v18, %v1220_v27  ;;  %v1284_v34 = vmul.f32 %v1882_v29, %v1282_v15  ;;  %v1884_v39 = vpop.eup %1883  ;;  %vm1289_vm11 = vweird.f32 %v1882_v29 }
 0x4c7   :  { %v1183_v37 = vsel %vm1182_vm7, %v1878_v16, %v1179_v30  ;;  %vm1290_vm14 = vmor %vm1288_vm12, %vm1289_vm11 }
 0x4c8   :  { %v1188_v40 = vsel %vm1185_vm9, %v1187_v31, %v1183_v37  ;;  %v1225_v42 = vsel %vm1224_vm8, %v1880_v18, %v1221_v33  ;;  %v1285_v43 = vsub.f32 1.0, %v1284_v34 }
 0x4c9   :  { %v1230_v44 = vsel %vm1227_vm10, %v1229_v36, %v1225_v42  ;;  %v1299_v45 = vmul.f32 %v1884_v39, %v1188_v40 }
 0x4ca   :  { %v1298_v46 = vmul.f32 %v1230_v44, %v2133_v35  ;;  %v1286_v47 = vmul.f32 %v1882_v29, %v1285_v43 }
 0x4cc   :  { %v2157_v38 = vadd.f32 %v1299_v45, %v1298_v46  ;;  %v1287_v48 = vadd.f32 %v1882_v29, %v1286_v47 }
 0x4ce   :  { %1885 = vtanh.f32 %v2157_v38  ;;  %v1291_v50 = vsel %vm1290_vm14, %v1882_v29, %v1287_v48 }
 0x4cf   :  { %v1296_v52 = vsel %vm1293_vm15, %v1295_v51, %v1291_v50 }
 0x4d4   :  { %v1886_v32 = vpop.eup %1885 }
 0x4d5   :  { %v1302_v53 = vmul.f32 %v1886_v32, %v1296_v52 }
 0x4d7   :  { %1703 = vst.msk [vmem:[%s2177_s4 + $0xc] sm:$0x3] %vm337_vm13, %v1302_v53  ;;  %v1305_v35 = vpack.c.bf16 %v1302_v53, %v1302_v53 }
 0x4d9   :  { %1708 = vmatmul.msk.bf16.vlgmr.msra.gmra.mxu0 %vm66_vm0, %v1305_v35  ;;  %1716 = vmatmul.msk.bf16.vlgmr.msra.gmra.mxu1 %vm66_vm0, %v1305_v35 }
 0x4da   :  { %1724 = vmatmul.msk.bf16.vlgmr.msra.gmra.mxu2 %vm66_vm0, %v1305_v35  ;;  %1731 = vmatmul.msk.bf16.vlgmr.msra.gmra.mxu3 %vm66_vm0, %v1305_v35 }
 0x556   :  { %v1327_v55 = vpop.f32.mrf.mxu0  ;;  %v1369_v57 = vpop.f32.mrf.mxu1 }
 0x557   :  { %v1331_v58 = vadd.f32 %v1327_v55, %v1306_v54  ;;  %v1373_v59 = vadd.f32 %v1369_v57, %v1351_v56 }
 0x559   :  { %v1709_v60 = vmul.f32 -1.442695, %v1331_v58  ;;  %v1717_v61 = vmul.f32 -1.442695, %v1373_v59 }
 0x55b   :  { %1887 = vpow2.f32 %v1709_v60 }
 0x55c   :  { %1889 = vpow2.f32 %v1717_v61 }
 0x55d   :  { %v1411_v62 = vpop.f32.mrf.mxu2  ;;  %v1435_v0 = vpop.f32.mrf.mxu3 }
 0x55e   :  { %v1439_v1 = vadd.f32 %v1435_v0, %v1417_v63  ;;  %v1329_v2 = vpop.f32.mrf.mxu0  ;;  %v1371_v3 = vpop.f32.mrf.mxu1  ;;  %v1415_v15 = vadd.f32 %v1411_v62, %v1393_v12 }
 0x560   :  { %v1732_v4 = vmul.f32 -1.442695, %v1439_v1 }
 0x561   :  { %v1888_v5 = vpop.eup %1887 }
 0x562   :  { %v1890_v6 = vpop.eup %1889  ;;  %v1335_v7 = vadd.f32 1.0, %v1888_v5  ;;  %1891 = vpow2.f32 %v1732_v4 }
 0x563   :  { %v1377_v8 = vadd.f32 1.0, %v1890_v6 }
 0x564   :  { %1893 = vrcp.f32 %v1335_v7  ;;  %v1347_v21 = vand.u32 2147483648, %v1335_v7  ;;  %v1345_v24 = vand.u32 2147483647, %v1335_v7  ;;  %vm1341_vm2 = vweird.f32 %v1335_v7 }
 0x565   :  { %1895 = vrcp.f32 %v1377_v8  ;;  %v1413_v9 = vpop.f32.mrf.mxu2  ;;  %v1437_v10 = vpop.f32.mrf.mxu3  ;;  %v1389_v22 = vand.u32 2147483648, %v1377_v8  ;;  %v1387_v26 = vand.u32 2147483647, %v1377_v8  ;;  %vm1383_vm3 = vweird.f32 %v1377_v8 }
 0x566   :  { %v1348_v29 = vor.u32 1.1754944e-38, %v1347_v21  ;;  %vm1346_vm6 = vcmp.eq.f32.partialorder %v1345_v24, 8.507059e+37 }
 0x567   :  { %v1390_v33 = vor.u32 1.1754944e-38, %v1389_v22  ;;  %vm1388_vm7 = vcmp.eq.f32.partialorder %v1387_v26, 8.507059e+37 }
 0x568   :  { %v1892_v11 = vpop.eup %1891 }
 0x569   :  { %v1443_v13 = vadd.f32 1.0, %v1892_v11 }
 0x56a   :  { %v1894_v14 = vpop.eup %1893 }
 0x56b   :  { %v1896_v16 = vpop.eup %1895  ;;  %v1337_v17 = vmul.f32 %v1894_v14, %v1335_v7  ;;  %1897 = vrcp.f32 %v1443_v13  ;;  %vm1342_vm0 = vweird.f32 %v1894_v14  ;;  %v1455_v48 = vand.u32 2147483648, %v1443_v13 }
 0x56c   :  { %v1379_v18 = vmul.f32 %v1896_v16, %v1377_v8  ;;  %1899 = vtanh.f32 %v1415_v15  ;;  %vm1384_vm1 = vweird.f32 %v1896_v16  ;;  %vm1343_vm4 = vmor %vm1341_vm2, %vm1342_vm0  ;;  %vm1449_vm9 = vweird.f32 %v1443_v13 }
 0x56d   :  { %v1338_v19 = vsub.f32 1.0, %v1337_v17  ;;  %vm1385_vm5 = vmor %vm1383_vm3, %vm1384_vm1  ;;  %v1453_v49 = vand.u32 2147483647, %v1443_v13  ;;  %v1456_v50 = vor.u32 1.1754944e-38, %v1455_v48 }
 0x56e   :  { %v1380_v20 = vsub.f32 1.0, %v1379_v18 }
 0x56f   :  { %v1339_v23 = vmul.f32 %v1894_v14, %v1338_v19  ;;  %vm1454_vm11 = vcmp.eq.f32.partialorder %v1453_v49, 8.507059e+37 }
 0x570   :  { %v1381_v25 = vmul.f32 %v1896_v16, %v1380_v20 }
 0x571   :  { %v1898_v27 = vpop.eup %1897  ;;  %v1340_v28 = vadd.f32 %v1894_v14, %v1339_v23 }
 0x572   :  { %v1382_v30 = vadd.f32 %v1896_v16, %v1381_v25  ;;  %v1445_v31 = vmul.f32 %v1898_v27, %v1443_v13  ;;  %v1900_v36 = vpop.eup %1899  ;;  %vm1450_vm8 = vweird.f32 %v1898_v27 }
 0x573   :  { %v1344_v34 = vsel %vm1343_vm4, %v1894_v14, %v1340_v28  ;;  %vm1451_vm10 = vmor %vm1449_vm9, %vm1450_vm8 }
 0x574   :  { %v1349_v37 = vsel %vm1346_vm6, %v1348_v29, %v1344_v34  ;;  %v1386_v39 = vsel %vm1385_vm5, %v1896_v16, %v1382_v30  ;;  %v1446_v40 = vsub.f32 1.0, %v1445_v31 }
 0x575   :  { %v1391_v42 = vsel %vm1388_vm7, %v1390_v33, %v1386_v39  ;;  %v1460_v43 = vmul.f32 %v1900_v36, %v1349_v37 }
 0x576   :  { %v1459_v44 = vmul.f32 %v1391_v42, %v2157_v38  ;;  %v1447_v45 = vmul.f32 %v1898_v27, %v1446_v40 }
 0x578   :  { %v1461_v46 = vadd.f32 %v1460_v43, %v1459_v44  ;;  %v1448_v47 = vadd.f32 %v1898_v27, %v1447_v45 }
 0x57a   :  { %1901 = vtanh.f32 %v1461_v46  ;;  %v1452_v41 = vsel %vm1451_vm10, %v1898_v27, %v1448_v47 }
 0x57b   :  { %v1457_v32 = vsel %vm1454_vm11, %v1456_v50, %v1452_v41 }
 0x580   :  { %v1902_v51 = vpop.eup %1901 }
 0x581   :  { %v1463_v52 = vmul.f32 %v1902_v51, %v1457_v32 }
 0x583   :  { %1733 = vst.msk [vmem:[%s2177_s4 + $0xe] sm:$0x3] %vm337_vm13, %v1463_v52 }

</bundles_post_ra>
